<compile_context>
chip_gen: v7x
topology: tpu7x:2x2x1
jax: 0.10.0
libtpu: 0.0.40
codegen_flags: <defaults>
</compile_context>

<pallas_src>
import jax
import jax.numpy as jnp
from jax.experimental import pallas as pl
from jax.experimental.pallas import tpu as pltpu


_TAPS = tuple((dz, dy) for dz in range(3) for dy in range(3))


def _round_up(x, m):
    return (x + m - 1) // m * m


# ---------------------------------------------------------------------------
# VMEM limit: query the chip, never request the full physical VMEM (v7x!).
# ---------------------------------------------------------------------------
_VMEM_LIMIT = None


def _vmem_limit_bytes():
    global _VMEM_LIMIT
    if _VMEM_LIMIT is None:
        cap = 64 * 1024 * 1024                      # conservative (v7x-sized) fallback
        try:
            info = pltpu.get_tpu_info()
            for attr in ('vmem_capacity_bytes', 'vmem_bytes', 'vmem_size_bytes'):
                val = getattr(info, attr, None)
                if val:
                    cap = int(val)
                    break
        except Exception:
            pass
        # 3/4 of physical, capped at 96 MiB: ~96 MiB on v5e/v6e (128 MiB/TC),
        # ~48 MiB on v7x (64 MiB/TC) -> headroom for Mosaic internal scratch.
        _VMEM_LIMIT = min(96 * 1024 * 1024, (cap * 3) // 4)
    return _VMEM_LIMIT


# ---------------------------------------------------------------------------
# Capability probe: single-buffer grid-invariant operands (weights / bias)
# with pipeline_mode=pl.Buffered(1); fall back to default double-buffering if
# this JAX/Mosaic build rejects it.
# ---------------------------------------------------------------------------
_BUFFERED1_OK = None


def _buffered1_supported():
    global _BUFFERED1_OK
    if _BUFFERED1_OK is None:
        try:
            spec = pl.BlockSpec((8, 128), lambda i: (0, 0),
                                pipeline_mode=pl.Buffered(1))

            def _probe(x_ref, o_ref):
                o_ref[...] = x_ref[...] + 1.0

            out = pl.pallas_call(
                _probe,
                out_shape=jax.ShapeDtypeStruct((8, 128), jnp.float32),
                grid_spec=pltpu.PrefetchScalarGridSpec(
                    num_scalar_prefetch=0, grid=(2,),
                    in_specs=[spec],
                    out_specs=pl.BlockSpec((8, 128), lambda i: (0, 0))),
                compiler_params=pltpu.CompilerParams(
                    dimension_semantics=("parallel",)),
            )(jnp.zeros((8, 128), jnp.float32))
            _BUFFERED1_OK = bool(jax.block_until_ready(jnp.all(out == 1.0)))
        except Exception:
            _BUFFERED1_OK = False
    return _BUFFERED1_OK


# ---------------------------------------------------------------------------
# Pallas ConvBlock kernel: Conv3d(k=3, s=1, p=1) + bias + LeakyReLU(0.2)
# ---------------------------------------------------------------------------
def conv_block_kernel(x_ref, w_ref, b_ref, o_ref, xcat_ref):
    # x_ref   : (Nb, D+2, H+2, Kp)   bf16/f32  padded input, W & Cin folded on lanes
    # w_ref   : (9*Kc, W*Cout)       bf16      banded weights, taps concatenated on K
    # b_ref   : (1, W*Cout)          f32       bias pre-tiled along W
    # o_ref   : (Nb, D, H, W*Cout)   bf16/f32
    # xcat_ref: (Nb*D*H, 9*Kc)       bf16      im2col slab, lane-aligned tap chunks
    Nb, D, H, WCo = o_ref.shape
    Kp = x_ref.shape[3]
    Kc = xcat_ref.shape[1] // 9
    M = Nb * D * H

    # Assemble the 9 (dz, dy) shifted slabs once; the 3 dx taps live inside the
    # banded weight, so a single big-K MXU matmul does all the accumulation
    # internally (no f32 accumulator read-modify-write in VMEM, no zero-init).
    for t, (dz, dy) in enumerate(_TAPS):
        slab = x_ref[:, dz:dz + D, dy:dy + H, :].reshape(M, Kp)
        xcat_ref[:, t * Kc:t * Kc + Kp] = slab.astype(xcat_ref.dtype)
        if Kc > Kp:
            # Lane-alignment padding must be finite (its weight rows are zero).
            xcat_ref[:, t * Kc + Kp:(t + 1) * Kc] = jnp.zeros(
                (M, Kc - Kp), xcat_ref.dtype)

    acc = jnp.dot(xcat_ref[...], w_ref[...], preferred_element_type=jnp.float32)
    out = acc + b_ref[...]                          # bias (pre-tiled, f32)
    out = jnp.where(out >= 0, out, 0.2 * out)       # LeakyReLU(0.2)
    o_ref[...] = out.reshape(Nb, D, H, WCo).astype(o_ref.dtype)


def conv_block_pallas(x, p, out_dtype=jnp.bfloat16):
    """ConvBlock forward. x: (N, D, H, W, Cin) NDHWC -> (N, D, H, W, Cout)."""
    N, D, H, W, Cin = x.shape
    Cout = p['b_raw'].shape[0]
    Kp = (W + 2) * Cin
    Kc = _round_up(Kp, 128)
    WCo = W * Cout
    w_big = p['w_banded']                           # (9*Kc, W*Cout) bf16
    b_tiled = p['b_tiled']                          # (1, W*Cout)    f32
    assert w_big.shape == (9 * Kc, WCo), (w_big.shape, (9 * Kc, WCo))

    # bf16 activations into the kernel for the big (memory-bound) levels; the
    # packed-bf16 (Nb,D,H)->M collapse is layout-trivial only when H % 16 == 0,
    # so coarse (tiny) levels keep the proven f32 input path.
    in_dtype = jnp.bfloat16 if H % 16 == 0 else jnp.float32

    # Coarse levels: fold the whole batch into one grid step (one matmul with
    # M = N*D*H) instead of per-step launch overhead on near-empty tiles.
    if D * H >= 128 and WCo >= 256:
        nb, grid = 1, (N,)
    else:
        nb, grid = N, (1,)

    # Halo padding once per layer, in the (narrow) kernel input dtype.
    x_pad = jnp.pad(x.astype(in_dtype), ((0, 0), (1, 1), (1, 1), (1, 1), (0, 0)))
    x_fold = x_pad.reshape(N, D + 2, H + 2, Kp)     # free, contiguous

    def call(single_buffer_consts):
        const_kw = (dict(pipeline_mode=pl.Buffered(1))
                    if single_buffer_consts else {})
        return pl.pallas_call(
            conv_block_kernel,
            out_shape=jax.ShapeDtypeStruct((N, D, H, WCo), out_dtype),
            grid_spec=pltpu.PrefetchScalarGridSpec(
                num_scalar_prefetch=0,
                grid=grid,
                in_specs=[
                    pl.BlockSpec((nb, D + 2, H + 2, Kp), lambda n: (n, 0, 0, 0)),
                    pl.BlockSpec((9 * Kc, WCo), lambda n: (0, 0), **const_kw),
                    pl.BlockSpec((1, WCo), lambda n: (0, 0), **const_kw),
                ],
                out_specs=pl.BlockSpec((nb, D, H, WCo), lambda n: (n, 0, 0, 0)),
                scratch_shapes=[pltpu.VMEM((nb * D * H, 9 * Kc), jnp.bfloat16)],
            ),
            compiler_params=pltpu.CompilerParams(
                dimension_semantics=("parallel",),
                vmem_limit_bytes=_vmem_limit_bytes(),
            ),
        )(x_fold, w_big, b_tiled)

    if _buffered1_supported():
        try:
            out = call(True)
        except Exception:
            out = call(False)
    else:
        out = call(False)
    return out.reshape(N, D, H, W, Cout)


def conv_block_reference(x, p, out_dtype=jnp.bfloat16):
    """Same math via lax.conv_general_dilated (bf16 operands, f32 accumulation)."""
    w = jnp.transpose(p['w_raw'], (2, 3, 4, 1, 0)).astype(jnp.bfloat16)   # DHWIO
    out = jax.lax.conv_general_dilated(
        x.astype(jnp.bfloat16), w,
        window_strides=(1, 1, 1),
        padding=((1, 1), (1, 1), (1, 1)),
        dimension_numbers=('NDHWC', 'DHWIO', 'NDHWC'),
        preferred_element_type=jnp.float32)
    out = out + p['b_raw'][None, None, None, None, :]
    out = jnp.where(out >= 0, out, 0.2 * out)
    return out.astype(out_dtype)


# ---------------------------------------------------------------------------
# Parameter preparation (banded weights built once, outside the hot path)
# ---------------------------------------------------------------------------
def build_banded_weight(weight, W):
    """(Cout, Cin, 3, 3, 3) conv weight -> banded (9*Kc, W*Cout).

    Tap t = dz*3 + dy occupies rows [t*Kc, t*Kc + Kp) with
      big[t*Kc + xp*Cin + ci, x*Cout + co] = weight[co, ci, dz, dy, xp - x]
    for xp - x in {0, 1, 2}, else 0; rows [t*Kc+Kp, (t+1)*Kc) are zero
    (lane-alignment padding, Kc = round_up((W+2)*Cin, 128)).
    """
    Cout, Cin = weight.shape[0], weight.shape[1]
    Kp = (W + 2) * Cin
    Kc = _round_up(Kp, 128)
    w_taps = jnp.transpose(weight, (2, 3, 4, 1, 0))              # (3,3,3,Cin,Cout)
    eye = jnp.eye(W, dtype=weight.dtype)
    base = jnp.einsum('uw,zyxio->zyxuiwo', eye, w_taps)          # (3,3,3,W,Cin,W,Cout)
    base = base.reshape(3, 3, 3, W * Cin, W * Cout)
    per_tap = jnp.zeros((3, 3, Kc, W * Cout), weight.dtype)
    for dx in range(3):
        per_tap = per_tap.at[:, :, dx * Cin:dx * Cin + W * Cin, :].add(base[:, :, dx])
    return per_tap.reshape(9 * Kc, W * Cout)


def make_conv_params(key, cin, cout, W):
    kw, kb = jax.random.split(key)
    fan_in = cin * 27
    w = jax.random.normal(kw, (cout, cin, 3, 3, 3), jnp.float32) / (fan_in ** 0.5)
    b = 0.01 * jax.random.normal(kb, (cout,), jnp.float32)
    return {
        'w_raw': w,
        'b_raw': b,
        'w_banded': build_banded_weight(w, W).astype(jnp.bfloat16),
        'b_tiled': jnp.tile(b, W)[None, :].astype(jnp.float32),
    }


def default_unet_features():
    return [[16, 32, 32, 32], [32, 32, 32, 32, 32, 16, 1]]


def init_unet_params(key, inshape, infeats, film_dim=32, curve_length=3):
    enc_nf, dec_nf = default_unet_features()
    nb_dec_convs = len(enc_nf)
    final_convs = dec_nf[nb_dec_convs:]
    dec_nf = dec_nf[:nb_dec_convs]
    nb_levels = nb_dec_convs + 1            # nb_conv_per_level = 1
    W0 = inshape[-1]

    keys = iter(jax.random.split(key, 64))

    prev_nf = infeats
    encoder_nfs = [infeats]
    encoder = []
    for level in range(nb_levels - 1):
        nf = enc_nf[level]
        encoder.append([make_conv_params(next(keys), prev_nf, nf, W0 >> level)])
        prev_nf = nf
        encoder_nfs.append(prev_nf)
    encoder_nfs = encoder_nfs[::-1]          # np.flip

    decoder = []
    for level in range(nb_levels - 1):
        nf = dec_nf[level]
        W_here = W0 >> (nb_levels - 1 - level)
        decoder.append([make_conv_params(next(keys), prev_nf, nf, W_here)])
        prev_nf = nf
        prev_nf += encoder_nfs[level]        # half_res=False -> always concat skip

    remaining = []
    for nf in final_convs:
        remaining.append(make_conv_params(next(keys), prev_nf, nf, W0))
        prev_nf = nf

    film_w = 0.02 * jax.random.normal(next(keys), (2 * film_dim, curve_length),
                                      jnp.float32)     # init: normal(0, 0.02)
    film_b = jnp.zeros((2 * film_dim,), jnp.float32)    # init: constant 0
    return {
        'encoder': encoder, 'decoder': decoder, 'remaining': remaining,
        'film_w': film_w, 'film_b': film_b, 'film_dim': film_dim,
    }


# ---------------------------------------------------------------------------
# UnetWithFiLM forward (shared skeleton; conv_fn selects Pallas vs reference)
# ---------------------------------------------------------------------------
def avg_pool2(x):
    n, d, h, w, c = x.shape
    return x.reshape(n, d // 2, 2, h // 2, 2, w // 2, 2, c).mean(axis=(2, 4, 6))


def upsample_nearest2(x):
    x = jnp.repeat(x, 2, axis=1)
    x = jnp.repeat(x, 2, axis=2)
    return jnp.repeat(x, 2, axis=3)


def unet_with_film_forward(params, x_ncdhw, v, conv_fn):
    """Forward of UnetWithFiLM (half_res=False, nb_conv_per_level=1, max_pool=2)."""
    # FiLM parameter generator: Linear(curve_length -> 2*film_dim).
    film = v @ params['film_w'].T + params['film_b']
    fd = params['film_dim']
    gamma, beta = film[:, :fd], film[:, fd:]

    # Single layout change at entry: NCDHW -> NDHWC, bf16 inter-layer dtype.
    x = jnp.transpose(x_ncdhw, (0, 2, 3, 4, 1)).astype(jnp.bfloat16)

    x_history = [x]
    for level in params['encoder']:
        for conv_p in level:
            x = conv_fn(x, conv_p, jnp.bfloat16)
        x_history.append(x)
        x = avg_pool2(x)

    # FiLM at the bottleneck: gamma * x + beta, per channel.
    x = x * gamma[:, None, None, None, :] + beta[:, None, None, None, :]

    for level in params['decoder']:
        for conv_p in level:
            x = conv_fn(x, conv_p, jnp.bfloat16)
        x = upsample_nearest2(x)
        skip = x_history.pop()
        x = jnp.concatenate([x, skip], axis=-1)

    last = len(params['remaining']) - 1
    for i, conv_p in enumerate(params['remaining']):
        x = conv_fn(x, conv_p, jnp.float32 if i == last else jnp.bfloat16)

    # Single layout change at exit: NDHWC -> NCDHW (PyTorch convention).
    return jnp.transpose(x, (0, 4, 1, 2, 3))


if __name__ == "__main__":
    N, infeats, curve_length = 2, 2, 3
    inshape = (16, 16, 16)

    key = jax.random.PRNGKey(0)
    kx, kv, kp = jax.random.split(key, 3)
    x = jax.random.normal(kx, (N, infeats) + inshape, dtype=jnp.float32)
    v = jax.random.normal(kv, (N, curve_length), dtype=jnp.float32)
    params = init_unet_params(kp, inshape, infeats)

    out = unet_with_film_forward(params, x, v, conv_block_pallas)
    out = jax.block_until_ready(out)
    assert out.shape == (N, 1) + inshape, out.shape
    assert out.dtype == jnp.float32, out.dtype

    ref = jax.block_until_ready(
        unet_with_film_forward(params, x, v, conv_block_reference))
    err = float(jnp.max(jnp.abs(out - ref)))
    # Both paths feed identical bf16 activations into f32-accumulating convs at
    # every layer, so the residual is accumulation-order / rare rounding noise.
    assert err < 5e-2, f"max |pallas - reference| = {err}"

    print("KERNEL_OK")
</pallas_src>

<mosaic_0001>
module attributes {stable_mosaic.version = 11 : i64} {
  func.func @_probe(%arg0: i32, %arg1: memref<8x128xf32, #tpu.memory_space<vmem>>, %arg2: memref<8x128xf32, #tpu.memory_space<vmem>>) attributes {dimension_semantics = [#tpu.dimension_semantics<parallel>], iteration_bounds = array<i64: 2>, scalar_prefetch = 0 : i64, scratch_operands = 0 : i64, tpu.core_type = #tpu.core_type<tc>, window_params = [{pipeline_mode = #tpu.pipeline_mode<synchronous>, transform_indices = @transform_0, window_bounds = array<i64: 8, 128>}, {pipeline_mode = #tpu.pipeline_mode<synchronous>, transform_indices = @transform_1, window_bounds = array<i64: 8, 128>}]} {
    %c0 = arith.constant 0 : index
    %c0_0 = arith.constant 0 : index
    %0 = vector.load %arg1[%c0, %c0_0] : memref<8x128xf32, #tpu.memory_space<vmem>>, vector<8x128xf32>
    %cst = arith.constant 1.000000e+00 : f32
    %1 = vector.broadcast %cst : f32 to vector<8x128xf32>
    %2 = arith.addf %0, %1 : vector<8x128xf32>
    %c0_1 = arith.constant 0 : index
    %c0_2 = arith.constant 0 : index
    %3 = vector.load %arg2[%c0_1, %c0_2] : memref<8x128xf32, #tpu.memory_space<vmem>>, vector<8x128xf32>
    tpu.vector_store %arg2[%c0_1, %c0_2], %2 {strides = array<i32>} : memref<8x128xf32, #tpu.memory_space<vmem>>, vector<8x128xf32>,
    return
  }
  func.func @transform_0(%arg0: i32) -> (i32, i32) {
    %c0_i32 = arith.constant 0 : i32
    %c0_i32_0 = arith.constant 0 : i32
    %c0_i32_1 = arith.constant 0 : i32
    return %c0_i32, %c0_i32_0 : i32, i32
  }
  func.func @transform_1(%arg0: i32) -> (i32, i32) {
    %c0_i32 = arith.constant 0 : i32
    %c0_i32_0 = arith.constant 0 : i32
    %c0_i32_1 = arith.constant 0 : i32
    return %c0_i32, %c0_i32_0 : i32, i32
  }
}

module attributes {stable_mosaic.version = 11 : i64} {
  func.func @conv_block_kernel(%arg0: i32, %arg1: memref<1x18x18x36xbf16, #tpu.memory_space<vmem>>, %arg2: memref<1152x256xbf16, #tpu.memory_space<vmem>>, %arg3: memref<1x256xf32, #tpu.memory_space<vmem>>, %arg4: memref<1x16x16x256xbf16, #tpu.memory_space<vmem>>, %arg5: memref<256x1152xbf16, #tpu.memory_space<vmem>>) attributes {dimension_semantics = [#tpu.dimension_semantics<parallel>], iteration_bounds = array<i64: 2>, scalar_prefetch = 0 : i64, scratch_operands = 1 : i64, tpu.core_type = #tpu.core_type<tc>, window_params = [{transform_indices = @transform_0, window_bounds = array<i64: 1, 18, 18, 36>}, {pipeline_mode = #tpu.pipeline_mode<synchronous>, transform_indices = @transform_1, window_bounds = array<i64: 1152, 256>}, {pipeline_mode = #tpu.pipeline_mode<synchronous>, transform_indices = @transform_2, window_bounds = array<i64: 1, 256>}, {transform_indices = @transform_3, window_bounds = array<i64: 1, 16, 16, 256>}]} {
    %c0 = arith.constant 0 : index
    %c0_0 = arith.constant 0 : index
    %c0_1 = arith.constant 0 : index
    %c0_2 = arith.constant 0 : index
    %0 = vector.load %arg1[%c0, %c0_0, %c0_1, %c0_2] : memref<1x18x18x36xbf16, #tpu.memory_space<vmem>>, vector<1x16x16x36xbf16>
    %1 = vector.shape_cast %0 : vector<1x16x16x36xbf16> to vector<256x36xbf16>
    %c0_3 = arith.constant 0 : index
    %c0_4 = arith.constant 0 : index
    %2 = vector.load %arg5[%c0_3, %c0_4] : memref<256x1152xbf16, #tpu.memory_space<vmem>>, vector<256x36xbf16>
    tpu.vector_store %arg5[%c0_3, %c0_4], %1 {strides = array<i32>} : memref<256x1152xbf16, #tpu.memory_space<vmem>>, vector<256x36xbf16>,
    %cst = arith.constant 0.000000e+00 : bf16
    %3 = vector.broadcast %cst : bf16 to vector<256x92xbf16>
    %c0_5 = arith.constant 0 : index
    %c36 = arith.constant 36 : index
    %4 = vector.load %arg5[%c0_5, %c36] : memref<256x1152xbf16, #tpu.memory_space<vmem>>, vector<256x92xbf16>
    tpu.vector_store %arg5[%c0_5, %c36], %3 {strides = array<i32>} : memref<256x1152xbf16, #tpu.memory_space<vmem>>, vector<256x92xbf16>,
    %c0_6 = arith.constant 0 : index
    %c0_7 = arith.constant 0 : index
    %c1 = arith.constant 1 : index
    %c0_8 = arith.constant 0 : index
    %5 = vector.load %arg1[%c0_6, %c0_7, %c1, %c0_8] : memref<1x18x18x36xbf16, #tpu.memory_space<vmem>>, vector<1x16x16x36xbf16>
    %6 = vector.shape_cast %5 : vector<1x16x16x36xbf16> to vector<256x36xbf16>
    %c0_9 = arith.constant 0 : index
    %c128 = arith.constant 128 : index
    %7 = vector.load %arg5[%c0_9, %c128] : memref<256x1152xbf16, #tpu.memory_space<vmem>>, vector<256x36xbf16>
    tpu.vector_store %arg5[%c0_9, %c128], %6 {strides = array<i32>} : memref<256x1152xbf16, #tpu.memory_space<vmem>>, vector<256x36xbf16>,
    %cst_10 = arith.constant 0.000000e+00 : bf16
    %8 = vector.broadcast %cst_10 : bf16 to vector<256x92xbf16>
    %c0_11 = arith.constant 0 : index
    %c164 = arith.constant 164 : index
    %9 = vector.load %arg5[%c0_11, %c164] : memref<256x1152xbf16, #tpu.memory_space<vmem>>, vector<256x92xbf16>
    tpu.vector_store %arg5[%c0_11, %c164], %8 {strides = array<i32>} : memref<256x1152xbf16, #tpu.memory_space<vmem>>, vector<256x92xbf16>,
    %c0_12 = arith.constant 0 : index
    %c0_13 = arith.constant 0 : index
    %c2 = arith.constant 2 : index
    %c0_14 = arith.constant 0 : index
    %10 = vector.load %arg1[%c0_12, %c0_13, %c2, %c0_14] : memref<1x18x18x36xbf16, #tpu.memory_space<vmem>>, vector<1x16x16x36xbf16>
    %11 = vector.shape_cast %10 : vector<1x16x16x36xbf16> to vector<256x36xbf16>
    %c0_15 = arith.constant 0 : index
    %c256 = arith.constant 256 : index
    %12 = vector.load %arg5[%c0_15, %c256] : memref<256x1152xbf16, #tpu.memory_space<vmem>>, vector<256x36xbf16>
    tpu.vector_store %arg5[%c0_15, %c256], %11 {strides = array<i32>} : memref<256x1152xbf16, #tpu.memory_space<vmem>>, vector<256x36xbf16>,
    %cst_16 = arith.constant 0.000000e+00 : bf16
    %13 = vector.broadcast %cst_16 : bf16 to vector<256x92xbf16>
    %c0_17 = arith.constant 0 : index
    %c292 = arith.constant 292 : index
    %14 = vector.load %arg5[%c0_17, %c292] : memref<256x1152xbf16, #tpu.memory_space<vmem>>, vector<256x92xbf16>
    tpu.vector_store %arg5[%c0_17, %c292], %13 {strides = array<i32>} : memref<256x1152xbf16, #tpu.memory_space<vmem>>, vector<256x92xbf16>,
    %c0_18 = arith.constant 0 : index
    %c1_19 = arith.constant 1 : index
    %c0_20 = arith.constant 0 : index
    %c0_21 = arith.constant 0 : index
    %15 = vector.load %arg1[%c0_18, %c1_19, %c0_20, %c0_21] : memref<1x18x18x36xbf16, #tpu.memory_space<vmem>>, vector<1x16x16x36xbf16>
    %16 = vector.shape_cast %15 : vector<1x16x16x36xbf16> to vector<256x36xbf16>
    %c0_22 = arith.constant 0 : index
    %c384 = arith.constant 384 : index
    %17 = vector.load %arg5[%c0_22, %c384] : memref<256x1152xbf16, #tpu.memory_space<vmem>>, vector<256x36xbf16>
    tpu.vector_store %arg5[%c0_22, %c384], %16 {strides = array<i32>} : memref<256x1152xbf16, #tpu.memory_space<vmem>>, vector<256x36xbf16>,
    %cst_23 = arith.constant 0.000000e+00 : bf16
    %18 = vector.broadcast %cst_23 : bf16 to vector<256x92xbf16>
    %c0_24 = arith.constant 0 : index
    %c420 = arith.constant 420 : index
    %19 = vector.load %arg5[%c0_24, %c420] : memref<256x1152xbf16, #tpu.memory_space<vmem>>, vector<256x92xbf16>
    tpu.vector_store %arg5[%c0_24, %c420], %18 {strides = array<i32>} : memref<256x1152xbf16, #tpu.memory_space<vmem>>, vector<256x92xbf16>,
    %c0_25 = arith.constant 0 : index
    %c1_26 = arith.constant 1 : index
    %c1_27 = arith.constant 1 : index
    %c0_28 = arith.constant 0 : index
    %20 = vector.load %arg1[%c0_25, %c1_26, %c1_27, %c0_28] : memref<1x18x18x36xbf16, #tpu.memory_space<vmem>>, vector<1x16x16x36xbf16>
    %21 = vector.shape_cast %20 : vector<1x16x16x36xbf16> to vector<256x36xbf16>
    %c0_29 = arith.constant 0 : index
    %c512 = arith.constant 512 : index
    %22 = vector.load %arg5[%c0_29, %c512] : memref<256x1152xbf16, #tpu.memory_space<vmem>>, vector<256x36xbf16>
    tpu.vector_store %arg5[%c0_29, %c512], %21 {strides = array<i32>} : memref<256x1152xbf16, #tpu.memory_space<vmem>>, vector<256x36xbf16>,
    %cst_30 = arith.constant 0.000000e+00 : bf16
    %23 = vector.broadcast %cst_30 : bf16 to vector<256x92xbf16>
    %c0_31 = arith.constant 0 : index
    %c548 = arith.constant 548 : index
    %24 = vector.load %arg5[%c0_31, %c548] : memref<256x1152xbf16, #tpu.memory_space<vmem>>, vector<256x92xbf16>
    tpu.vector_store %arg5[%c0_31, %c548], %23 {strides = array<i32>} : memref<256x1152xbf16, #tpu.memory_space<vmem>>, vector<256x92xbf16>,
    %c0_32 = arith.constant 0 : index
    %c1_33 = arith.constant 1 : index
    %c2_34 = arith.constant 2 : index
    %c0_35 = arith.constant 0 : index
    %25 = vector.load %arg1[%c0_32, %c1_33, %c2_34, %c0_35] : memref<1x18x18x36xbf16, #tpu.memory_space<vmem>>, vector<1x16x16x36xbf16>
    %26 = vector.shape_cast %25 : vector<1x16x16x36xbf16> to vector<256x36xbf16>
    %c0_36 = arith.constant 0 : index
    %c640 = arith.constant 640 : index
    %27 = vector.load %arg5[%c0_36, %c640] : memref<256x1152xbf16, #tpu.memory_space<vmem>>, vector<256x36xbf16>
    tpu.vector_store %arg5[%c0_36, %c640], %26 {strides = array<i32>} : memref<256x1152xbf16, #tpu.memory_space<vmem>>, vector<256x36xbf16>,
    %cst_37 = arith.constant 0.000000e+00 : bf16
    %28 = vector.broadcast %cst_37 : bf16 to vector<256x92xbf16>
    %c0_38 = arith.constant 0 : index
    %c676 = arith.constant 676 : index
    %29 = vector.load %arg5[%c0_38, %c676] : memref<256x1152xbf16, #tpu.memory_space<vmem>>, vector<256x92xbf16>
    tpu.vector_store %arg5[%c0_38, %c676], %28 {strides = array<i32>} : memref<256x1152xbf16, #tpu.memory_space<vmem>>, vector<256x92xbf16>,
    %c0_39 = arith.constant 0 : index
    %c2_40 = arith.constant 2 : index
    %c0_41 = arith.constant 0 : index
    %c0_42 = arith.constant 0 : index
    %30 = vector.load %arg1[%c0_39, %c2_40, %c0_41, %c0_42] : memref<1x18x18x36xbf16, #tpu.memory_space<vmem>>, vector<1x16x16x36xbf16>
    %31 = vector.shape_cast %30 : vector<1x16x16x36xbf16> to vector<256x36xbf16>
    %c0_43 = arith.constant 0 : index
    %c768 = arith.constant 768 : index
    %32 = vector.load %arg5[%c0_43, %c768] : memref<256x1152xbf16, #tpu.memory_space<vmem>>, vector<256x36xbf16>
    tpu.vector_store %arg5[%c0_43, %c768], %31 {strides = array<i32>} : memref<256x1152xbf16, #tpu.memory_space<vmem>>, vector<256x36xbf16>,
    %cst_44 = arith.constant 0.000000e+00 : bf16
    %33 = vector.broadcast %cst_44 : bf16 to vector<256x92xbf16>
    %c0_45 = arith.constant 0 : index
    %c804 = arith.constant 804 : index
    %34 = vector.load %arg5[%c0_45, %c804] : memref<256x1152xbf16, #tpu.memory_space<vmem>>, vector<256x92xbf16>
    tpu.vector_store %arg5[%c0_45, %c804], %33 {strides = array<i32>} : memref<256x1152xbf16, #tpu.memory_space<vmem>>, vector<256x92xbf16>,
    %c0_46 = arith.constant 0 : index
    %c2_47 = arith.constant 2 : index
    %c1_48 = arith.constant 1 : index
    %c0_49 = arith.constant 0 : index
    %35 = vector.load %arg1[%c0_46, %c2_47, %c1_48, %c0_49] : memref<1x18x18x36xbf16, #tpu.memory_space<vmem>>, vector<1x16x16x36xbf16>
    %36 = vector.shape_cast %35 : vector<1x16x16x36xbf16> to vector<256x36xbf16>
    %c0_50 = arith.constant 0 : index
    %c896 = arith.constant 896 : index
    %37 = vector.load %arg5[%c0_50, %c896] : memref<256x1152xbf16, #tpu.memory_space<vmem>>, vector<256x36xbf16>
    tpu.vector_store %arg5[%c0_50, %c896], %36 {strides = array<i32>} : memref<256x1152xbf16, #tpu.memory_space<vmem>>, vector<256x36xbf16>,
    %cst_51 = arith.constant 0.000000e+00 : bf16
    %38 = vector.broadcast %cst_51 : bf16 to vector<256x92xbf16>
    %c0_52 = arith.constant 0 : index
    %c932 = arith.constant 932 : index
    %39 = vector.load %arg5[%c0_52, %c932] : memref<256x1152xbf16, #tpu.memory_space<vmem>>, vector<256x92xbf16>
    tpu.vector_store %arg5[%c0_52, %c932], %38 {strides = array<i32>} : memref<256x1152xbf16, #tpu.memory_space<vmem>>, vector<256x92xbf16>,
    %c0_53 = arith.constant 0 : index
    %c2_54 = arith.constant 2 : index
    %c2_55 = arith.constant 2 : index
    %c0_56 = arith.constant 0 : index
    %40 = vector.load %arg1[%c0_53, %c2_54, %c2_55, %c0_56] : memref<1x18x18x36xbf16, #tpu.memory_space<vmem>>, vector<1x16x16x36xbf16>
    %41 = vector.shape_cast %40 : vector<1x16x16x36xbf16> to vector<256x36xbf16>
    %c0_57 = arith.constant 0 : index
    %c1024 = arith.constant 1024 : index
    %42 = vector.load %arg5[%c0_57, %c1024] : memref<256x1152xbf16, #tpu.memory_space<vmem>>, vector<256x36xbf16>
    tpu.vector_store %arg5[%c0_57, %c1024], %41 {strides = array<i32>} : memref<256x1152xbf16, #tpu.memory_space<vmem>>, vector<256x36xbf16>,
    %cst_58 = arith.constant 0.000000e+00 : bf16
    %43 = vector.broadcast %cst_58 : bf16 to vector<256x92xbf16>
    %c0_59 = arith.constant 0 : index
    %c1060 = arith.constant 1060 : index
    %44 = vector.load %arg5[%c0_59, %c1060] : memref<256x1152xbf16, #tpu.memory_space<vmem>>, vector<256x92xbf16>
    tpu.vector_store %arg5[%c0_59, %c1060], %43 {strides = array<i32>} : memref<256x1152xbf16, #tpu.memory_space<vmem>>, vector<256x92xbf16>,
    %c0_60 = arith.constant 0 : index
    %c0_61 = arith.constant 0 : index
    %45 = vector.load %arg5[%c0_60, %c0_61] : memref<256x1152xbf16, #tpu.memory_space<vmem>>, vector<256x1152xbf16>
    %c0_62 = arith.constant 0 : index
    %c0_63 = arith.constant 0 : index
    %46 = vector.load %arg2[%c0_62, %c0_63] : memref<1152x256xbf16, #tpu.memory_space<vmem>>, vector<1152x256xbf16>
    %cst_64 = arith.constant dense<0.000000e+00> : vector<256x256xf32>
    %47 = tpu.matmul %45, %46, %cst_64 {dimension_numbers = #tpu.dot_dimension_numbers<[1], [0], [0], [1], [0, 0, 1, 1], [], []>} : vector<256x1152xbf16>, vector<1152x256xbf16>, vector<256x256xf32> -> vector<256x256xf32>
    %c0_65 = arith.constant 0 : index
    %c0_66 = arith.constant 0 : index
    %48 = vector.load %arg3[%c0_65, %c0_66] : memref<1x256xf32, #tpu.memory_space<vmem>>, vector<1x256xf32>
    %49 = vector.broadcast %48 : vector<1x256xf32> to vector<256x256xf32>
    %50 = arith.addf %47, %49 : vector<256x256xf32>
    %cst_67 = arith.constant 0.000000e+00 : f32
    %51 = vector.broadcast %cst_67 : f32 to vector<256x256xf32>
    %52 = arith.cmpf oge, %50, %51 : vector<256x256xf32>
    %cst_68 = arith.constant 2.000000e-01 : f32
    %53 = vector.broadcast %cst_68 : f32 to vector<256x256xf32>
    %54 = arith.mulf %53, %50 : vector<256x256xf32>
    %55 = arith.select %52, %50, %54 : vector<256x256xi1>, vector<256x256xf32>
    %56 = vector.shape_cast %55 : vector<256x256xf32> to vector<1x16x16x256xf32>
    %57 = arith.truncf %56 : vector<1x16x16x256xf32> to vector<1x16x16x256xbf16>
    %c0_69 = arith.constant 0 : index
    %c0_70 = arith.constant 0 : index
    %c0_71 = arith.constant 0 : index
    %c0_72 = arith.constant 0 : index
    %58 = vector.load %arg4[%c0_69, %c0_70, %c0_71, %c0_72] : memref<1x16x16x256xbf16, #tpu.memory_space<vmem>>, vector<1x16x16x256xbf16>
    tpu.vector_store %arg4[%c0_69, %c0_70, %c0_71, %c0_72], %57 {strides = array<i32>} : memref<1x16x16x256xbf16, #tpu.memory_space<vmem>>, vector<1x16x16x256xbf16>,
    return
  }
  func.func @transform_0(%arg0: i32) -> (i32, i32, i32, i32) {
    %c0_i32 = arith.constant 0 : i32
    %c0_i32_0 = arith.constant 0 : i32
    %c0_i32_1 = arith.constant 0 : i32
    %c0_i32_2 = arith.constant 0 : i32
    return %arg0, %c0_i32, %c0_i32_0, %c0_i32_1 : i32, i32, i32, i32
  }
  func.func @transform_1(%arg0: i32) -> (i32, i32) {
    %c0_i32 = arith.constant 0 : i32
    %c0_i32_0 = arith.constant 0 : i32
    %c0_i32_1 = arith.constant 0 : i32
    return %c0_i32, %c0_i32_0 : i32, i32
  }
  func.func @transform_2(%arg0: i32) -> (i32, i32) {
    %c0_i32 = arith.constant 0 : i32
    %c0_i32_0 = arith.constant 0 : i32
    %c0_i32_1 = arith.constant 0 : i32
    return %c0_i32, %c0_i32_0 : i32, i32
  }
  func.func @transform_3(%arg0: i32) -> (i32, i32, i32, i32) {
    %c0_i32 = arith.constant 0 : i32
    %c0_i32_0 = arith.constant 0 : i32
    %c0_i32_1 = arith.constant 0 : i32
    %c0_i32_2 = arith.constant 0 : i32
    return %arg0, %c0_i32, %c0_i32_0, %c0_i32_1 : i32, i32, i32, i32
  }
}

</mosaic_0001>

<bundles_post_ra>
// kernel: tpu_custom_call.1
= control target key start
LH: loop header
LB: loop body
LE: loop exit
PB: predicated region body
PF: predicated region fallthrough
CT: control target
= control target key end

     0   :  { %6 = vsyncpa [#allocation3], 0  ;;  %s341_s0 = inlined_call_operand.hbm [shape: f32[8,128], index: 0, kind: input, shape index: {}]   ;;  %s342_s1 = inlined_call_operand.hbm [shape: f32[8,128], index: 1, kind: output, shape index: {}]  }
   0x1   :  { %7 = vsyncpa [#allocation4], 0  ;;  %s262_s6 = smov 0  }
   0x2 LB: > { %s145_s7 = sadd.s32 4294967295, %s248_s6   ;;  %p146_p0 = scmp.ge.s32.totalorder %s248_s6, 1  ;;  %s248_s6 = sphi %s262_s6, %s13_s6  }
   0x3   : > { %p60_p1 = scmp.lt.s32.totalorder %s248_s6, 3  ;;  %p276_p3 = scmp.eq.s32.totalorder %s145_s7, 0 }
   0x4   : > { %s250_s10 = smov [#allocation2]   ;;  %s180_s15 = scalar_lea.hbm %s341_s0, 128 }
   0x5   : > { %p270_p2 = pnand %p146_p0, %p60_p1  ;;  %s73_s11 = sshll.u32 %s250_s10, 4  ;;  %s74_s11 = int_to_ptr.vmem [resolvable:$true] %s73_s11 }
   0x6   : > { %s347_s9 = scalar_select %p276_p3, 1, 0 }
   0x7   : > { %s346_s8 = scalar_select %p270_p2, 1, 0 }
   0x8   : > { %p162_p4 = pneg %p270_p2  ;;  %p181_p6 = scmp.ne.s32.totalorder %s341_s0, %s180_s15 }
   0x9   : > { %p187_p10 = scmp.lt.u32.totalorder %s180_s15, %s341_s0 }
   0xa   : > { %p284_p5 = pnand %p276_p3, %p162_p4 }
   0xc   : > { %p182_p7 = pneg %p284_p5 }
   0xe   : > { %p183_p8 = pnand %p182_p7, %p181_p6 }
  0x10   : > { %p184_p9 = pneg %p183_p8 }
  0x12   : > { %p189_p11 = pnand %p187_p10, %p184_p9 }
  0x14   : > { %192 = shalt.err (!%p189_p11)
}
  0x15   : > { %s193_s20 = scalar_lea.vmem %s74_s11, 128  ;;  %p201_p1 = scmp.lt.s32.totalorder %s74_s11, %s74_s11 }
  0x16   : > { %p194_p12 = scmp.ne.s32.totalorder %s74_s11, %s193_s20  ;;  %p202_p4 = scmp.lt.s32.totalorder %s193_s20, %s193_s20 }
  0x18   : > { %p196_p13 = pnand %p194_p12, %p182_p7  ;;  %p203_p3 = por %p202_p4, %p201_p1 }
  0x1a   : > { %p197_p0 = pneg %p196_p13 }
  0x1c   : > { %p204_p2 = pnand %p203_p3, %p197_p0 }
  0x1e   : > { %207 = shalt.err (!%p204_p2)
}
  0x1f   : > { %165 = dma.hbm_to_vmem [thread:$0]  (!%p284_p5), %s341_s0, 128, %s74_s11, [#allocation3]  }
  0x20   : > { %p349_p6 = scmp.ne.s32.totalorder %s346_s8, 0 }
  0x21   : > { %p350_p8 = scmp.ne.s32.totalorder (!%p349_p6), %s347_s9, 0 }
  0x22   : > { %86 = sbr.rel (%p349_p6) target bundleno = 67 (0x43), region = 24 }
  0x29   : > { %239 = dma.done.wait (%p350_p8), [#allocation3], 128  }
  0x2a   : > { %241 = vsyncadd (%p350_p8), [#allocation3], 4294967168  ;;  %s251_s23 = smov [#allocation5]   ;;  %v96_v0 = vld [vmem:[#allocation2] sm:$0xff]  ;;  %p312_p2 = scmp.eq.s32.totalorder %s145_s7, 1 }
  0x2b   : > { %s106_s24 = sshll.u32 %s251_s23, 4  ;;  %v97_v1 = vadd.f32 1.0, %v96_v0  ;;  %s107_s24 = int_to_ptr.vmem [resolvable:$true] %s106_s24 }
  0x2c   : > { %s208_s26 = scalar_lea.vmem %s107_s24, 128  ;;  %p215_p9 = scmp.lt.s32.totalorder %s107_s24, %s107_s24 }
  0x2d   : > { %98 = vst [vmem:[#allocation5] sm:$0xff] %v97_v1  ;;  %p209_p3 = scmp.ne.s32.totalorder %s107_s24, %s208_s26  ;;  %p216_p10 = scmp.lt.s32.totalorder %s208_s26, %s208_s26 }
  0x2f   : > { %p210_p5 = pnand %p209_p3, %p312_p2  ;;  %p217_p11 = por %p216_p10, %p215_p9 }
  0x31   : > { %p211_p7 = pneg %p210_p5 }
  0x33   : > { %p218_p12 = pnand %p217_p11, %p211_p7 }
  0x35   : > { %221 = shalt.err (!%p218_p12)
}
  0x36   : > { %s222_s29 = scalar_lea.hbm %s342_s1, 128 }
  0x37   : > { %p223_p13 = scmp.ne.s32.totalorder %s342_s1, %s222_s29  ;;  %p228_p4 = scmp.lt.u32.totalorder %s222_s29, %s342_s1 }
  0x39   : > { %p224_p0 = pnand %p223_p13, %p312_p2 }
  0x3b   : > { %p225_p1 = pneg %p224_p0 }
  0x3d   : > { %p230_p6 = pnand %p228_p4, %p225_p1 }
  0x3f   : > { %233 = shalt.err (!%p230_p6)
}
  0x40   : > { %159 = dma.vmem_to_hbm [thread:$0]  (%p312_p2), %s107_s24, 128, %s342_s1, [#allocation4]  }
  0x41   : > { %243 = dma.done.wait (%p312_p2), [#allocation4], 128  }
  0x42   : > { %245 = vsyncadd (%p312_p2), [#allocation4], 4294967168 }
  0x43 PF: > { %s13_s6 = sadd.s32 1, %s248_s6  }
  0x44   : > { %p10_p8 = scmp.ge.s32.totalorder %s13_s6, 4  }
  0x46   :  { %12 = sbr.rel (!%p10_p8) target bundleno = 2 (0x2), region = 53 }
  0x4d   :  { %119 = vsyncpa [#allocation3], 1 }
  0x4e   :  { %121 = vsyncpa [#allocation3 + $0x1], 1 }
  0x4f   :  { %122 = vsyncpa [#allocation4], 1 }
  0x50   :  { %124 = vsyncpa [#allocation4 + $0x1], 1 }

// kernel: tpu_custom_call.1
= control target key start
LH: loop header
LB: loop body
LE: loop exit
PB: predicated region body
PF: predicated region fallthrough
CT: control target
= control target key end

     0   :  { %8 = vsyncpa [#allocation4], 0  ;;  %s8669_s0 = inlined_call_operand.vmem [shape: bf16[2,18,18,36], index: 0, kind: input, shape index: {}]   ;;  %s8670_s1 = inlined_call_operand.hbm [shape: bf16[1152,256], index: 1, kind: input, shape index: {}]   ;;  %s8671_s2 = inlined_call_operand.vmem [shape: f32[1,256], index: 2, kind: input, shape index: {}]   ;;  %s8672_s3 = inlined_call_operand.hbm [shape: bf16[2,16,16,256], index: 3, kind: output, shape index: {}]  }
   0x1   :  { %9 = vsyncpa [#allocation5], 0 }
   0x2   :  { %11 = vsyncpa [#allocation5 + $0x1], 0  ;;  %s7157_s12 = smov 0   ;;  %s7159_s13 = smov 0  }
   0x3   :  { %s7161_s14 = smov 0   ;;  %s7163_s15 = smov 0  }
   0x4 LB: > { %s7178_s16 = sadd.s32 4294967295, %s7128_s15   ;;  %s5660_s17 = sadd.s32 4294967294, %s7128_s15   ;;  %s7128_s15 = sphi %s7163_s15, %s8692_s15   ;;  %s7124_s14 = sphi %s7161_s14, %s8691_s14   ;;  %s7120_s13 = sphi %s7159_s13, %s8690_s13   ;;  %s7116_s12 = sphi %s7157_s12, %s8689_s12  }
   0x5   : > { %s7182_s18 = sadd.s32 1, %s7128_s15   ;;  %s92_s19 = sadd.s32 1, %s7124_s14 }
   0x6   : > { %s89_s20 = ssub.s32 %s7128_s15, %s7182_s18  ;;  %p102_p0 = scmp.ne.s32.totalorder %s7124_s14, %s7120_s13 }
   0x7   : > { %p90_p1 = scmp.eq.s32.totalorder %s89_s20, 0  ;;  %p103_p2 = scmp.eq.s32.totalorder %s7178_s16, 1 }
   0x8   : > { %p108_p3 = scmp.ne.s32.totalorder %s7120_s13, %s7116_s12  ;;  %p109_p4 = scmp.eq.s32.totalorder %s5660_s17, 1 }
   0x9   : > { %s7193_s21 = scalar_select %p90_p1, %s7124_s14, %s92_s19  }
   0xa   : > { %p7195_p5 = por %p103_p2, %p102_p0  ;;  %p7199_p6 = por %p109_p4, %p108_p3 }
   0xb   : > { %p5661_p7 = scmp.ge.s32.totalorder %s7128_s15, 1  ;;  %p116_p8 = scmp.lt.s32.totalorder %s7128_s15, 3 }
   0xc   : > { %s8676_s22 = scalar_select %p7195_p5, 1, 0 }
   0xd   : > { %s8677_s23 = scalar_select %p7199_p6, 1, 0 }
   0xe   : > { %p8673_p9 = scmp.eq.s32.totalorder %s7178_s16, 0  ;;  %p7206_p10 = pnand %p5661_p7, %p116_p8 }
   0xf   : > { %s7130_s25 = smov [#allocation3]   ;;  %s7034_s30 = scalar_lea.hbm %s8670_s1, 18432 }
  0x10   : > { %s8678_s24 = scalar_select %p7206_p10, 1, 0 }
  0x11   : > { %s128_s26 = sshll.u32 %s7130_s25, 4  ;;  %p6689_p11 = pneg %p7206_p10  ;;  %s129_s26 = int_to_ptr.vmem [resolvable:$true] %s128_s26 }
  0x12   : > { %p7035_p13 = scmp.ne.s32.totalorder %s8670_s1, %s7034_s30  ;;  %p7041_p3 = scmp.lt.u32.totalorder %s7034_s30, %s8670_s1 }
  0x13   : > { %p7214_p12 = pnand %p8673_p9, %p6689_p11 }
  0x15   : > { %p7036_p0 = pneg %p7214_p12 }
  0x17   : > { %p7037_p1 = pnand %p7036_p0, %p7035_p13 }
  0x19   : > { %p7038_p2 = pneg %p7037_p1 }
  0x1b   : > { %p7043_p4 = pnand %p7041_p3, %p7038_p2 }
  0x1d   : > { %7046 = shalt.err (!%p7043_p4)
}
  0x1e   : > { %s7047_s8 = scalar_lea.vmem %s129_s26, 18432  ;;  %p7055_p9 = scmp.lt.s32.totalorder %s129_s26, %s129_s26 }
  0x1f   : > { %p7048_p7 = scmp.ne.s32.totalorder %s129_s26, %s7047_s8  ;;  %p7056_p6 = scmp.lt.s32.totalorder %s7047_s8, %s7047_s8 }
  0x21   : > { %p7050_p8 = pnand %p7048_p7, %p7036_p0  ;;  %p7057_p5 = por %p7056_p6, %p7055_p9 }
  0x23   : > { %p7051_p11 = pneg %p7050_p8 }
  0x25   : > { %p7058_p10 = pnand %p7057_p5, %p7051_p11 }
  0x27   : > { %7061 = shalt.err (!%p7058_p10)
}
  0x28   : > { %s7131_s9 = smov 128   ;;  %s7132_s10 = smov 8  }
  0x29   : > { %6692 = dma.hbm_to_vmem [thread:$0]  (!%p7214_p12), %s8670_s1, 18432, %s129_s26, [#allocation4], %s7131_s9, %s7131_s9, %s7132_s10  }
  0x2a   : > { %p8680_p13 = scmp.ne.s32.totalorder %s8678_s24, 0 }
  0x2b   : > { %p8681_p1 = scmp.eq.s32.totalorder (!%p8680_p13), %s7178_s16, 0 }
  0x2c   : > { %155 = sbr.rel (%p8680_p13) target bundleno = 710 (0x2c6), region = 32 }
  0x33   : > { %7107 = dma.done.wait (%p8681_p1), [#allocation4], 18432   ;;  %p8682_p0 = pmov %p8681_p1 }
  0x34   : > { %v6738_v0 = vld [vmem:[#allocation3 + $0x4] ss:$8 sps:$4 sm:$0xff]   ;;  %v6742_v2 = vld [vmem:[#allocation3] ss:$8 sps:$4 sm:$0xff]   ;;  %v6744_v4 = vld [vmem:[#allocation3 + $0x14] ss:$8 sps:$4 sm:$0xff]  }
  0x35   : > { %7109 = vsyncadd (%p8682_p0), [#allocation4], 4294948864  ;;  %v6740_v1 = vld [vmem:[#allocation3 + $0x204] ss:$8 sps:$4 sm:$0xff]   ;;  %4191 = vmatprep.subr.bf16.mxu1 %v6738_v0  ;;  %v6743_v3 = vld [vmem:[#allocation3 + $0x200] ss:$8 sps:$4 sm:$0xff]  }
  0x36   : > { %4577 = vmatprep.subr.bf16.mxu0 %v6740_v1  ;;  %4192 = vmatpush1.bf16.msra.mxu1 %v6742_v2  ;;  %v6746_v5 = vld [vmem:[#allocation3 + $0x214] ss:$8 sps:$4 sm:$0xff]   ;;  %v6748_v6 = vld [vmem:[#allocation3 + $0x10] ss:$8 sps:$4 sm:$0xff]   ;;  %v6750_v8 = vld [vmem:[#allocation3 + $0x24] ss:$8 sps:$4 sm:$0xff]  }
  0x37   : > { %4578 = vmatpush1.bf16.msra.mxu0 %v6743_v3  ;;  %4193 = vmatprep.subr.bf16.mxu1 %v6744_v4  ;;  %v6749_v7 = vld [vmem:[#allocation3 + $0x210] ss:$8 sps:$4 sm:$0xff]   ;;  %v6752_v9 = vld [vmem:[#allocation3 + $0x224] ss:$8 sps:$4 sm:$0xff]   ;;  %v6754_v10 = vld [vmem:[#allocation3 + $0x20] ss:$8 sps:$4 sm:$0xff]  }
  0x38   : > { %4579 = vmatprep.subr.bf16.mxu0 %v6746_v5  ;;  %v6755_v11 = vld [vmem:[#allocation3 + $0x220] ss:$8 sps:$4 sm:$0xff]   ;;  %v6756_v12 = vld [vmem:[#allocation3 + $0x34] ss:$8 sps:$4 sm:$0xff]   ;;  %v6760_v14 = vld [vmem:[#allocation3 + $0x30] ss:$8 sps:$4 sm:$0xff]  }
  0x39   : > { %v6758_v13 = vld [vmem:[#allocation3 + $0x234] ss:$8 sps:$4 sm:$0xff]   ;;  %v6761_v15 = vld [vmem:[#allocation3 + $0x230] ss:$8 sps:$4 sm:$0xff]   ;;  %v6762_v16 = vld [vmem:[#allocation3 + $0x44] ss:$8 sps:$4 sm:$0xff]  }
  0x3a   : > { %4194 = vmatpush1.bf16.msra.mxu1 %v6748_v6  ;;  %v6764_v17 = vld [vmem:[#allocation3 + $0x244] ss:$8 sps:$4 sm:$0xff]   ;;  %v6766_v18 = vld [vmem:[#allocation3 + $0x40] ss:$8 sps:$4 sm:$0xff]   ;;  %v6768_v20 = vld [vmem:[#allocation3 + $0x54] ss:$8 sps:$4 sm:$0xff]  }
  0x3b   : > { %4580 = vmatpush1.bf16.msra.mxu0 %v6749_v7  ;;  %4195 = vmatprep.subr.bf16.mxu1 %v6750_v8  ;;  %v6767_v19 = vld [vmem:[#allocation3 + $0x240] ss:$8 sps:$4 sm:$0xff]   ;;  %v6770_v21 = vld [vmem:[#allocation3 + $0x254] ss:$8 sps:$4 sm:$0xff]   ;;  %v6772_v22 = vld [vmem:[#allocation3 + $0x50] ss:$8 sps:$4 sm:$0xff]  }
  0x3c   : > { %4581 = vmatprep.subr.bf16.mxu0 %v6752_v9  ;;  %v6773_v23 = vld [vmem:[#allocation3 + $0x250] ss:$8 sps:$4 sm:$0xff]   ;;  %v6774_v24 = vld [vmem:[#allocation3 + $0x64] ss:$8 sps:$4 sm:$0xff]   ;;  %v6778_v26 = vld [vmem:[#allocation3 + $0x60] ss:$8 sps:$4 sm:$0xff]  }
  0x3d   : > { %v6776_v25 = vld [vmem:[#allocation3 + $0x264] ss:$8 sps:$4 sm:$0xff]   ;;  %v6779_v27 = vld [vmem:[#allocation3 + $0x260] ss:$8 sps:$4 sm:$0xff]   ;;  %v6780_v28 = vld [vmem:[#allocation3 + $0x74] ss:$8 sps:$4 sm:$0xff]  }
  0x3e   : > { %4196 = vmatpush1.bf16.msra.mxu1 %v6754_v10  ;;  %v6782_v29 = vld [vmem:[#allocation3 + $0x274] ss:$8 sps:$4 sm:$0xff]   ;;  %v6784_v30 = vld [vmem:[#allocation3 + $0x70] ss:$8 sps:$4 sm:$0xff]   ;;  %p179_p5 = scmp.lt.s32.totalorder %s7178_s16, 1  ;;  %vm313_vm0 = vcmask 293888  }
  0x3f   : > { %4582 = vmatpush1.bf16.msra.mxu0 %v6755_v11  ;;  %4197 = vmatprep.subr.bf16.mxu1 %v6756_v12  ;;  %v6785_v31 = vld [vmem:[#allocation3 + $0x270] ss:$8 sps:$4 sm:$0xff]   ;;  %v6786_v32 = vld [vmem:[#allocation3 + $0x84] ss:$8 sps:$4 sm:$0xff]   ;;  %v6790_v34 = vld [vmem:[#allocation3 + $0x80] ss:$8 sps:$4 sm:$0xff]  }
  0x40   : > { %4583 = vmatprep.subr.bf16.mxu0 %v6758_v13  ;;  %v6788_v33 = vld [vmem:[#allocation3 + $0x284] ss:$8 sps:$4 sm:$0xff]   ;;  %v6791_v35 = vld [vmem:[#allocation3 + $0x280] ss:$8 sps:$4 sm:$0xff]   ;;  %s180_s19 = scalar_select %p179_p5, %s7178_s16, 1  ;;  %vm330_vm1 = vcmask 1047840  }
  0x41   : > { %v6792_v36 = vld [vmem:[#allocation3 + $0x94] ss:$8 sps:$4 sm:$0xff]   ;;  %v6796_v38 = vld [vmem:[#allocation3 + $0x90] ss:$8 sps:$4 sm:$0xff]   ;;  %v6798_v40 = vld [vmem:[#allocation3 + $0xa4] ss:$8 sps:$4 sm:$0xff]  }
  0x42   : > { %4198 = vmatpush1.bf16.msra.mxu1 %v6760_v14  ;;  %v6794_v37 = vld [vmem:[#allocation3 + $0x294] ss:$8 sps:$4 sm:$0xff]   ;;  %s6682_s20 = smul.u32 216, %s180_s19  ;;  %v6797_v39 = vld [vmem:[#allocation3 + $0x290] ss:$8 sps:$4 sm:$0xff]   ;;  %vm974_vm4 = vcmask 1042432  }
  0x43   : > { %4584 = vmatpush1.bf16.msra.mxu0 %v6761_v15  ;;  %4199 = vmatprep.subr.bf16.mxu1 %v6762_v16  ;;  %v6800_v41 = vld [vmem:[#allocation3 + $0x2a4] ss:$8 sps:$4 sm:$0xff]   ;;  %v6802_v42 = vld [vmem:[#allocation3 + $0xa0] ss:$8 sps:$4 sm:$0xff]   ;;  %vm395_vm2 = vsmask.f32 3328 }
  0x44   : > { %4585 = vmatprep.subr.bf16.mxu0 %v6764_v17  ;;  %v6803_v43 = vld [vmem:[#allocation3 + $0x2a0] ss:$8 sps:$4 sm:$0xff]   ;;  %s7245_s26 = scalar_lea.vmem %s8669_s0, %s6682_s20  ;;  %v6804_v44 = vld [vmem:[#allocation3 + $0xb4] ss:$8 sps:$4 sm:$0xff]   ;;  %vm396_vm3 = vsmask.f32 7440 }
  0x45   : > { %v6806_v45 = vld [vmem:[#allocation3 + $0x2b4] ss:$8 sps:$4 sm:$0xff]   ;;  %vm975_vm5 = vcmask 1046532   ;;  %v6808_v46 = vld [vmem:[#allocation3 + $0xb0] ss:$8 sps:$4 sm:$0xff]   ;;  %v7133_v10 = vmov 0   ;;  %vm7265_vm7 = vmor %vm395_vm2, %vm396_vm3 }
  0x46   : > { %4200 = vmatpush1.bf16.msra.mxu1 %v6766_v18  ;;  %v6809_v47 = vld [vmem:[#allocation3 + $0x2b0] ss:$8 sps:$4 sm:$0xff]   ;;  %v6810_v49 = vld [vmem:[#allocation3 + $0xc4] ss:$8 sps:$4 sm:$0xff]   ;;  %v348_v51 = vld [vmem:[%s7245_s26 + $0x4] sm:$0xf] }
  0x47   : > { %4586 = vmatpush1.bf16.msra.mxu0 %v6767_v19  ;;  %4201 = vmatprep.subr.bf16.mxu1 %v6768_v20  ;;  %v347_v48 = vld [vmem:[%s7245_s26] sm:$0xf]  ;;  %v6812_v50 = vld [vmem:[#allocation3 + $0x2c4] ss:$8 sps:$4 sm:$0xff]   ;;  %v349_v52 = vld [vmem:[%s7245_s26 + $0x8] sm:$0x1] }
  0x48   : > { %4587 = vmatprep.subr.bf16.mxu0 %v6770_v21  ;;  %v399_v53 = vshrl.u32 %v347_v48, 16  ;;  %v402_v54 = vshll.u32 %v347_v48, 16  ;;  %v408_v55 = vshll.u32 %v348_v51, 16  ;;  %v412_v56 = vshrl.u32 %v348_v51, 16  ;;  %v5844_v58 = vld [vmem:[%s7245_s26 + $0xc] sm:$0xe]  ;;  %vm7256_vm6 = vmor %vm974_vm4, %vm975_vm5 }
  0x49   : > { %v418_v57 = vshll.u32 %v349_v52, 16  ;;  %v6834_v59 = vld [vmem:[%s7245_s26] sm:$0xff]   ;;  %v5845_v62 = vld [vmem:[%s7245_s26 + $0x10] sm:$0xf]  ;;  %v5846_v63 = vld [vmem:[%s7245_s26 + $0x14] sm:$0x1] }
  0x4a   : > { %4202 = vmatpush1.bf16.msra.mxu1 %v6772_v22  ;;  %v401_v60 = vrot.slane %v399_v53, 4  ;;  %v404_v61 = vrot.slane %v402_v54, 5  ;;  %v6814_v0 = vld [vmem:[#allocation3 + $0xc0] ss:$8 sps:$4 sm:$0xff]   ;;  %v410_v2 = vrot.slane %v408_v55, 5  ;;  %v414_v3 = vrot.slane %v412_v56, 4 }
  0x4b   : > { %4588 = vmatpush1.bf16.msra.mxu0 %v6773_v23  ;;  %4203 = vmatprep.subr.bf16.mxu1 %v6774_v24  ;;  %v6815_v1 = vld [vmem:[#allocation3 + $0x2c0] ss:$8 sps:$4 sm:$0xff]   ;;  %v5892_v5 = vrot.slane %v5844_v58, 9  ;;  %314 = vst.msk [vmem:[#allocation2] sm:$0xff] %vm313_vm0, %v6834_v59  ;;  %v6816_v6 = vld [vmem:[#allocation3 + $0xd4] ss:$8 sps:$4 sm:$0xff]  }
  0x4c   : > { %4589 = vmatprep.subr.bf16.mxu0 %v6776_v25  ;;  %v405_v7 = vor.u32 %v404_v61, %v401_v60  ;;  %v1972_v8 = vrot.slane %v5845_v62, 5  ;;  %v1975_v9 = vrot.slane %v5846_v63, 5  ;;  %331 = vst.msk [vmem:[#allocation2] sm:$0xff] %vm330_vm1, %v7133_v10  ;;  %v6818_v11 = vld [vmem:[#allocation3 + $0x2d4] ss:$8 sps:$4 sm:$0xff]   ;;  %v415_v13 = vor.u32 %v414_v3, %v410_v2  ;;  %s176_s29 = sand.u32 1, %s7120_s13  }
  0x4d   : > { %v420_v14 = vrot.slane %v418_v57, 5  ;;  %v5780_v15 = vld [vmem:[%s7245_s26 + $0xc] sm:$0xf]  ;;  %v5781_v19 = vld [vmem:[%s7245_s26 + $0x10] sm:$0xf]  ;;  %s5666_s30 = sshll.u32 %s176_s29, 8 }
  0x4e   : > { %4204 = vmatpush1.bf16.msra.mxu1 %v6778_v26  ;;  %v406_v16 = vrot.slane %v405_v7, 4  ;;  %v1973_v17 = vsel %vm7256_vm6, %v5892_v5, %v1972_v8  ;;  %v1974_v18 = vrot.slane %v1972_v8, 4  ;;  %v5782_v20 = vld [vmem:[%s7245_s26 + $0x14] sm:$0x1]  ;;  %v416_v21 = vrot.slane %v415_v13, 4  ;;  %s8501_s4 = scalar_lea.vmem [#allocation6], %s5666_s30 }
  0x4f   : > { %4590 = vmatpush1.bf16.msra.mxu0 %v6779_v27  ;;  %4205 = vmatprep.subr.bf16.mxu1 %v6780_v28  ;;  %v1395_v22 = vshrl.u32 %v5780_v15, 16  ;;  %v1398_v23 = vshll.u32 %v5780_v15, 16  ;;  %v1404_v24 = vshll.u32 %v5781_v19, 16  ;;  %v6820_v25 = vld [vmem:[#allocation3 + $0xd0] ss:$8 sps:$4 sm:$0xff]   ;;  %s6329_s5 = sshll.u32 %s7178_s16, 12 }
  0x50   : > { %4591 = vmatprep.subr.bf16.mxu0 %v6782_v29  ;;  %v6821_v26 = vld [vmem:[#allocation3 + $0x2d0] ss:$8 sps:$4 sm:$0xff]   ;;  %v411_v27 = vsel %vm7265_vm7, %v406_v16, %v410_v2  ;;  %v1976_v28 = vsel %vm7256_vm6, %v1974_v18, %v1975_v9  ;;  %v1408_v29 = vshrl.u32 %v5781_v19, 16  ;;  %v6830_v48 = vld [vmem:[#allocation3 + $0x2f4] ss:$8 sps:$4 sm:$0xff]   ;;  %s5586_s6 = sshll.u32 %s8501_s4, 4  ;;  %s8620_s9 = scalar_lea.hbm %s8672_s3, %s6329_s5  ;;  %s8622_s6 = int_to_ptr.vmem [resolvable:$true] %s5586_s6 }
  0x51   : > { %v5847_v57 = vld [vmem:[%s7245_s26 + $0x18] sm:$0xe]  ;;  %v5848_v62 = vld [vmem:[%s7245_s26 + $0x1c] sm:$0xf]  ;;  %v6832_v63 = vld [vmem:[#allocation3 + $0xf0] ss:$8 sps:$4 sm:$0xff]  }
  0x52   : > { %4206 = vmatpush1.bf16.msra.mxu1 %v6784_v30  ;;  %v1414_v30 = vshll.u32 %v5782_v20, 16  ;;  %v5849_v3 = vld [vmem:[%s7245_s26 + $0x20] sm:$0x1]  ;;  %v5893_v5 = vrot.slane %v5847_v57, 9  ;;  %v1979_v9 = vrot.slane %v5848_v62, 5  ;;  %s8628_s16 = scalar_lea.sflag [#allocation5], %s176_s29 }
  0x53   : > { %4592 = vmatpush1.bf16.msra.mxu0 %v6785_v31  ;;  %4207 = vmatprep.subr.bf16.mxu1 %v6786_v32  ;;  %v6822_v31 = vld [vmem:[#allocation3 + $0xe4] ss:$8 sps:$4 sm:$0xff]   ;;  %v421_v32 = vsel %vm7265_vm7, %v416_v21, %v420_v14  ;;  %s7062_s10 = scalar_lea.vmem %s8622_s6, 4096  ;;  %p8687_p9 = scmp.ne.s32.totalorder %s8676_s22, 0 }
  0x54   : > { %4593 = vmatprep.subr.bf16.mxu0 %v6788_v33  ;;  %v5908_v33 = vcombine.low %v1973_v17, %v1976_v28  ;;  %v6840_v14 = vld [vmem:[#allocation3 + $0x304] ss:$8 sps:$4 sm:$0xff]   ;;  %v5783_v17 = vld [vmem:[%s7245_s26 + $0x18] sm:$0xf]  ;;  %v1980_v19 = vsel %vm7256_vm6, %v5893_v5, %v1979_v9  ;;  %v1981_v20 = vrot.slane %v1979_v9, 4  ;;  %p7063_p6 = scmp.ne.s32.totalorder %s8622_s6, %s7062_s10  ;;  %s7134_s11 = smov [#allocation6]  }
  0x55   : > { %v5784_v21 = vld [vmem:[%s7245_s26 + $0x1c] sm:$0xf]  ;;  %s7066_s17 = sshll.u32 %s7134_s11, 4  ;;  %s7067_s17 = int_to_ptr.vmem [resolvable:$false] %s7066_s17 }
  0x56   : > { %4208 = vmatpush1.bf16.msra.mxu1 %v6790_v34  ;;  %v1397_v34 = vrot.slane %v1395_v22, 4  ;;  %2146 = vst.msk [vmem:[#allocation2 + $0x28] sm:$0xff] %vm313_vm0, %v5908_v33  ;;  %v5785_v22 = vld [vmem:[%s7245_s26 + $0x20] sm:$0x1]  ;;  %p7064_p10 = pnand %p7063_p6, %p8687_p9  ;;  %s7068_s19 = scalar_lea.vmem %s7067_s17, 8192 }
  0x57   : > { %4594 = vmatpush1.bf16.msra.mxu0 %v6791_v35  ;;  %4209 = vmatprep.subr.bf16.mxu1 %v6792_v36  ;;  %v1400_v35 = vrot.slane %v1398_v23, 5  ;;  %v6824_v36 = vld [vmem:[#allocation3 + $0x2e4] ss:$8 sps:$4 sm:$0xff]   ;;  %2162 = vst.msk [vmem:[#allocation2 + $0x28] sm:$0xff] %vm330_vm1, %v7133_v10  ;;  %v1438_v33 = vshll.u32 %v5785_v22, 16  ;;  %p7069_p2 = scmp.lt.s32.totalorder %s8622_s6, %s7067_s17  ;;  %p7070_p3 = scmp.lt.s32.totalorder %s7068_s19, %s7062_s10 }
  0x58   : > { %4595 = vmatprep.subr.bf16.mxu0 %v6794_v37  ;;  %v5684_v37 = vcombine.low %v411_v27, %v421_v32  ;;  %v1428_v27 = vshll.u32 %v5784_v21, 16  ;;  %v1432_v32 = vshrl.u32 %v5784_v21, 16  ;;  %v5786_v21 = vld [vmem:[%s7245_s26 + $0x24] sm:$0xf]  ;;  %p7065_p12 = pneg %p7064_p10 }
  0x59   : > { %p7071_p4 = por %p7070_p3, %p7069_p2 }
  0x5a   : > { %4210 = vmatpush1.bf16.msra.mxu1 %v6796_v38  ;;  %v1406_v38 = vrot.slane %v1404_v24, 5  ;;  %846 = vst.msk [vmem:[#allocation2 + $0x8] sm:$0xff] %vm313_vm0, %v5684_v37 }
  0x5b   : > { %4596 = vmatpush1.bf16.msra.mxu0 %v6797_v39  ;;  %4211 = vmatprep.subr.bf16.mxu1 %v6798_v40  ;;  %v1410_v39 = vrot.slane %v1408_v29, 4  ;;  %v6844_v40 = vld [vmem:[%s7245_s26 + $0xc] sm:$0xff]   ;;  %862 = vst.msk [vmem:[#allocation2 + $0x8] sm:$0xff] %vm330_vm1, %v7133_v10  ;;  %p7072_p7 = pnand %p7071_p4, %p7065_p12 }
  0x5c   : > { %4597 = vmatprep.subr.bf16.mxu0 %v6800_v41  ;;  %v6826_v41 = vld [vmem:[#allocation3 + $0xe0] ss:$8 sps:$4 sm:$0xff]   ;;  %315 = vst.msk [vmem:[#allocation2 + $0x48] sm:$0xff] %vm313_vm0, %v6844_v40  ;;  %v6847_v40 = vld [vmem:[#allocation3 + $0x114] ss:$8 sps:$4 sm:$0xff]  }
  0x5d   : > { %332 = vst.msk [vmem:[#allocation2 + $0x48] sm:$0xff] %vm330_vm1, %v7133_v10  ;;  %v6835_v29 = vld [vmem:[#allocation3 + $0x100] ss:$8 sps:$4 sm:$0xff]  }
  0x5e   : > { %4212 = vmatpush1.bf16.msra.mxu1 %v6802_v42  ;;  %v6827_v42 = vld [vmem:[#allocation3 + $0x2e0] ss:$8 sps:$4 sm:$0xff]  }
  0x5f   : > { %4598 = vmatpush1.bf16.msra.mxu0 %v6803_v43  ;;  %4213 = vmatprep.subr.bf16.mxu1 %v6804_v44  ;;  %v1401_v43 = vor.u32 %v1400_v35, %v1397_v34  ;;  %v1416_v44 = vrot.slane %v1414_v30, 5  ;;  %v3176_v23 = vld [vmem:[#allocation2 + $0x28] sm:$0xff]  ;;  %v3171_v34 = vld [vmem:[#allocation2] sm:$0xff] }
  0x60   : > { %4599 = vmatprep.subr.bf16.mxu0 %v6806_v45  ;;  %v350_v45 = vld [vmem:[%s7245_s26 + $0xc] sm:$0xf]  ;;  %4609 = vmatprep.mubr.bf16.mxu0 %v3176_v23 }
  0x61   : > { %v423_v51 = vshrl.u32 %v350_v45, 16  ;;  %v426_v52 = vshll.u32 %v350_v45, 16  ;;  %v1402_v54 = vrot.slane %v1401_v43, 4  ;;  %v6854_v43 = vld [vmem:[%s7245_s26 + $0x18] sm:$0xff]   ;;  %v6845_v45 = vld [vmem:[#allocation3 + $0x110] ss:$8 sps:$4 sm:$0xff]  }
  0x62   : > { %4214 = vmatpush1.bf16.msra.mxu1 %v6808_v46  ;;  %v351_v46 = vld [vmem:[%s7245_s26 + $0x10] sm:$0xf]  ;;  %v3172_v28 = vld [vmem:[#allocation2 + $0x8] sm:$0xff]  ;;  %316 = vst.msk [vmem:[#allocation2 + $0x90] sm:$0xff] %vm313_vm0, %v6854_v43 }
  0x63   : > { %4600 = vmatpush1.bf16.msra.mxu0 %v6809_v47  ;;  %4215 = vmatprep.subr.bf16.mxu1 %v6810_v49  ;;  %v6828_v47 = vld [vmem:[#allocation3 + $0xf4] ss:$8 sps:$4 sm:$0xff]   ;;  %v1411_v49 = vor.u32 %v1410_v39, %v1406_v38  ;;  %v432_v53 = vshll.u32 %v351_v46, 16  ;;  %v436_v55 = vshrl.u32 %v351_v46, 16  ;;  %v425_v59 = vrot.slane %v423_v51, 4  ;;  %333 = vst.msk [vmem:[#allocation2 + $0x90] sm:$0xff] %vm330_vm1, %v7133_v10 }
  0x64   : > { %4601 = vmatprep.subr.bf16.mxu0 %v6812_v50  ;;  %v352_v50 = vld [vmem:[%s7245_s26 + $0x14] sm:$0x1]  ;;  %v428_v60 = vrot.slane %v426_v52, 5  ;;  %4223 = vmatprep.mubr.bf16.mxu1 %v3172_v28  ;;  %v355_v52 = vld [vmem:[%s7245_s26 + $0x20] sm:$0x1] }
  0x65   : > { %v442_v56 = vshll.u32 %v352_v50, 16  ;;  %v1412_v58 = vrot.slane %v1411_v49, 4  ;;  %v434_v61 = vrot.slane %v432_v53, 5  ;;  %v438_v2 = vrot.slane %v436_v55, 4  ;;  %v354_v49 = vld [vmem:[%s7245_s26 + $0x1c] sm:$0xf] }
  0x66   : > { %4216 = vmatpush1.bf16.msra.mxu1 %v6814_v0  ;;  %v6833_v0 = vld [vmem:[#allocation3 + $0x2f0] ss:$8 sps:$4 sm:$0xff]   ;;  %v429_v8 = vor.u32 %v428_v60, %v425_v59  ;;  %v6843_v50 = vld [vmem:[#allocation3 + $0x314] ss:$8 sps:$4 sm:$0xff]   ;;  %v456_v55 = vshll.u32 %v354_v49, 16  ;;  %v460_v57 = vshrl.u32 %v354_v49, 16 }
  0x67   : > { %4602 = vmatpush1.bf16.msra.mxu0 %v6815_v1  ;;  %4217 = vmatprep.subr.bf16.mxu1 %v6816_v6  ;;  %v1407_v1 = vsel %vm7265_vm7, %v1402_v54, %v1406_v38  ;;  %v6837_v6 = vld [vmem:[#allocation3 + $0x104] ss:$8 sps:$4 sm:$0xff]   ;;  %v1417_v7 = vsel %vm7265_vm7, %v1412_v58, %v1416_v44  ;;  %v439_v15 = vor.u32 %v438_v2, %v434_v61  ;;  %v444_v16 = vrot.slane %v442_v56, 5  ;;  %v6838_v44 = vld [vmem:[#allocation3 + $0x300] ss:$8 sps:$4 sm:$0xff]  }
  0x68   : > { %4603 = vmatprep.subr.bf16.mxu0 %v6818_v11  ;;  %v1982_v11 = vrot.slane %v5849_v3, 5  ;;  %v5828_v13 = vcombine.low %v1407_v1, %v1417_v7  ;;  %v430_v18 = vrot.slane %v429_v8, 4  ;;  %v466_v58 = vshll.u32 %v355_v52, 16  ;;  %v5850_v59 = vld [vmem:[%s7245_s26 + $0x24] sm:$0xe] }
  0x69   : > { %v440_v24 = vrot.slane %v439_v15, 4  ;;  %v6841_v2 = vld [vmem:[#allocation3 + $0x310] ss:$8 sps:$4 sm:$0xff]   ;;  %v462_v5 = vrot.slane %v460_v57, 4  ;;  %v5852_v7 = vld [vmem:[%s7245_s26 + $0x2c] sm:$0x1] }
  0x6a   : > { %4218 = vmatpush1.bf16.msra.mxu1 %v6820_v25  ;;  %1842 = vst.msk [vmem:[#allocation2 + $0x20] sm:$0xff] %vm313_vm0, %v5828_v13  ;;  %v1419_v25 = vshrl.u32 %v5783_v17, 16  ;;  %v435_v30 = vsel %vm7265_vm7, %v430_v18, %v434_v61  ;;  %v5894_v8 = vrot.slane %v5850_v59, 9  ;;  %v1989_v15 = vrot.slane %v5852_v7, 5  ;;  %v6860_v52 = vld [vmem:[#allocation3 + $0x344] ss:$8 sps:$4 sm:$0xff]  }
  0x6b   : > { %4604 = vmatpush1.bf16.msra.mxu0 %v6821_v26  ;;  %4219 = vmatprep.subr.bf16.mxu1 %v6822_v31  ;;  %v1422_v26 = vshll.u32 %v5783_v17, 16  ;;  %1858 = vst.msk [vmem:[#allocation2 + $0x20] sm:$0xff] %vm330_vm1, %v7133_v10  ;;  %v1983_v31 = vsel %vm7256_vm6, %v1981_v20, %v1982_v11  ;;  %v445_v35 = vsel %vm7265_vm7, %v440_v24, %v444_v16  ;;  %v6850_v11 = vld [vmem:[#allocation3 + $0x324] ss:$8 sps:$4 sm:$0xff]  }
  0x6c   : > { %4605 = vmatprep.subr.bf16.mxu0 %v6824_v36  ;;  %v5909_v36 = vcombine.low %v1980_v19, %v1983_v31  ;;  %v1421_v37 = vrot.slane %v1419_v25, 4  ;;  %v5685_v39 = vcombine.low %v435_v30, %v445_v35  ;;  %v3180_v16 = vld [vmem:[#allocation2 + $0x48] sm:$0xff]  ;;  %v5787_v25 = vld [vmem:[%s7245_s26 + $0x28] sm:$0xf]  ;;  %v1446_v30 = vshll.u32 %v5786_v21, 16 }
  0x6d   : > { %v1424_v38 = vrot.slane %v1422_v26, 5  ;;  %v6855_v19 = vld [vmem:[#allocation3 + $0x120] ss:$8 sps:$4 sm:$0xff]   ;;  %v6857_v20 = vld [vmem:[#allocation3 + $0x124] ss:$8 sps:$4 sm:$0xff]   ;;  %v1452_v31 = vshll.u32 %v5787_v25, 16 }
  0x6e   : > { %4220 = vmatpush1.bf16.msra.mxu1 %v6826_v41  ;;  %v1430_v41 = vrot.slane %v1428_v27, 5  ;;  %2147 = vst.msk [vmem:[#allocation2 + $0x70] sm:$0xff] %vm313_vm0, %v5909_v36  ;;  %847 = vst.msk [vmem:[#allocation2 + $0x50] sm:$0xff] %vm313_vm0, %v5685_v39  ;;  %v5788_v26 = vld [vmem:[%s7245_s26 + $0x2c] sm:$0x1]  ;;  %v1456_v35 = vshrl.u32 %v5787_v25, 16 }
  0x6f   : > { %4606 = vmatpush1.bf16.msra.mxu0 %v6827_v42  ;;  %4221 = vmatprep.subr.bf16.mxu1 %v6828_v47  ;;  %v1434_v42 = vrot.slane %v1432_v32, 4  ;;  %v1425_v46 = vor.u32 %v1424_v38, %v1421_v37  ;;  %v1440_v47 = vrot.slane %v1438_v33, 5  ;;  %2163 = vst.msk [vmem:[#allocation2 + $0x70] sm:$0xff] %vm330_vm1, %v7133_v10  ;;  %863 = vst.msk [vmem:[#allocation2 + $0x50] sm:$0xff] %vm330_vm1, %v7133_v10  ;;  %v1462_v36 = vshll.u32 %v5788_v26, 16 }
  0x70   : > { %4607 = vmatprep.subr.bf16.mxu0 %v6830_v48  ;;  %v353_v48 = vld [vmem:[%s7245_s26 + $0x18] sm:$0xf]  ;;  %v6853_v38 = vld [vmem:[#allocation3 + $0x334] ss:$8 sps:$4 sm:$0xff]   ;;  %v5789_v26 = vld [vmem:[%s7245_s26 + $0x30] sm:$0xf] }
  0x71   : > { %v1435_v51 = vor.u32 %v1434_v42, %v1430_v41  ;;  %v447_v53 = vshrl.u32 %v353_v48, 16  ;;  %v450_v54 = vshll.u32 %v353_v48, 16  ;;  %v1426_v56 = vrot.slane %v1425_v46, 4  ;;  %v6848_v37 = vld [vmem:[#allocation3 + $0x320] ss:$8 sps:$4 sm:$0xff]   ;;  %v6864_v46 = vld [vmem:[%s7245_s26 + $0x24] sm:$0xff]  }
  0x72   : > { %4222 = vmatpush1.bf16.msra.mxu1 %v6832_v63  ;;  %v458_v63 = vrot.slane %v456_v55, 5  ;;  %v3175_v1 = vld [vmem:[#allocation2 + $0x20] sm:$0xff]  ;;  %v1448_v42 = vrot.slane %v1446_v30, 5  ;;  %v1464_v49 = vrot.slane %v1462_v36, 5  ;;  %317 = vst.msk [vmem:[#allocation2 + $0xd8] sm:$0xff] %vm313_vm0, %v6864_v46 }
  0x73   : > { %4608 = vmatpush1.bf16.msra.mxu0 %v6833_v0  ;;  %4384 = vmatprep.subr.bf16.mxu1 %v6837_v6  ;;  %v1436_v60 = vrot.slane %v1435_v51, 4  ;;  %v449_v61 = vrot.slane %v447_v53, 4  ;;  %v452_v62 = vrot.slane %v450_v54, 5  ;;  %v5851_v0 = vld [vmem:[%s7245_s26 + $0x28] sm:$0xf]  ;;  %v1431_v3 = vsel %vm7265_vm7, %v1426_v56, %v1430_v41  ;;  %334 = vst.msk [vmem:[#allocation2 + $0xd8] sm:$0xff] %vm330_vm1, %v7133_v10 }
  0x74   : > { %4770 = vmatprep.subr.bf16.mxu0 %v6840_v14  ;;  %v468_v6 = vrot.slane %v466_v58, 5  ;;  %v1986_v14 = vrot.slane %v5851_v0, 5  ;;  %v463_v18 = vor.u32 %v462_v5, %v458_v63  ;;  %v357_v53 = vld [vmem:[%s7245_s26 + $0x28] sm:$0xf]  ;;  %v358_v54 = vld [vmem:[%s7245_s26 + $0x2c] sm:$0x1] }
  0x75   : > { %4224 = vmatmul.mubr.bf16.vlgmr.msra.gmra.mrb[0].mxu1 %v3171_v34  ;;  %v1441_v9 = vsel %vm7265_vm7, %v1436_v60, %v1440_v47  ;;  %v453_v13 = vor.u32 %v452_v62, %v449_v61  ;;  %v6851_v47 = vld [vmem:[#allocation3 + $0x330] ss:$8 sps:$4 sm:$0xff]   ;;  %v480_v58 = vshll.u32 %v357_v53, 16  ;;  %v484_v59 = vshrl.u32 %v357_v53, 16  ;;  %v5853_v61 = vld [vmem:[%s7245_s26 + $0x30] sm:$0xe] }
  0x76   : > { %4385 = vmatpush1.bf16.msra.mxu1 %v6835_v29  ;;  %4610 = vmatmul.mubr.bf16.vlgmr.msra.gmra.mrb[0].mxu0 %v3175_v1  ;;  %v5829_v17 = vcombine.low %v1431_v3, %v1441_v9  ;;  %v1987_v23 = vsel %vm7256_vm6, %v5894_v8, %v1986_v14  ;;  %v1988_v24 = vrot.slane %v1986_v14, 4  ;;  %v3185_v27 = vld [vmem:[#allocation2 + $0x70] sm:$0xff]  ;;  %v464_v28 = vrot.slane %v463_v18, 4  ;;  %v5854_v1 = vld [vmem:[%s7245_s26 + $0x34] sm:$0xf] }
  0x77   : > { %4386 = vmatprep.subr.bf16.mxu1 %v6847_v40  ;;  %4771 = vmatpush1.bf16.msra.mxu0 %v6838_v44  ;;  %v454_v22 = vrot.slane %v453_v13, 4  ;;  %v1443_v29 = vshrl.u32 %v5786_v21, 16  ;;  %v3181_v32 = vld [vmem:[#allocation2 + $0x50] sm:$0xff]  ;;  %v1454_v44 = vrot.slane %v1452_v31, 5  ;;  %v490_v60 = vshll.u32 %v358_v54, 16  ;;  %v6874_v54 = vld [vmem:[%s7245_s26 + $0x30] sm:$0xff]  }
  0x78   : > { %4772 = vmatprep.subr.bf16.mxu0 %v6843_v50  ;;  %1843 = vst.msk [vmem:[#allocation2 + $0x68] sm:$0xff] %vm313_vm0, %v5829_v17  ;;  %4619 = vmatprep.mubr.bf16.mxu0 %v3185_v27  ;;  %v1990_v34 = vsel %vm7256_vm6, %v1988_v24, %v1989_v15  ;;  %v469_v39 = vsel %vm7265_vm7, %v464_v28, %v468_v6  ;;  %v356_v50 = vld [vmem:[%s7245_s26 + $0x24] sm:$0xf]  ;;  %v6858_v6 = vld [vmem:[#allocation3 + $0x340] ss:$8 sps:$4 sm:$0xff]   ;;  %v482_v7 = vrot.slane %v480_v58, 5 }
  0x79   : > { %1859 = vst.msk [vmem:[#allocation2 + $0x68] sm:$0xff] %vm330_vm1, %v7133_v10  ;;  %v459_v33 = vsel %vm7265_vm7, %v454_v22, %v458_v63  ;;  %4233 = vmatprep.mubr.bf16.mxu1 %v3181_v32  ;;  %v5910_v40 = vcombine.low %v1987_v23, %v1990_v34  ;;  %v1445_v41 = vrot.slane %v1443_v29, 4  ;;  %v471_v55 = vshrl.u32 %v356_v50, 16  ;;  %v5855_v9 = vld [vmem:[%s7245_s26 + $0x38] sm:$0x1]  ;;  %v3189_v17 = vld [vmem:[#allocation2 + $0x90] sm:$0xff] }
  0x7a   : > { %4387 = vmatpush1.bf16.msra.mxu1 %v6845_v45  ;;  %v5686_v43 = vcombine.low %v459_v33, %v469_v39  ;;  %v1458_v45 = vrot.slane %v1456_v35, 4  ;;  %v474_v56 = vshll.u32 %v356_v50, 16  ;;  %v486_v8 = vrot.slane %v484_v59, 4  ;;  %v6863_v13 = vld [vmem:[#allocation3 + $0x354] ss:$8 sps:$4 sm:$0xff]   ;;  %318 = vst.msk [vmem:[#allocation2 + $0x120] sm:$0xff] %vm313_vm0, %v6874_v54 }
  0x7b   : > { %4388 = vmatprep.subr.bf16.mxu1 %v6857_v20  ;;  %4773 = vmatpush1.bf16.msra.mxu0 %v6841_v2  ;;  %2148 = vst.msk [vmem:[#allocation2 + $0xb8] sm:$0xff] %vm313_vm0, %v5910_v40  ;;  %v1449_v48 = vor.u32 %v1448_v42, %v1445_v41  ;;  %v473_v63 = vrot.slane %v471_v55, 4  ;;  %v5895_v2 = vrot.slane %v5853_v61, 9  ;;  %v1993_v15 = vrot.slane %v5854_v1, 5  ;;  %v6865_v21 = vld [vmem:[#allocation3 + $0x130] ss:$8 sps:$4 sm:$0xff]  }
  0x7c   : > { %4774 = vmatprep.subr.bf16.mxu0 %v6850_v11  ;;  %848 = vst.msk [vmem:[#allocation2 + $0x98] sm:$0xff] %vm313_vm0, %v5686_v43  ;;  %v1459_v51 = vor.u32 %v1458_v45, %v1454_v44  ;;  %v476_v0 = vrot.slane %v474_v56, 5  ;;  %v492_v20 = vrot.slane %v490_v60, 5  ;;  %v6867_v25 = vld [vmem:[#allocation3 + $0x134] ss:$8 sps:$4 sm:$0xff]   ;;  %v1467_v34 = vshrl.u32 %v5789_v26, 16 }
  0x7d   : > { %4234 = vmatmul.mubr.bf16.gmra.mrb[4].mxu1 %v3180_v16  ;;  %2164 = vst.msk [vmem:[#allocation2 + $0xb8] sm:$0xff] %vm330_vm1, %v7133_v10  ;;  %864 = vst.msk [vmem:[#allocation2 + $0x98] sm:$0xff] %vm330_vm1, %v7133_v10  ;;  %v1450_v57 = vrot.slane %v1449_v48, 4  ;;  %v1996_v16 = vrot.slane %v5855_v9, 5  ;;  %v1994_v23 = vsel %vm7256_vm6, %v5895_v2, %v1993_v15  ;;  %v1995_v24 = vrot.slane %v1993_v15, 4 }
  0x7e   : > { %4389 = vmatpush1.bf16.msra.mxu1 %v6855_v19  ;;  %v1460_v62 = vrot.slane %v1459_v51, 4  ;;  %v477_v14 = vor.u32 %v476_v0, %v473_v63  ;;  %v487_v19 = vor.u32 %v486_v8, %v482_v7  ;;  %v5790_v29 = vld [vmem:[%s7245_s26 + $0x34] sm:$0xf]  ;;  %v5791_v30 = vld [vmem:[%s7245_s26 + $0x38] sm:$0x1]  ;;  %v1470_v35 = vshll.u32 %v5789_v26, 16 }
  0x7f   : > { %4775 = vmatpush1.bf16.msra.mxu0 %v6848_v37  ;;  %v1455_v5 = vsel %vm7265_vm7, %v1450_v57, %v1454_v44  ;;  %v1997_v33 = vsel %vm7256_vm6, %v1995_v24, %v1996_v16  ;;  %4390 = vmatprep.subr.bf16.mxu1 %v6867_v25  ;;  %v6861_v36 = vld [vmem:[#allocation3 + $0x350] ss:$8 sps:$4 sm:$0xff]   ;;  %v1476_v39 = vshll.u32 %v5790_v29, 16  ;;  %v1480_v40 = vshrl.u32 %v5790_v29, 16  ;;  %v6870_v45 = vld [vmem:[#allocation3 + $0x364] ss:$8 sps:$4 sm:$0xff]  }
  0x80   : > { %4776 = vmatprep.subr.bf16.mxu0 %v6853_v38  ;;  %v3184_v3 = vld [vmem:[#allocation2 + $0x68] sm:$0xff]  ;;  %v1465_v11 = vsel %vm7265_vm7, %v1460_v62, %v1464_v49  ;;  %v478_v22 = vrot.slane %v477_v14, 4  ;;  %v488_v28 = vrot.slane %v487_v19, 4  ;;  %v5911_v38 = vcombine.low %v1994_v23, %v1997_v33  ;;  %v6873_v51 = vld [vmem:[#allocation3 + $0x374] ss:$8 sps:$4 sm:$0xff]   ;;  %335 = vst.msk [vmem:[#allocation2 + $0x120] sm:$0xff] %vm330_vm1, %v7133_v10 }
  0x81   : > { %4620 = vmatmul.mubr.bf16.gmra.mrb[4].mxu0 %v3184_v3  ;;  %v5830_v18 = vcombine.low %v1455_v5, %v1465_v11  ;;  %v1469_v42 = vrot.slane %v1467_v34, 4  ;;  %v1472_v43 = vrot.slane %v1470_v35, 5  ;;  %v1486_v44 = vshll.u32 %v5791_v30, 16  ;;  %v6868_v48 = vld [vmem:[#allocation3 + $0x360] ss:$8 sps:$4 sm:$0xff]   ;;  %v3198_v14 = vld [vmem:[#allocation2 + $0xd8] sm:$0xff] }
  0x82   : > { %v483_v32 = vsel %vm7265_vm7, %v478_v22, %v482_v7  ;;  %v493_v37 = vsel %vm7265_vm7, %v488_v28, %v492_v20  ;;  %2149 = vst.msk [vmem:[#allocation2 + $0x100] sm:$0xff] %vm313_vm0, %v5911_v38  ;;  %v1478_v46 = vrot.slane %v1476_v39, 5  ;;  %4391 = vmatpush1.bf16.msra.mxu1 %v6865_v21  ;;  %v360_v53 = vld [vmem:[%s7245_s26 + $0x34] sm:$0xf]  ;;  %v361_v56 = vld [vmem:[%s7245_s26 + $0x38] sm:$0x1] }
  0x83   : > { %4777 = vmatpush1.bf16.msra.mxu0 %v6851_v47  ;;  %1844 = vst.msk [vmem:[#allocation2 + $0xb0] sm:$0xff] %vm313_vm0, %v5830_v18  ;;  %v5687_v41 = vcombine.low %v483_v32, %v493_v37  ;;  %v1482_v47 = vrot.slane %v1480_v40, 4  ;;  %v1473_v49 = vor.u32 %v1472_v43, %v1469_v42  ;;  %v1488_v50 = vrot.slane %v1486_v44, 5  ;;  %v5856_v63 = vld [vmem:[%s7245_s26 + $0x3c] sm:$0xe] }
  0x84   : > { %4778 = vmatprep.subr.bf16.mxu0 %v6860_v52  ;;  %v3194_v27 = vld [vmem:[#allocation2 + $0xb8] sm:$0xff]  ;;  %1860 = vst.msk [vmem:[#allocation2 + $0xb0] sm:$0xff] %vm330_vm1, %v7133_v10  ;;  %2165 = vst.msk [vmem:[#allocation2 + $0x100] sm:$0xff] %vm330_vm1, %v7133_v10  ;;  %v359_v52 = vld [vmem:[%s7245_s26 + $0x30] sm:$0xf]  ;;  %v504_v59 = vshll.u32 %v360_v53, 16 }
  0x85   : > { %v3190_v31 = vld [vmem:[#allocation2 + $0x98] sm:$0xff]  ;;  %4629 = vmatprep.mubr.bf16.mxu0 %v3194_v27  ;;  %849 = vst.msk [vmem:[#allocation2 + $0xe0] sm:$0xff] %vm313_vm0, %v5687_v41  ;;  %v1483_v55 = vor.u32 %v1482_v47, %v1478_v46  ;;  %v495_v57 = vshrl.u32 %v359_v52, 16  ;;  %v498_v58 = vshll.u32 %v359_v52, 16  ;;  %v1474_v60 = vrot.slane %v1473_v49, 4 }
  0x86   : > { %4243 = vmatprep.mubr.bf16.mxu1 %v3190_v31  ;;  %865 = vst.msk [vmem:[#allocation2 + $0xe0] sm:$0xff] %vm330_vm1, %v7133_v10  ;;  %v508_v61 = vshrl.u32 %v360_v53, 16  ;;  %v514_v62 = vshll.u32 %v361_v56, 16  ;;  %v6871_v2 = vld [vmem:[#allocation3 + $0x370] ss:$8 sps:$4 sm:$0xff]  }
  0x87   : > { %4779 = vmatpush1.bf16.msra.mxu0 %v6858_v6  ;;  %4244 = vmatmul.mubr.bf16.gmra.mrb[8].mxu1 %v3189_v17  ;;  %v1484_v1 = vrot.slane %v1483_v55, 4  ;;  %v497_v3 = vrot.slane %v495_v57, 4  ;;  %v500_v5 = vrot.slane %v498_v58, 5  ;;  %v506_v6 = vrot.slane %v504_v59, 5  ;;  %v5857_v11 = vld [vmem:[%s7245_s26 + $0x40] sm:$0xf] }
  0x88   : > { %4780 = vmatprep.subr.bf16.mxu0 %v6863_v13  ;;  %v1479_v7 = vsel %vm7265_vm7, %v1474_v60, %v1478_v46  ;;  %v510_v8 = vrot.slane %v508_v61, 4  ;;  %v516_v9 = vrot.slane %v514_v62, 5  ;;  %v5858_v13 = vld [vmem:[%s7245_s26 + $0x44] sm:$0x1]  ;;  %v5896_v17 = vrot.slane %v5856_v63, 9 }
  0x89   : > { %v1489_v15 = vsel %vm7265_vm7, %v1484_v1, %v1488_v50  ;;  %v501_v16 = vor.u32 %v500_v5, %v497_v3  ;;  %v2000_v18 = vrot.slane %v5857_v11, 5  ;;  %v2003_v21 = vrot.slane %v5858_v13, 5  ;;  %v6875_v22 = vld [vmem:[#allocation3 + $0x140] ss:$8 sps:$4 sm:$0xff]   ;;  %v6877_v23 = vld [vmem:[#allocation3 + $0x144] ss:$8 sps:$4 sm:$0xff]  }
  0x8a   : > { %v5831_v19 = vcombine.low %v1479_v7, %v1489_v15  ;;  %v511_v20 = vor.u32 %v510_v8, %v506_v6  ;;  %v5792_v28 = vld [vmem:[%s7245_s26 + $0x3c] sm:$0xf]  ;;  %4392 = vmatprep.subr.bf16.mxu1 %v6877_v23  ;;  %v5793_v31 = vld [vmem:[%s7245_s26 + $0x40] sm:$0xf]  ;;  %v5794_v32 = vld [vmem:[%s7245_s26 + $0x44] sm:$0x1] }
  0x8b   : > { %4781 = vmatpush1.bf16.msra.mxu0 %v6861_v36  ;;  %v3193_v0 = vld [vmem:[#allocation2 + $0xb0] sm:$0xff]  ;;  %v3203_v24 = vld [vmem:[#allocation2 + $0x100] sm:$0xff]  ;;  %v502_v25 = vrot.slane %v501_v16, 4  ;;  %v2001_v26 = vsel %vm7256_vm6, %v5896_v17, %v2000_v18  ;;  %v2002_v27 = vrot.slane %v2000_v18, 4  ;;  %v1491_v35 = vshrl.u32 %v5792_v28, 16  ;;  %4393 = vmatpush1.bf16.msra.mxu1 %v6875_v22 }
  0x8c   : > { %4782 = vmatprep.subr.bf16.mxu0 %v6870_v45  ;;  %4630 = vmatmul.mubr.bf16.gmra.mrb[8].mxu0 %v3193_v0  ;;  %1845 = vst.msk [vmem:[#allocation2 + $0xf8] sm:$0xff] %vm313_vm0, %v5831_v19  ;;  %v512_v30 = vrot.slane %v511_v20, 4  ;;  %v1494_v36 = vshll.u32 %v5792_v28, 16  ;;  %v6878_v37 = vld [vmem:[#allocation3 + $0x380] ss:$8 sps:$4 sm:$0xff]   ;;  %v1500_v41 = vshll.u32 %v5793_v31, 16 }
  0x8d   : > { %v3199_v29 = vld [vmem:[#allocation2 + $0xe0] sm:$0xff]  ;;  %4639 = vmatprep.mubr.bf16.mxu0 %v3203_v24  ;;  %1861 = vst.msk [vmem:[#allocation2 + $0xf8] sm:$0xff] %vm330_vm1, %v7133_v10  ;;  %v507_v33 = vsel %vm7265_vm7, %v502_v25, %v506_v6  ;;  %v2004_v34 = vsel %vm7256_vm6, %v2002_v27, %v2003_v21  ;;  %v1504_v42 = vshrl.u32 %v5793_v31, 16  ;;  %v1493_v44 = vrot.slane %v1491_v35, 4  ;;  %v6883_v47 = vld [vmem:[#allocation3 + $0x394] ss:$8 sps:$4 sm:$0xff]  }
  0x8e   : > { %4253 = vmatprep.mubr.bf16.mxu1 %v3199_v29  ;;  %v6880_v38 = vld [vmem:[#allocation3 + $0x384] ss:$8 sps:$4 sm:$0xff]   ;;  %v517_v39 = vsel %vm7265_vm7, %v512_v30, %v516_v9  ;;  %v5912_v40 = vcombine.low %v2001_v26, %v2004_v34  ;;  %v1496_v45 = vrot.slane %v1494_v36, 5  ;;  %v1510_v46 = vshll.u32 %v5794_v32, 16  ;;  %v363_v53 = vld [vmem:[%s7245_s26 + $0x40] sm:$0xf] }
  0x8f   : > { %4783 = vmatpush1.bf16.msra.mxu0 %v6868_v48  ;;  %4254 = vmatmul.mubr.bf16.gmra.mrb[12].mxu1 %v3198_v14  ;;  %v5688_v43 = vcombine.low %v507_v33, %v517_v39  ;;  %v6884_v48 = vld [vmem:[%s7245_s26 + $0x3c] sm:$0xff]   ;;  %v1502_v49 = vrot.slane %v1500_v41, 5  ;;  %v1506_v50 = vrot.slane %v1504_v42, 4  ;;  %v364_v56 = vld [vmem:[%s7245_s26 + $0x44] sm:$0x1]  ;;  %v528_v60 = vshll.u32 %v363_v53, 16 }
  0x90   : > { %4784 = vmatprep.subr.bf16.mxu0 %v6873_v51  ;;  %2150 = vst.msk [vmem:[#allocation2 + $0x148] sm:$0xff] %vm313_vm0, %v5912_v40  ;;  %v6881_v51 = vld [vmem:[#allocation3 + $0x390] ss:$8 sps:$4 sm:$0xff]   ;;  %v362_v52 = vld [vmem:[%s7245_s26 + $0x3c] sm:$0xf]  ;;  %v1497_v54 = vor.u32 %v1496_v45, %v1493_v44  ;;  %v1512_v55 = vrot.slane %v1510_v46, 5 }
  0x91   : > { %850 = vst.msk [vmem:[#allocation2 + $0x128] sm:$0xff] %vm313_vm0, %v5688_v43  ;;  %v519_v57 = vshrl.u32 %v362_v52, 16  ;;  %v522_v58 = vshll.u32 %v362_v52, 16  ;;  %319 = vst.msk [vmem:[#allocation2 + $0x168] sm:$0xff] %vm313_vm0, %v6884_v48  ;;  %v1507_v59 = vor.u32 %v1506_v50, %v1502_v49  ;;  %v532_v61 = vshrl.u32 %v363_v53, 16  ;;  %v3207_v17 = vld [vmem:[#allocation2 + $0x120] sm:$0xff] }
  0x92   : > { %2166 = vst.msk [vmem:[#allocation2 + $0x148] sm:$0xff] %vm330_vm1, %v7133_v10  ;;  %866 = vst.msk [vmem:[#allocation2 + $0x128] sm:$0xff] %vm330_vm1, %v7133_v10  ;;  %v538_v62 = vshll.u32 %v364_v56, 16  ;;  %v5859_v63 = vld [vmem:[%s7245_s26 + $0x48] sm:$0xe]  ;;  %v1498_v0 = vrot.slane %v1497_v54, 4 }
  0x93   : > { %4785 = vmatpush1.bf16.msra.mxu0 %v6871_v2  ;;  %336 = vst.msk [vmem:[#allocation2 + $0x168] sm:$0xff] %vm330_vm1, %v7133_v10  ;;  %v521_v1 = vrot.slane %v519_v57, 4  ;;  %v524_v2 = vrot.slane %v522_v58, 5  ;;  %v5860_v3 = vld [vmem:[%s7245_s26 + $0x4c] sm:$0xf]  ;;  %v5897_v5 = vrot.slane %v5859_v63, 9 }
  0x94   : > { %4786 = vmatprep.subr.bf16.mxu0 %v6880_v38  ;;  %v3202_v6 = vld [vmem:[#allocation2 + $0xf8] sm:$0xff]  ;;  %v1508_v7 = vrot.slane %v1507_v59, 4  ;;  %v530_v8 = vrot.slane %v528_v60, 5  ;;  %v534_v9 = vrot.slane %v532_v61, 4  ;;  %v540_v11 = vrot.slane %v538_v62, 5 }
  0x95   : > { %4640 = vmatmul.mubr.bf16.gmra.mrb[12].mxu0 %v3202_v6  ;;  %v1503_v13 = vsel %vm7265_vm7, %v1498_v0, %v1502_v49  ;;  %v525_v14 = vor.u32 %v524_v2, %v521_v1  ;;  %v5861_v15 = vld [vmem:[%s7245_s26 + $0x50] sm:$0x1]  ;;  %v2007_v16 = vrot.slane %v5860_v3, 5  ;;  %v6885_v21 = vld [vmem:[#allocation3 + $0x150] ss:$8 sps:$4 sm:$0xff]  }
  0x96   : > { %v1513_v18 = vsel %vm7265_vm7, %v1508_v7, %v1512_v55  ;;  %v535_v19 = vor.u32 %v534_v9, %v530_v8  ;;  %v2010_v20 = vrot.slane %v5861_v15, 5  ;;  %v6887_v26 = vld [vmem:[#allocation3 + $0x154] ss:$8 sps:$4 sm:$0xff]   ;;  %v5795_v27 = vld [vmem:[%s7245_s26 + $0x48] sm:$0xf] }
  0x97   : > { %4787 = vmatpush1.bf16.msra.mxu0 %v6878_v37  ;;  %v5832_v22 = vcombine.low %v1503_v13, %v1513_v18  ;;  %v526_v23 = vrot.slane %v525_v14, 4  ;;  %v2008_v24 = vsel %vm7256_vm6, %v5897_v5, %v2007_v16  ;;  %v2009_v25 = vrot.slane %v2007_v16, 4  ;;  %v5796_v30 = vld [vmem:[%s7245_s26 + $0x4c] sm:$0xf]  ;;  %v5797_v31 = vld [vmem:[%s7245_s26 + $0x50] sm:$0x1]  ;;  %4394 = vmatprep.subr.bf16.mxu1 %v6887_v26 }
  0x98   : > { %4788 = vmatprep.subr.bf16.mxu0 %v6883_v47  ;;  %v536_v29 = vrot.slane %v535_v19, 4  ;;  %v1515_v35 = vshrl.u32 %v5795_v27, 16  ;;  %v1518_v36 = vshll.u32 %v5795_v27, 16  ;;  %v6888_v37 = vld [vmem:[#allocation3 + $0x3a0] ss:$8 sps:$4 sm:$0xff]   ;;  %v1524_v40 = vshll.u32 %v5796_v30, 16  ;;  %4395 = vmatpush1.bf16.msra.mxu1 %v6885_v21 }
  0x99   : > { %v3212_v28 = vld [vmem:[#allocation2 + $0x148] sm:$0xff]  ;;  %1846 = vst.msk [vmem:[#allocation2 + $0x140] sm:$0xff] %vm313_vm0, %v5832_v22  ;;  %v531_v33 = vsel %vm7265_vm7, %v526_v23, %v530_v8  ;;  %v2011_v34 = vsel %vm7256_vm6, %v2009_v25, %v2010_v20  ;;  %v1528_v41 = vshrl.u32 %v5796_v30, 16  ;;  %v6894_v43 = vld [vmem:[%s7245_s26 + $0x48] sm:$0xff]   ;;  %v1534_v47 = vshll.u32 %v5797_v31, 16 }
  0x9a   : > { %v3208_v32 = vld [vmem:[#allocation2 + $0x128] sm:$0xff]  ;;  %4649 = vmatprep.mubr.bf16.mxu0 %v3212_v28  ;;  %1862 = vst.msk [vmem:[#allocation2 + $0x140] sm:$0xff] %vm330_vm1, %v7133_v10  ;;  %v541_v38 = vsel %vm7265_vm7, %v536_v29, %v540_v11  ;;  %v5913_v39 = vcombine.low %v2008_v24, %v2011_v34  ;;  %v1517_v45 = vrot.slane %v1515_v35, 4  ;;  %v1520_v46 = vrot.slane %v1518_v36, 5  ;;  %v6891_v48 = vld [vmem:[#allocation3 + $0x3b0] ss:$8 sps:$4 sm:$0xff]  }
  0x9b   : > { %4789 = vmatpush1.bf16.msra.mxu0 %v6881_v51  ;;  %4263 = vmatprep.mubr.bf16.mxu1 %v3208_v32  ;;  %v6890_v42 = vld [vmem:[#allocation3 + $0x3a4] ss:$8 sps:$4 sm:$0xff]   ;;  %v5689_v44 = vcombine.low %v531_v33, %v541_v38  ;;  %v1526_v49 = vrot.slane %v1524_v40, 5  ;;  %v1530_v50 = vrot.slane %v1528_v41, 4  ;;  %v6893_v51 = vld [vmem:[#allocation3 + $0x3b4] ss:$8 sps:$4 sm:$0xff]  }
  0x9c   : > { %4264 = vmatmul.mubr.bf16.gmra.mrb[16].mxu1 %v3207_v17  ;;  %2151 = vst.msk [vmem:[#allocation2 + $0x190] sm:$0xff] %vm313_vm0, %v5913_v39  ;;  %4790 = vmatprep.subr.bf16.mxu0 %v6890_v42  ;;  %v365_v52 = vld [vmem:[%s7245_s26 + $0x48] sm:$0xf]  ;;  %320 = vst.msk [vmem:[#allocation2 + $0x1b0] sm:$0xff] %vm313_vm0, %v6894_v43  ;;  %v1521_v53 = vor.u32 %v1520_v46, %v1517_v45  ;;  %v1536_v54 = vrot.slane %v1534_v47, 5  ;;  %v3216_v28 = vld [vmem:[#allocation2 + $0x168] sm:$0xff] }
  0x9d   : > { %851 = vst.msk [vmem:[#allocation2 + $0x170] sm:$0xff] %vm313_vm0, %v5689_v44  ;;  %v366_v55 = vld [vmem:[%s7245_s26 + $0x4c] sm:$0xf]  ;;  %v367_v56 = vld [vmem:[%s7245_s26 + $0x50] sm:$0x1]  ;;  %v543_v57 = vshrl.u32 %v365_v52, 16  ;;  %v1531_v58 = vor.u32 %v1530_v50, %v1526_v49 }
  0x9e   : > { %2167 = vst.msk [vmem:[#allocation2 + $0x190] sm:$0xff] %vm330_vm1, %v7133_v10  ;;  %337 = vst.msk [vmem:[#allocation2 + $0x1b0] sm:$0xff] %vm330_vm1, %v7133_v10  ;;  %v546_v59 = vshll.u32 %v365_v52, 16  ;;  %v552_v60 = vshll.u32 %v366_v55, 16  ;;  %v556_v61 = vshrl.u32 %v366_v55, 16  ;;  %v1522_v63 = vrot.slane %v1521_v53, 4 }
  0x9f   : > { %4791 = vmatpush1.bf16.msra.mxu0 %v6888_v37  ;;  %867 = vst.msk [vmem:[#allocation2 + $0x170] sm:$0xff] %vm330_vm1, %v7133_v10  ;;  %v5862_v62 = vld [vmem:[%s7245_s26 + $0x54] sm:$0xe]  ;;  %v545_v0 = vrot.slane %v543_v57, 4  ;;  %v562_v1 = vshll.u32 %v367_v56, 16  ;;  %v1532_v5 = vrot.slane %v1531_v58, 4 }
  0xa0   : > { %4792 = vmatprep.subr.bf16.mxu0 %v6893_v51  ;;  %v5863_v2 = vld [vmem:[%s7245_s26 + $0x58] sm:$0xf]  ;;  %v5898_v3 = vrot.slane %v5862_v62, 9  ;;  %v548_v6 = vrot.slane %v546_v59, 5  ;;  %v554_v7 = vrot.slane %v552_v60, 5  ;;  %v558_v8 = vrot.slane %v556_v61, 4 }
  0xa1   : > { %v5864_v9 = vld [vmem:[%s7245_s26 + $0x5c] sm:$0x1]  ;;  %v3211_v11 = vld [vmem:[#allocation2 + $0x140] sm:$0xff]  ;;  %v1527_v13 = vsel %vm7265_vm7, %v1522_v63, %v1526_v49  ;;  %v564_v14 = vrot.slane %v562_v1, 5  ;;  %v2014_v15 = vrot.slane %v5863_v2, 5  ;;  %v1537_v17 = vsel %vm7265_vm7, %v1532_v5, %v1536_v54 }
  0xa2   : > { %v2017_v16 = vrot.slane %v5864_v9, 5  ;;  %4650 = vmatmul.mubr.bf16.gmra.mrb[16].mxu0 %v3211_v11  ;;  %v549_v18 = vor.u32 %v548_v6, %v545_v0  ;;  %v559_v19 = vor.u32 %v558_v8, %v554_v7  ;;  %v6895_v20 = vld [vmem:[#allocation3 + $0x160] ss:$8 sps:$4 sm:$0xff]   ;;  %v6897_v21 = vld [vmem:[#allocation3 + $0x164] ss:$8 sps:$4 sm:$0xff]   ;;  %v5833_v22 = vcombine.low %v1527_v13, %v1537_v17 }
  0xa3   : > { %4793 = vmatpush1.bf16.msra.mxu0 %v6891_v48  ;;  %v2015_v23 = vsel %vm7256_vm6, %v5898_v3, %v2014_v15  ;;  %v2016_v24 = vrot.slane %v2014_v15, 4  ;;  %v5798_v25 = vld [vmem:[%s7245_s26 + $0x54] sm:$0xf]  ;;  %v5799_v26 = vld [vmem:[%s7245_s26 + $0x58] sm:$0xf]  ;;  %4396 = vmatprep.subr.bf16.mxu1 %v6897_v21 }
  0xa4   : > { %v550_v29 = vrot.slane %v549_v18, 4  ;;  %v560_v30 = vrot.slane %v559_v19, 4  ;;  %v5800_v31 = vld [vmem:[%s7245_s26 + $0x5c] sm:$0x1]  ;;  %1847 = vst.msk [vmem:[#allocation2 + $0x188] sm:$0xff] %vm313_vm0, %v5833_v22  ;;  %v1539_v34 = vshrl.u32 %v5798_v25, 16  ;;  %4397 = vmatpush1.bf16.msra.mxu1 %v6895_v20 }
  0xa5   : > { %v3221_v27 = vld [vmem:[#allocation2 + $0x190] sm:$0xff]  ;;  %v2018_v33 = vsel %vm7256_vm6, %v2016_v24, %v2017_v16  ;;  %v1542_v35 = vshll.u32 %v5798_v25, 16  ;;  %v1548_v36 = vshll.u32 %v5799_v26, 16  ;;  %1863 = vst.msk [vmem:[#allocation2 + $0x188] sm:$0xff] %vm330_vm1, %v7133_v10  ;;  %v1552_v40 = vshrl.u32 %v5799_v26, 16  ;;  %v6904_v48 = vld [vmem:[%s7245_s26 + $0x54] sm:$0xff]  }
  0xa6   : > { %v3217_v32 = vld [vmem:[#allocation2 + $0x170] sm:$0xff]  ;;  %4659 = vmatprep.mubr.bf16.mxu0 %v3221_v27  ;;  %v555_v37 = vsel %vm7265_vm7, %v550_v29, %v554_v7  ;;  %v565_v38 = vsel %vm7265_vm7, %v560_v30, %v564_v14  ;;  %v5914_v39 = vcombine.low %v2015_v23, %v2018_v33  ;;  %v6898_v41 = vld [vmem:[#allocation3 + $0x3c0] ss:$8 sps:$4 sm:$0xff]   ;;  %v6900_v42 = vld [vmem:[#allocation3 + $0x3c4] ss:$8 sps:$4 sm:$0xff]   ;;  %v1541_v44 = vrot.slane %v1539_v34, 4 }
  0xa7   : > { %4273 = vmatprep.mubr.bf16.mxu1 %v3217_v32  ;;  %v5690_v43 = vcombine.low %v555_v37, %v565_v38  ;;  %v1544_v45 = vrot.slane %v1542_v35, 5  ;;  %v1550_v46 = vrot.slane %v1548_v36, 5  ;;  %v6901_v47 = vld [vmem:[#allocation3 + $0x3d0] ss:$8 sps:$4 sm:$0xff]   ;;  %v1554_v49 = vrot.slane %v1552_v40, 4  ;;  %4794 = vmatprep.subr.bf16.mxu0 %v6900_v42  ;;  %321 = vst.msk [vmem:[#allocation2 + $0x1f8] sm:$0xff] %vm313_vm0, %v6904_v48 }
  0xa8   : > { %4274 = vmatmul.mubr.bf16.gmra.mrb[20].mxu1 %v3216_v28  ;;  %2152 = vst.msk [vmem:[#allocation2 + $0x1d8] sm:$0xff] %vm313_vm0, %v5914_v39  ;;  %v1558_v50 = vshll.u32 %v5800_v31, 16  ;;  %v6903_v51 = vld [vmem:[#allocation3 + $0x3d4] ss:$8 sps:$4 sm:$0xff]   ;;  %v368_v52 = vld [vmem:[%s7245_s26 + $0x54] sm:$0xf]  ;;  %4795 = vmatpush1.bf16.msra.mxu0 %v6898_v41 }
  0xa9   : > { %852 = vst.msk [vmem:[#allocation2 + $0x1b8] sm:$0xff] %vm313_vm0, %v5690_v43  ;;  %v1545_v53 = vor.u32 %v1544_v45, %v1541_v44  ;;  %v369_v54 = vld [vmem:[%s7245_s26 + $0x58] sm:$0xf]  ;;  %v370_v55 = vld [vmem:[%s7245_s26 + $0x5c] sm:$0x1]  ;;  %v567_v56 = vshrl.u32 %v368_v52, 16  ;;  %v1555_v58 = vor.u32 %v1554_v49, %v1550_v46  ;;  %4796 = vmatprep.subr.bf16.mxu0 %v6903_v51 }
  0xaa   : > { %2168 = vst.msk [vmem:[#allocation2 + $0x1d8] sm:$0xff] %vm330_vm1, %v7133_v10  ;;  %v570_v57 = vshll.u32 %v368_v52, 16  ;;  %868 = vst.msk [vmem:[#allocation2 + $0x1b8] sm:$0xff] %vm330_vm1, %v7133_v10  ;;  %v1560_v59 = vrot.slane %v1558_v50, 5  ;;  %v576_v60 = vshll.u32 %v369_v54, 16  ;;  %v580_v61 = vshrl.u32 %v369_v54, 16 }
  0xab   : > { %v5865_v62 = vld [vmem:[%s7245_s26 + $0x60] sm:$0xe]  ;;  %338 = vst.msk [vmem:[#allocation2 + $0x1f8] sm:$0xff] %vm330_vm1, %v7133_v10  ;;  %v1546_v63 = vrot.slane %v1545_v53, 4  ;;  %v569_v0 = vrot.slane %v567_v56, 4  ;;  %v586_v2 = vshll.u32 %v370_v55, 16 }
  0xac   : > { %v572_v1 = vrot.slane %v570_v57, 5  ;;  %v5866_v3 = vld [vmem:[%s7245_s26 + $0x64] sm:$0xf]  ;;  %v1556_v5 = vrot.slane %v1555_v58, 4  ;;  %v578_v6 = vrot.slane %v576_v60, 5  ;;  %v582_v7 = vrot.slane %v580_v61, 4  ;;  %4797 = vmatpush1.bf16.msra.mxu0 %v6901_v47 }
  0xad   : > { %v5867_v8 = vld [vmem:[%s7245_s26 + $0x68] sm:$0x1]  ;;  %v5899_v9 = vrot.slane %v5865_v62, 9  ;;  %v3220_v11 = vld [vmem:[#allocation2 + $0x188] sm:$0xff]  ;;  %v1551_v13 = vsel %vm7265_vm7, %v1546_v63, %v1550_v46  ;;  %v588_v15 = vrot.slane %v586_v2, 5  ;;  %v2021_v16 = vrot.slane %v5866_v3, 5 }
  0xae   : > { %v573_v14 = vor.u32 %v572_v1, %v569_v0  ;;  %4660 = vmatmul.mubr.bf16.gmra.mrb[20].mxu0 %v3220_v11  ;;  %v3225_v17 = vld [vmem:[#allocation2 + $0x1b0] sm:$0xff]  ;;  %v1561_v18 = vsel %vm7265_vm7, %v1556_v5, %v1560_v59  ;;  %v583_v19 = vor.u32 %v582_v7, %v578_v6  ;;  %v2024_v20 = vrot.slane %v5867_v8, 5  ;;  %v5803_v31 = vld [vmem:[%s7245_s26 + $0x68] sm:$0x1]  ;;  %v6908_v41 = vld [vmem:[#allocation3 + $0x3e0] ss:$8 sps:$4 sm:$0xff]  }
  0xaf   : > { %v6905_v21 = vld [vmem:[#allocation3 + $0x170] ss:$8 sps:$4 sm:$0xff]   ;;  %v5834_v22 = vcombine.low %v1551_v13, %v1561_v18  ;;  %v2022_v24 = vsel %vm7256_vm6, %v5899_v9, %v2021_v16  ;;  %v2023_v25 = vrot.slane %v2021_v16, 4  ;;  %v6907_v26 = vld [vmem:[#allocation3 + $0x174] ss:$8 sps:$4 sm:$0xff]   ;;  %v1582_v46 = vshll.u32 %v5803_v31, 16 }
  0xb0   : > { %v574_v23 = vrot.slane %v573_v14, 4  ;;  %v5801_v27 = vld [vmem:[%s7245_s26 + $0x60] sm:$0xf]  ;;  %v584_v29 = vrot.slane %v583_v19, 4  ;;  %v5802_v30 = vld [vmem:[%s7245_s26 + $0x64] sm:$0xf]  ;;  %4398 = vmatprep.subr.bf16.mxu1 %v6907_v26 }
  0xb1   : > { %v3230_v28 = vld [vmem:[#allocation2 + $0x1d8] sm:$0xff]  ;;  %1848 = vst.msk [vmem:[#allocation2 + $0x1d0] sm:$0xff] %vm313_vm0, %v5834_v22  ;;  %v2025_v34 = vsel %vm7256_vm6, %v2023_v25, %v2024_v20  ;;  %v1563_v35 = vshrl.u32 %v5801_v27, 16  ;;  %v1566_v36 = vshll.u32 %v5801_v27, 16  ;;  %v1572_v39 = vshll.u32 %v5802_v30, 16  ;;  %4399 = vmatpush1.bf16.msra.mxu1 %v6905_v21  ;;  %v6914_v47 = vld [vmem:[%s7245_s26 + $0x60] sm:$0xff]  }
  0xb2   : > { %v3226_v32 = vld [vmem:[#allocation2 + $0x1b8] sm:$0xff]  ;;  %4669 = vmatprep.mubr.bf16.mxu0 %v3230_v28  ;;  %v579_v33 = vsel %vm7265_vm7, %v574_v23, %v578_v6  ;;  %1864 = vst.msk [vmem:[#allocation2 + $0x1d0] sm:$0xff] %vm330_vm1, %v7133_v10  ;;  %v589_v37 = vsel %vm7265_vm7, %v584_v29, %v588_v15  ;;  %v5915_v38 = vcombine.low %v2022_v24, %v2025_v34  ;;  %v1576_v40 = vshrl.u32 %v5802_v30, 16  ;;  %v6910_v42 = vld [vmem:[#allocation3 + $0x3e4] ss:$8 sps:$4 sm:$0xff]  }
  0xb3   : > { %4283 = vmatprep.mubr.bf16.mxu1 %v3226_v32  ;;  %v5691_v43 = vcombine.low %v579_v33, %v589_v37  ;;  %v1565_v44 = vrot.slane %v1563_v35, 4  ;;  %v1568_v45 = vrot.slane %v1566_v36, 5  ;;  %v1574_v48 = vrot.slane %v1572_v39, 5  ;;  %4798 = vmatprep.subr.bf16.mxu0 %v6910_v42  ;;  %v6911_v50 = vld [vmem:[#allocation3 + $0x3f0] ss:$8 sps:$4 sm:$0xff]   ;;  %322 = vst.msk [vmem:[#allocation2 + $0x240] sm:$0xff] %vm313_vm0, %v6914_v47 }
  0xb4   : > { %4284 = vmatmul.mubr.bf16.gmra.mrb[24].mxu1 %v3225_v17  ;;  %2153 = vst.msk [vmem:[#allocation2 + $0x220] sm:$0xff] %vm313_vm0, %v5915_v38  ;;  %v1578_v49 = vrot.slane %v1576_v40, 4  ;;  %v6913_v51 = vld [vmem:[#allocation3 + $0x3f4] ss:$8 sps:$4 sm:$0xff]   ;;  %v1584_v53 = vrot.slane %v1582_v46, 5  ;;  %4799 = vmatpush1.bf16.msra.mxu0 %v6908_v41  ;;  %v6918_v1 = vld [vmem:[%s7245_s26 + $0x18] sm:$0xff]  }
  0xb5   : > { %853 = vst.msk [vmem:[#allocation2 + $0x200] sm:$0xff] %vm313_vm0, %v5691_v43  ;;  %v1569_v52 = vor.u32 %v1568_v45, %v1565_v44  ;;  %v371_v54 = vld [vmem:[%s7245_s26 + $0x60] sm:$0xf]  ;;  %v372_v55 = vld [vmem:[%s7245_s26 + $0x64] sm:$0xf]  ;;  %4800 = vmatprep.subr.bf16.mxu0 %v6913_v51  ;;  %2307 = vst.msk [vmem:[#allocation2 + $0x30] sm:$0xff] %vm313_vm0, %v6918_v1 }
  0xb6   : > { %2169 = vst.msk [vmem:[#allocation2 + $0x220] sm:$0xff] %vm330_vm1, %v7133_v10  ;;  %869 = vst.msk [vmem:[#allocation2 + $0x200] sm:$0xff] %vm330_vm1, %v7133_v10  ;;  %v1579_v56 = vor.u32 %v1578_v49, %v1574_v48  ;;  %v373_v57 = vld [vmem:[%s7245_s26 + $0x68] sm:$0x1]  ;;  %v591_v58 = vshrl.u32 %v371_v54, 16  ;;  %v594_v59 = vshll.u32 %v371_v54, 16 }
  0xb7   : > { %v600_v60 = vshll.u32 %v372_v55, 16  ;;  %339 = vst.msk [vmem:[#allocation2 + $0x240] sm:$0xff] %vm330_vm1, %v7133_v10  ;;  %v1570_v61 = vrot.slane %v1569_v52, 4  ;;  %v604_v62 = vshrl.u32 %v372_v55, 16  ;;  %v610_v63 = vshll.u32 %v373_v57, 16  ;;  %v3234_v16 = vld [vmem:[#allocation2 + $0x1f8] sm:$0xff] }
  0xb8   : > { %v5972_v0 = vld [vmem:[%s7245_s26 + $0x18] sm:$0xf]  ;;  %v1580_v2 = vrot.slane %v1579_v56, 4  ;;  %v593_v3 = vrot.slane %v591_v58, 4  ;;  %v596_v5 = vrot.slane %v594_v59, 5  ;;  %4801 = vmatpush1.bf16.msra.mxu0 %v6911_v50  ;;  %2323 = vst.msk [vmem:[#allocation2 + $0x30] sm:$0xff] %vm330_vm1, %v7133_v10 }
  0xb9   : > { %v602_v6 = vrot.slane %v600_v60, 5  ;;  %v5973_v7 = vld [vmem:[%s7245_s26 + $0x1c] sm:$0xf]  ;;  %v3229_v8 = vld [vmem:[#allocation2 + $0x1d0] sm:$0xff]  ;;  %v1575_v9 = vsel %vm7265_vm7, %v1570_v61, %v1574_v48  ;;  %v606_v11 = vrot.slane %v604_v62, 4  ;;  %v612_v13 = vrot.slane %v610_v63, 5 }
  0xba   : > { %v5974_v14 = vld [vmem:[%s7245_s26 + $0x20] sm:$0x1]  ;;  %v2388_v15 = vshrl.u32 %v5972_v0, 16  ;;  %4670 = vmatmul.mubr.bf16.gmra.mrb[24].mxu0 %v3229_v8  ;;  %v1585_v17 = vsel %vm7265_vm7, %v1580_v2, %v1584_v53  ;;  %v597_v18 = vor.u32 %v596_v5, %v593_v3  ;;  %v2391_v19 = vshll.u32 %v5972_v0, 16  ;;  %v6915_v25 = vld [vmem:[#allocation3 + $0x180] ss:$8 sps:$4 sm:$0xff]  }
  0xbb   : > { %v2397_v20 = vshll.u32 %v5973_v7, 16  ;;  %v5835_v21 = vcombine.low %v1575_v9, %v1585_v17  ;;  %v607_v22 = vor.u32 %v606_v11, %v602_v6  ;;  %v2401_v24 = vshrl.u32 %v5973_v7, 16  ;;  %v6917_v26 = vld [vmem:[#allocation3 + $0x184] ss:$8 sps:$4 sm:$0xff]   ;;  %v374_v41 = vld [vmem:[%s7245_s26 + $0x6c] sm:$0xf] }
  0xbc   : > { %v2390_v23 = vrot.slane %v2388_v15, 4  ;;  %v598_v28 = vrot.slane %v597_v18, 4  ;;  %v2393_v29 = vrot.slane %v2391_v19, 5  ;;  %v2407_v31 = vshll.u32 %v5974_v14, 16  ;;  %4400 = vmatprep.subr.bf16.mxu1 %v6917_v26  ;;  %v6921_v40 = vld [vmem:[#allocation3 + $0x404] ss:$8 sps:$4 sm:$0xff]  }
  0xbd   : > { %v3239_v27 = vld [vmem:[#allocation2 + $0x220] sm:$0xff]  ;;  %v2399_v30 = vrot.slane %v2397_v20, 5  ;;  %1849 = vst.msk [vmem:[#allocation2 + $0x218] sm:$0xff] %vm313_vm0, %v5835_v21  ;;  %v608_v33 = vrot.slane %v607_v22, 4  ;;  %v2403_v34 = vrot.slane %v2401_v24, 4  ;;  %4401 = vmatpush1.bf16.msra.mxu1 %v6915_v25  ;;  %v615_v46 = vshrl.u32 %v374_v41, 16  ;;  %4963 = vmatprep.subr.bf16.mxu0 %v6921_v40 }
  0xbe   : > { %v3235_v32 = vld [vmem:[#allocation2 + $0x200] sm:$0xff]  ;;  %4679 = vmatprep.mubr.bf16.mxu0 %v3239_v27  ;;  %1865 = vst.msk [vmem:[#allocation2 + $0x218] sm:$0xff] %vm330_vm1, %v7133_v10  ;;  %v603_v35 = vsel %vm7265_vm7, %v598_v28, %v602_v6  ;;  %v2394_v36 = vor.u32 %v2393_v29, %v2390_v23  ;;  %v2409_v37 = vrot.slane %v2407_v31, 5  ;;  %v618_v47 = vshll.u32 %v374_v41, 16  ;;  %v5975_v56 = vld [vmem:[%s7245_s26 + $0x24] sm:$0xf] }
  0xbf   : > { %4293 = vmatprep.mubr.bf16.mxu1 %v3235_v32  ;;  %v613_v38 = vsel %vm7265_vm7, %v608_v33, %v612_v13  ;;  %v2404_v39 = vor.u32 %v2403_v34, %v2399_v30  ;;  %v375_v42 = vld [vmem:[%s7245_s26 + $0x70] sm:$0xf]  ;;  %v376_v45 = vld [vmem:[%s7245_s26 + $0x74] sm:$0x1]  ;;  %v617_v54 = vrot.slane %v615_v46, 4  ;;  %v2412_v1 = vshrl.u32 %v5975_v56, 16 }
  0xc0   : > { %4294 = vmatmul.mubr.bf16.gmra.mrb[28].mxu1 %v3234_v16  ;;  %v5692_v43 = vcombine.low %v603_v35, %v613_v38  ;;  %v2395_v44 = vrot.slane %v2394_v36, 4  ;;  %v6922_v48 = vld [vmem:[%s7245_s26 + $0x6c] sm:$0xff]   ;;  %v624_v50 = vshll.u32 %v375_v42, 16  ;;  %v628_v51 = vshrl.u32 %v375_v42, 16  ;;  %v5976_v57 = vld [vmem:[%s7245_s26 + $0x28] sm:$0xf] }
  0xc1   : > { %v2405_v49 = vrot.slane %v2404_v39, 4  ;;  %v634_v52 = vshll.u32 %v376_v45, 16  ;;  %v620_v55 = vrot.slane %v618_v47, 5  ;;  %323 = vst.msk [vmem:[#allocation2 + $0x288] sm:$0xff] %vm313_vm0, %v6922_v48  ;;  %v5977_v62 = vld [vmem:[%s7245_s26 + $0x2c] sm:$0x1] }
  0xc2   : > { %854 = vst.msk [vmem:[#allocation2 + $0x248] sm:$0xff] %vm313_vm0, %v5692_v43  ;;  %v2400_v53 = vsel %vm7265_vm7, %v2395_v44, %v2399_v30  ;;  %v626_v59 = vrot.slane %v624_v50, 5  ;;  %v630_v60 = vrot.slane %v628_v51, 4  ;;  %v2415_v2 = vshll.u32 %v5975_v56, 16  ;;  %v6923_v9 = vld [vmem:[#allocation3 + $0x190] ss:$8 sps:$4 sm:$0xff]  }
  0xc3   : > { %870 = vst.msk [vmem:[#allocation2 + $0x248] sm:$0xff] %vm330_vm1, %v7133_v10  ;;  %v2410_v58 = vsel %vm7265_vm7, %v2405_v49, %v2409_v37  ;;  %v636_v61 = vrot.slane %v634_v52, 5  ;;  %340 = vst.msk [vmem:[#allocation2 + $0x288] sm:$0xff] %vm330_vm1, %v7133_v10  ;;  %v621_v0 = vor.u32 %v620_v55, %v617_v54  ;;  %v2421_v6 = vshll.u32 %v5976_v57, 16  ;;  %v6925_v15 = vld [vmem:[#allocation3 + $0x194] ss:$8 sps:$4 sm:$0xff]  }
  0xc4   : > { %v6020_v63 = vcombine.low %v2400_v53, %v2410_v58  ;;  %v631_v5 = vor.u32 %v630_v60, %v626_v59  ;;  %v2425_v7 = vshrl.u32 %v5976_v57, 16  ;;  %v2431_v8 = vshll.u32 %v5977_v62, 16  ;;  %v6926_v16 = vld [vmem:[%s7245_s26 + $0x24] sm:$0xff]   ;;  %v3243_v17 = vld [vmem:[#allocation2 + $0x240] sm:$0xff]  ;;  %4402 = vmatprep.subr.bf16.mxu1 %v6925_v15  ;;  %v377_v24 = vld [vmem:[%s7245_s26 + $0x78] sm:$0xf] }
  0xc5   : > { %v3238_v3 = vld [vmem:[#allocation2 + $0x218] sm:$0xff]  ;;  %v622_v11 = vrot.slane %v621_v0, 4  ;;  %v2414_v13 = vrot.slane %v2412_v1, 4  ;;  %v2417_v14 = vrot.slane %v2415_v2, 5  ;;  %v2423_v19 = vrot.slane %v2421_v6, 5  ;;  %2308 = vst.msk [vmem:[#allocation2 + $0x78] sm:$0xff] %vm313_vm0, %v6926_v16  ;;  %4403 = vmatpush1.bf16.msra.mxu1 %v6923_v9 }
  0xc6   : > { %4680 = vmatmul.mubr.bf16.gmra.mrb[28].mxu0 %v3238_v3  ;;  %2835 = vst.msk [vmem:[#allocation2 + $0x38] sm:$0xff] %vm313_vm0, %v6020_v63  ;;  %v632_v18 = vrot.slane %v631_v5, 4  ;;  %v2427_v20 = vrot.slane %v2425_v7, 4  ;;  %v2433_v21 = vrot.slane %v2431_v8, 5  ;;  %v378_v25 = vld [vmem:[%s7245_s26 + $0x7c] sm:$0xf] }
  0xc7   : > { %2851 = vst.msk [vmem:[#allocation2 + $0x38] sm:$0xff] %vm330_vm1, %v7133_v10  ;;  %v627_v22 = vsel %vm7265_vm7, %v622_v11, %v626_v59  ;;  %v2418_v23 = vor.u32 %v2417_v14, %v2414_v13  ;;  %2324 = vst.msk [vmem:[#allocation2 + $0x78] sm:$0xff] %vm330_vm1, %v7133_v10  ;;  %v379_v28 = vld [vmem:[%s7245_s26 + $0x80] sm:$0x1]  ;;  %v639_v29 = vshrl.u32 %v377_v24, 16  ;;  %v642_v30 = vshll.u32 %v377_v24, 16 }
  0xc8   : > { %v637_v26 = vsel %vm7265_vm7, %v632_v18, %v636_v61  ;;  %v2428_v27 = vor.u32 %v2427_v20, %v2423_v19  ;;  %v5978_v31 = vld [vmem:[%s7245_s26 + $0x30] sm:$0xf]  ;;  %v648_v35 = vshll.u32 %v378_v25, 16  ;;  %v652_v36 = vshrl.u32 %v378_v25, 16  ;;  %v6927_v37 = vld [vmem:[%s7245_s26 + $0x78] sm:$0xff]   ;;  %v3177_v38 = vld [vmem:[#allocation2 + $0x30] sm:$0xff] }
  0xc9   : > { %v5693_v33 = vcombine.low %v627_v22, %v637_v26  ;;  %v2419_v34 = vrot.slane %v2418_v23, 4  ;;  %v6919_v39 = vld [vmem:[#allocation3 + $0x400] ss:$8 sps:$4 sm:$0xff]   ;;  %v641_v41 = vrot.slane %v639_v29, 4  ;;  %v644_v42 = vrot.slane %v642_v30, 5  ;;  %324 = vst.msk [vmem:[#allocation2 + $0x2d0] sm:$0xff] %vm313_vm0, %v6927_v37 }
  0xca   : > { %v3244_v32 = vld [vmem:[#allocation2 + $0x248] sm:$0xff]  ;;  %v2429_v40 = vrot.slane %v2428_v27, 4  ;;  %v658_v43 = vshll.u32 %v379_v28, 16  ;;  %v5979_v44 = vld [vmem:[%s7245_s26 + $0x34] sm:$0xf]  ;;  %v650_v46 = vrot.slane %v648_v35, 5 }
  0xcb   : > { %4303 = vmatprep.mubr.bf16.mxu1 %v3244_v32  ;;  %855 = vst.msk [vmem:[#allocation2 + $0x290] sm:$0xff] %vm313_vm0, %v5693_v33  ;;  %v2424_v45 = vsel %vm7265_vm7, %v2419_v34, %v2423_v19  ;;  %v654_v47 = vrot.slane %v652_v36, 4  ;;  %v5980_v48 = vld [vmem:[%s7245_s26 + $0x38] sm:$0x1]  ;;  %v2436_v49 = vshrl.u32 %v5978_v31, 16  ;;  %v645_v51 = vor.u32 %v644_v42, %v641_v41  ;;  %v6931_v3 = vld [vmem:[%s7245_s26 + $0x30] sm:$0xff]  }
  0xcc   : > { %4304 = vmatmul.mubr.bf16.gmra.mrb[32].mxu1 %v3243_v17  ;;  %871 = vst.msk [vmem:[#allocation2 + $0x290] sm:$0xff] %vm330_vm1, %v7133_v10  ;;  %v2434_v50 = vsel %vm7265_vm7, %v2429_v40, %v2433_v21  ;;  %v660_v52 = vrot.slane %v658_v43, 5  ;;  %v2439_v53 = vshll.u32 %v5978_v31, 16  ;;  %341 = vst.msk [vmem:[#allocation2 + $0x2d0] sm:$0xff] %vm330_vm1, %v7133_v10  ;;  %v2445_v58 = vshll.u32 %v5979_v44, 16  ;;  %v3252_v5 = vld [vmem:[#allocation2 + $0x288] sm:$0xff] }
  0xcd   : > { %v6021_v55 = vcombine.low %v2424_v45, %v2434_v50  ;;  %v655_v56 = vor.u32 %v654_v47, %v650_v46  ;;  %v2438_v57 = vrot.slane %v2436_v49, 4  ;;  %v6928_v59 = vld [vmem:[#allocation3 + $0x1a0] ss:$8 sps:$4 sm:$0xff]   ;;  %v646_v60 = vrot.slane %v645_v51, 4  ;;  %v6930_v0 = vld [vmem:[#allocation3 + $0x1a4] ss:$8 sps:$4 sm:$0xff]  }
  0xce   : > { %v3178_v54 = vld [vmem:[#allocation2 + $0x38] sm:$0xff]  ;;  %v2441_v61 = vrot.slane %v2439_v53, 5  ;;  %v2449_v62 = vshrl.u32 %v5979_v44, 16  ;;  %v2455_v63 = vshll.u32 %v5980_v48, 16  ;;  %v2447_v2 = vrot.slane %v2445_v58, 5  ;;  %4404 = vmatprep.subr.bf16.mxu1 %v6930_v0  ;;  %2309 = vst.msk [vmem:[#allocation2 + $0xc0] sm:$0xff] %vm313_vm0, %v6931_v3 }
  0xcf   : > { %4802 = vmatprep.mubr.bf16.mxu0 %v3178_v54  ;;  %2836 = vst.msk [vmem:[#allocation2 + $0x80] sm:$0xff] %vm313_vm0, %v6021_v55  ;;  %v656_v1 = vrot.slane %v655_v56, 4  ;;  %v651_v6 = vsel %vm7265_vm7, %v646_v60, %v650_v46  ;;  %4405 = vmatpush1.bf16.msra.mxu1 %v6928_v59  ;;  %v6932_v13 = vld [vmem:[#allocation3 + $0x410] ss:$8 sps:$4 sm:$0xff]   ;;  %v6934_v14 = vld [vmem:[#allocation3 + $0x414] ss:$8 sps:$4 sm:$0xff]  }
  0xd0   : > { %4803 = vmatmul.mubr.bf16.vlgmr.msra.gmra.mrb[0].mxu0 %v3177_v38  ;;  %2852 = vst.msk [vmem:[#allocation2 + $0x80] sm:$0xff] %vm330_vm1, %v7133_v10  ;;  %v2442_v7 = vor.u32 %v2441_v61, %v2438_v57  ;;  %v2451_v8 = vrot.slane %v2449_v62, 4  ;;  %v2457_v9 = vrot.slane %v2455_v63, 5  ;;  %v380_v15 = vld [vmem:[%s7245_s26 + $0x84] sm:$0xf]  ;;  %2325 = vst.msk [vmem:[#allocation2 + $0xc0] sm:$0xff] %vm330_vm1, %v7133_v10 }
  0xd1   : > { %4964 = vmatpush1.bf16.msra.mxu0 %v6919_v39  ;;  %v661_v11 = vsel %vm7265_vm7, %v656_v1, %v660_v52  ;;  %v381_v19 = vld [vmem:[%s7245_s26 + $0x88] sm:$0xf]  ;;  %v382_v20 = vld [vmem:[%s7245_s26 + $0x8c] sm:$0x1]  ;;  %v663_v21 = vshrl.u32 %v380_v15, 16  ;;  %v666_v23 = vshll.u32 %v380_v15, 16 }
  0xd2   : > { %v5694_v16 = vcombine.low %v651_v6, %v661_v11  ;;  %v2443_v17 = vrot.slane %v2442_v7, 4  ;;  %v2452_v18 = vor.u32 %v2451_v8, %v2447_v2  ;;  %4965 = vmatprep.subr.bf16.mxu0 %v6934_v14  ;;  %v672_v24 = vshll.u32 %v381_v19, 16  ;;  %v3186_v27 = vld [vmem:[#allocation2 + $0x78] sm:$0xff]  ;;  %v5981_v31 = vld [vmem:[%s7245_s26 + $0x3c] sm:$0xf]  ;;  %v6940_v61 = vld [vmem:[%s7245_s26 + $0x90] sm:$0xff]  }
  0xd3   : > { %v3253_v22 = vld [vmem:[#allocation2 + $0x290] sm:$0xff]  ;;  %v676_v25 = vshrl.u32 %v381_v19, 16  ;;  %v682_v26 = vshll.u32 %v382_v20, 16  ;;  %v665_v30 = vrot.slane %v663_v21, 4  ;;  %v668_v33 = vrot.slane %v666_v23, 5  ;;  %326 = vst.msk [vmem:[#allocation2 + $0x360] sm:$0xff] %vm313_vm0, %v6940_v61 }
  0xd4   : > { %4313 = vmatprep.mubr.bf16.mxu1 %v3253_v22  ;;  %856 = vst.msk [vmem:[#allocation2 + $0x2d8] sm:$0xff] %vm313_vm0, %v5694_v16  ;;  %v2448_v28 = vsel %vm7265_vm7, %v2443_v17, %v2447_v2  ;;  %v2453_v29 = vrot.slane %v2452_v18, 4  ;;  %v5982_v32 = vld [vmem:[%s7245_s26 + $0x40] sm:$0xf]  ;;  %v674_v34 = vrot.slane %v672_v24, 5  ;;  %v2460_v39 = vshrl.u32 %v5981_v31, 16 }
  0xd5   : > { %4966 = vmatpush1.bf16.msra.mxu0 %v6932_v13  ;;  %4314 = vmatmul.mubr.bf16.gmra.mrb[36].mxu1 %v3252_v5  ;;  %872 = vst.msk [vmem:[#allocation2 + $0x2d8] sm:$0xff] %vm330_vm1, %v7133_v10  ;;  %v678_v35 = vrot.slane %v676_v25, 4  ;;  %v684_v36 = vrot.slane %v682_v26, 5  ;;  %v5983_v37 = vld [vmem:[%s7245_s26 + $0x44] sm:$0x1]  ;;  %v2463_v40 = vshll.u32 %v5981_v31, 16  ;;  %v669_v45 = vor.u32 %v668_v33, %v665_v30 }
  0xd6   : > { %v2458_v38 = vsel %vm7265_vm7, %v2453_v29, %v2457_v9  ;;  %v2469_v41 = vshll.u32 %v5982_v32, 16  ;;  %v6935_v42 = vld [vmem:[%s7245_s26 + $0x84] sm:$0xff]   ;;  %v2473_v47 = vshrl.u32 %v5982_v32, 16  ;;  %v2462_v48 = vrot.slane %v2460_v39, 4  ;;  %v6939_v52 = vld [vmem:[%s7245_s26 + $0x3c] sm:$0xff]   ;;  %343 = vst.msk [vmem:[#allocation2 + $0x360] sm:$0xff] %vm330_vm1, %v7133_v10 }
  0xd7   : > { %v3187_v43 = vld [vmem:[#allocation2 + $0x80] sm:$0xff]  ;;  %v6022_v44 = vcombine.low %v2448_v28, %v2458_v38  ;;  %v679_v46 = vor.u32 %v678_v35, %v674_v34  ;;  %v2465_v49 = vrot.slane %v2463_v40, 5  ;;  %v2479_v51 = vshll.u32 %v5983_v37, 16  ;;  %325 = vst.msk [vmem:[#allocation2 + $0x318] sm:$0xff] %vm313_vm0, %v6935_v42  ;;  %v3261_v53 = vld [vmem:[#allocation2 + $0x2d0] sm:$0xff]  ;;  %2310 = vst.msk [vmem:[#allocation2 + $0x108] sm:$0xff] %vm313_vm0, %v6939_v52 }
  0xd8   : > { %4812 = vmatprep.mubr.bf16.mxu0 %v3187_v43  ;;  %v2471_v50 = vrot.slane %v2469_v41, 5  ;;  %v670_v54 = vrot.slane %v669_v45, 4  ;;  %v2475_v56 = vrot.slane %v2473_v47, 4  ;;  %342 = vst.msk [vmem:[#allocation2 + $0x318] sm:$0xff] %vm330_vm1, %v7133_v10  ;;  %v6936_v57 = vld [vmem:[#allocation3 + $0x1b0] ss:$8 sps:$4 sm:$0xff]  }
  0xd9   : > { %4813 = vmatmul.mubr.bf16.gmra.mrb[4].mxu0 %v3186_v27  ;;  %2837 = vst.msk [vmem:[#allocation2 + $0xc8] sm:$0xff] %vm313_vm0, %v6022_v44  ;;  %v680_v55 = vrot.slane %v679_v46, 4  ;;  %v2466_v58 = vor.u32 %v2465_v49, %v2462_v48  ;;  %v2481_v59 = vrot.slane %v2479_v51, 5  ;;  %v6938_v60 = vld [vmem:[#allocation3 + $0x1b4] ss:$8 sps:$4 sm:$0xff]   ;;  %v3195_v26 = vld [vmem:[#allocation2 + $0xc0] sm:$0xff] }
  0xda   : > { %2853 = vst.msk [vmem:[#allocation2 + $0xc8] sm:$0xff] %vm330_vm1, %v7133_v10  ;;  %v675_v62 = vsel %vm7265_vm7, %v670_v54, %v674_v34  ;;  %v2476_v0 = vor.u32 %v2475_v56, %v2471_v50  ;;  %2326 = vst.msk [vmem:[#allocation2 + $0x108] sm:$0xff] %vm330_vm1, %v7133_v10  ;;  %v383_v1 = vld [vmem:[%s7245_s26 + $0x90] sm:$0xf]  ;;  %v384_v2 = vld [vmem:[%s7245_s26 + $0x94] sm:$0xf]  ;;  %4406 = vmatprep.subr.bf16.mxu1 %v6938_v60 }
  0xdb   : > { %v685_v63 = vsel %vm7265_vm7, %v680_v55, %v684_v36  ;;  %v2467_v6 = vrot.slane %v2466_v58, 4  ;;  %v385_v7 = vld [vmem:[%s7245_s26 + $0x98] sm:$0x1]  ;;  %v687_v8 = vshrl.u32 %v383_v1, 16  ;;  %v690_v9 = vshll.u32 %v383_v1, 16  ;;  %4407 = vmatpush1.bf16.msra.mxu1 %v6936_v57  ;;  %v6944_v47 = vld [vmem:[%s7245_s26 + $0x48] sm:$0xff]  }
  0xdc   : > { %v3262_v3 = vld [vmem:[#allocation2 + $0x2d8] sm:$0xff]  ;;  %v5695_v5 = vcombine.low %v675_v62, %v685_v63  ;;  %v2477_v11 = vrot.slane %v2476_v0, 4  ;;  %v696_v13 = vshll.u32 %v384_v2, 16  ;;  %v700_v14 = vshrl.u32 %v384_v2, 16  ;;  %v5986_v21 = vld [vmem:[%s7245_s26 + $0x50] sm:$0x1] }
  0xdd   : > { %4323 = vmatprep.mubr.bf16.mxu1 %v3262_v3  ;;  %v706_v15 = vshll.u32 %v385_v7, 16  ;;  %v5984_v16 = vld [vmem:[%s7245_s26 + $0x48] sm:$0xf]  ;;  %v2472_v17 = vsel %vm7265_vm7, %v2467_v6, %v2471_v50  ;;  %v689_v18 = vrot.slane %v687_v8, 4  ;;  %v692_v19 = vrot.slane %v690_v9, 5  ;;  %2311 = vst.msk [vmem:[#allocation2 + $0x150] sm:$0xff] %vm313_vm0, %v6944_v47 }
  0xde   : > { %4324 = vmatmul.mubr.bf16.gmra.mrb[40].mxu1 %v3261_v53  ;;  %857 = vst.msk [vmem:[#allocation2 + $0x320] sm:$0xff] %vm313_vm0, %v5695_v5  ;;  %v5985_v20 = vld [vmem:[%s7245_s26 + $0x4c] sm:$0xf]  ;;  %v2482_v22 = vsel %vm7265_vm7, %v2477_v11, %v2481_v59  ;;  %v698_v23 = vrot.slane %v696_v13, 5  ;;  %v702_v24 = vrot.slane %v700_v14, 4  ;;  %v2484_v29 = vshrl.u32 %v5984_v16, 16 }
  0xdf   : > { %873 = vst.msk [vmem:[#allocation2 + $0x320] sm:$0xff] %vm330_vm1, %v7133_v10  ;;  %v708_v25 = vrot.slane %v706_v15, 5  ;;  %v6023_v27 = vcombine.low %v2472_v17, %v2482_v22  ;;  %v693_v28 = vor.u32 %v692_v19, %v689_v18  ;;  %v2487_v30 = vshll.u32 %v5984_v16, 16  ;;  %v6941_v36 = vld [vmem:[#allocation3 + $0x1c0] ss:$8 sps:$4 sm:$0xff]   ;;  %v3270_v44 = vld [vmem:[#allocation2 + $0x318] sm:$0xff] }
  0xe0   : > { %v703_v32 = vor.u32 %v702_v24, %v698_v23  ;;  %v2493_v33 = vshll.u32 %v5985_v20, 16  ;;  %v2497_v34 = vshrl.u32 %v5985_v20, 16  ;;  %v2503_v35 = vshll.u32 %v5986_v21, 16  ;;  %v6943_v40 = vld [vmem:[#allocation3 + $0x1c4] ss:$8 sps:$4 sm:$0xff]   ;;  %2327 = vst.msk [vmem:[#allocation2 + $0x150] sm:$0xff] %vm330_vm1, %v7133_v10 }
  0xe1   : > { %v3196_v31 = vld [vmem:[#allocation2 + $0xc8] sm:$0xff]  ;;  %2838 = vst.msk [vmem:[#allocation2 + $0x110] sm:$0xff] %vm313_vm0, %v6023_v27  ;;  %v694_v37 = vrot.slane %v693_v28, 4  ;;  %v2486_v38 = vrot.slane %v2484_v29, 4  ;;  %v2489_v39 = vrot.slane %v2487_v30, 5  ;;  %4408 = vmatprep.subr.bf16.mxu1 %v6943_v40 }
  0xe2   : > { %4822 = vmatprep.mubr.bf16.mxu0 %v3196_v31  ;;  %2854 = vst.msk [vmem:[#allocation2 + $0x110] sm:$0xff] %vm330_vm1, %v7133_v10  ;;  %v704_v41 = vrot.slane %v703_v32, 4  ;;  %v2495_v42 = vrot.slane %v2493_v33, 5  ;;  %v2499_v43 = vrot.slane %v2497_v34, 4  ;;  %v2505_v50 = vrot.slane %v2503_v35, 5  ;;  %4409 = vmatpush1.bf16.msra.mxu1 %v6941_v36  ;;  %v3204_v57 = vld [vmem:[#allocation2 + $0x108] sm:$0xff] }
  0xe3   : > { %4823 = vmatmul.mubr.bf16.gmra.mrb[8].mxu0 %v3195_v26  ;;  %v699_v45 = vsel %vm7265_vm7, %v694_v37, %v698_v23  ;;  %v2490_v46 = vor.u32 %v2489_v39, %v2486_v38  ;;  %v6945_v51 = vld [vmem:[#allocation3 + $0x420] ss:$8 sps:$4 sm:$0xff]   ;;  %v6947_v55 = vld [vmem:[#allocation3 + $0x424] ss:$8 sps:$4 sm:$0xff]   ;;  %v387_v59 = vld [vmem:[%s7245_s26 + $0xa0] sm:$0xf] }
  0xe4   : > { %v709_v48 = vsel %vm7265_vm7, %v704_v41, %v708_v25  ;;  %v2500_v49 = vor.u32 %v2499_v43, %v2495_v42  ;;  %v386_v56 = vld [vmem:[%s7245_s26 + $0x9c] sm:$0xf]  ;;  %v388_v60 = vld [vmem:[%s7245_s26 + $0xa4] sm:$0x1]  ;;  %4967 = vmatprep.subr.bf16.mxu0 %v6947_v55  ;;  %v720_v0 = vshll.u32 %v387_v59, 16  ;;  %v724_v1 = vshrl.u32 %v387_v59, 16 }
  0xe5   : > { %v5696_v53 = vcombine.low %v699_v45, %v709_v48  ;;  %v2491_v54 = vrot.slane %v2490_v46, 4  ;;  %v711_v61 = vshrl.u32 %v386_v56, 16  ;;  %v714_v63 = vshll.u32 %v386_v56, 16  ;;  %v5987_v2 = vld [vmem:[%s7245_s26 + $0x54] sm:$0xf]  ;;  %v6948_v3 = vld [vmem:[%s7245_s26 + $0x9c] sm:$0xff]   ;;  %4968 = vmatpush1.bf16.msra.mxu0 %v6945_v51 }
  0xe6   : > { %v3271_v52 = vld [vmem:[#allocation2 + $0x320] sm:$0xff]  ;;  %v2501_v58 = vrot.slane %v2500_v49, 4  ;;  %v730_v7 = vshll.u32 %v388_v60, 16  ;;  %v5988_v8 = vld [vmem:[%s7245_s26 + $0x58] sm:$0xf]  ;;  %v722_v15 = vrot.slane %v720_v0, 5 }
  0xe7   : > { %4333 = vmatprep.mubr.bf16.mxu1 %v3271_v52  ;;  %858 = vst.msk [vmem:[#allocation2 + $0x368] sm:$0xff] %vm313_vm0, %v5696_v53  ;;  %v2496_v62 = vsel %vm7265_vm7, %v2491_v54, %v2495_v42  ;;  %v713_v6 = vrot.slane %v711_v61, 4  ;;  %v5989_v9 = vld [vmem:[%s7245_s26 + $0x5c] sm:$0x1]  ;;  %v716_v14 = vrot.slane %v714_v63, 5  ;;  %v726_v16 = vrot.slane %v724_v1, 4 }
  0xe8   : > { %4334 = vmatmul.mubr.bf16.gmra.mrb[44].mxu1 %v3270_v44  ;;  %874 = vst.msk [vmem:[#allocation2 + $0x368] sm:$0xff] %vm330_vm1, %v7133_v10  ;;  %v2506_v5 = vsel %vm7265_vm7, %v2501_v58, %v2505_v50  ;;  %v732_v17 = vrot.slane %v730_v7, 5  ;;  %v2508_v18 = vshrl.u32 %v5987_v2, 16  ;;  %v2511_v19 = vshll.u32 %v5987_v2, 16  ;;  %v6949_v25 = vld [vmem:[#allocation3 + $0x1d0] ss:$8 sps:$4 sm:$0xff]  }
  0xe9   : > { %v3205_v11 = vld [vmem:[#allocation2 + $0x110] sm:$0xff]  ;;  %v6024_v13 = vcombine.low %v2496_v62, %v2506_v5  ;;  %327 = vst.msk [vmem:[#allocation2 + $0x3a8] sm:$0xff] %vm313_vm0, %v6948_v3  ;;  %v2517_v20 = vshll.u32 %v5988_v8, 16  ;;  %v717_v21 = vor.u32 %v716_v14, %v713_v6  ;;  %v727_v22 = vor.u32 %v726_v16, %v722_v15  ;;  %v6952_v30 = vld [vmem:[%s7245_s26 + $0x54] sm:$0xff]   ;;  %v6953_v36 = vld [vmem:[%s7245_s26 + $0xa8] sm:$0xff]  }
  0xea   : > { %4832 = vmatprep.mubr.bf16.mxu0 %v3205_v11  ;;  %344 = vst.msk [vmem:[#allocation2 + $0x3a8] sm:$0xff] %vm330_vm1, %v7133_v10  ;;  %v2521_v23 = vshrl.u32 %v5988_v8, 16  ;;  %v2527_v24 = vshll.u32 %v5989_v9, 16  ;;  %v2510_v26 = vrot.slane %v2508_v18, 4  ;;  %v2513_v27 = vrot.slane %v2511_v19, 5  ;;  %v3279_v31 = vld [vmem:[#allocation2 + $0x360] sm:$0xff] }
  0xeb   : > { %4833 = vmatmul.mubr.bf16.gmra.mrb[12].mxu0 %v3204_v57  ;;  %2839 = vst.msk [vmem:[#allocation2 + $0x158] sm:$0xff] %vm313_vm0, %v6024_v13  ;;  %v2519_v28 = vrot.slane %v2517_v20, 5  ;;  %v6951_v29 = vld [vmem:[#allocation3 + $0x1d4] ss:$8 sps:$4 sm:$0xff]   ;;  %v718_v32 = vrot.slane %v717_v21, 4  ;;  %v728_v33 = vrot.slane %v727_v22, 4 }
  0xec   : > { %2855 = vst.msk [vmem:[#allocation2 + $0x158] sm:$0xff] %vm330_vm1, %v7133_v10  ;;  %v2523_v34 = vrot.slane %v2521_v23, 4  ;;  %v2529_v35 = vrot.slane %v2527_v24, 5  ;;  %v2514_v37 = vor.u32 %v2513_v27, %v2510_v26  ;;  %4410 = vmatprep.subr.bf16.mxu1 %v6951_v29  ;;  %v389_v38 = vld [vmem:[%s7245_s26 + $0xa8] sm:$0xf]  ;;  %v3213_v51 = vld [vmem:[#allocation2 + $0x150] sm:$0xff] }
  0xed   : > { %2312 = vst.msk [vmem:[#allocation2 + $0x198] sm:$0xff] %vm313_vm0, %v6952_v30  ;;  %v723_v40 = vsel %vm7265_vm7, %v718_v32, %v722_v15  ;;  %v733_v41 = vsel %vm7265_vm7, %v728_v33, %v732_v17  ;;  %4411 = vmatpush1.bf16.msra.mxu1 %v6949_v25  ;;  %v390_v43 = vld [vmem:[%s7245_s26 + $0xac] sm:$0xf]  ;;  %v391_v44 = vld [vmem:[%s7245_s26 + $0xb0] sm:$0x1]  ;;  %v735_v45 = vshrl.u32 %v389_v38, 16 }
  0xee   : > { %v2524_v42 = vor.u32 %v2523_v34, %v2519_v28  ;;  %2328 = vst.msk [vmem:[#allocation2 + $0x198] sm:$0xff] %vm330_vm1, %v7133_v10  ;;  %v5697_v46 = vcombine.low %v723_v40, %v733_v41  ;;  %v2515_v47 = vrot.slane %v2514_v37, 4  ;;  %v738_v48 = vshll.u32 %v389_v38, 16  ;;  %v5990_v50 = vld [vmem:[%s7245_s26 + $0x60] sm:$0xf] }
  0xef   : > { %v3280_v39 = vld [vmem:[#allocation2 + $0x368] sm:$0xff]  ;;  %328 = vst.msk [vmem:[#allocation2 + $0x3f0] sm:$0xff] %vm313_vm0, %v6953_v36  ;;  %v744_v49 = vshll.u32 %v390_v43, 16  ;;  %v737_v53 = vrot.slane %v735_v45, 4  ;;  %v748_v54 = vshrl.u32 %v390_v43, 16  ;;  %v754_v55 = vshll.u32 %v391_v44, 16 }
  0xf0   : > { %4343 = vmatprep.mubr.bf16.mxu1 %v3280_v39  ;;  %345 = vst.msk [vmem:[#allocation2 + $0x3f0] sm:$0xff] %vm330_vm1, %v7133_v10  ;;  %v2525_v52 = vrot.slane %v2524_v42, 4  ;;  %v2520_v56 = vsel %vm7265_vm7, %v2515_v47, %v2519_v28  ;;  %v740_v57 = vrot.slane %v738_v48, 5  ;;  %v5991_v59 = vld [vmem:[%s7245_s26 + $0x64] sm:$0xf]  ;;  %v2532_v1 = vshrl.u32 %v5990_v50, 16 }
  0xf1   : > { %4344 = vmatmul.mubr.bf16.gmra.mrb[48].mxu1 %v3279_v31  ;;  %859 = vst.msk [vmem:[#allocation2 + $0x3b0] sm:$0xff] %vm313_vm0, %v5697_v46  ;;  %v746_v58 = vrot.slane %v744_v49, 5  ;;  %v5992_v60 = vld [vmem:[%s7245_s26 + $0x68] sm:$0x1]  ;;  %v750_v63 = vrot.slane %v748_v54, 4  ;;  %v756_v0 = vrot.slane %v754_v55, 5 }
  0xf2   : > { %875 = vst.msk [vmem:[#allocation2 + $0x3b0] sm:$0xff] %vm330_vm1, %v7133_v10  ;;  %v2530_v62 = vsel %vm7265_vm7, %v2525_v52, %v2529_v35  ;;  %v741_v3 = vor.u32 %v740_v57, %v737_v53  ;;  %v2535_v5 = vshll.u32 %v5990_v50, 16  ;;  %v2541_v6 = vshll.u32 %v5991_v59, 16  ;;  %v6954_v7 = vld [vmem:[#allocation3 + $0x1e0] ss:$8 sps:$4 sm:$0xff]   ;;  %v6957_v15 = vld [vmem:[%s7245_s26 + $0x60] sm:$0xff]  }
  0xf3   : > { %v3214_v61 = vld [vmem:[#allocation2 + $0x158] sm:$0xff]  ;;  %v6025_v2 = vcombine.low %v2520_v56, %v2530_v62  ;;  %v751_v8 = vor.u32 %v750_v63, %v746_v58  ;;  %v2534_v9 = vrot.slane %v2532_v1, 4  ;;  %v2545_v11 = vshrl.u32 %v5991_v59, 16  ;;  %v6956_v14 = vld [vmem:[#allocation3 + $0x1e4] ss:$8 sps:$4 sm:$0xff]   ;;  %2313 = vst.msk [vmem:[#allocation2 + $0x1e0] sm:$0xff] %vm313_vm0, %v6957_v15 }
  0xf4   : > { %4842 = vmatprep.mubr.bf16.mxu0 %v3214_v61  ;;  %v2551_v13 = vshll.u32 %v5992_v60, 16  ;;  %v742_v16 = vrot.slane %v741_v3, 4  ;;  %v2537_v17 = vrot.slane %v2535_v5, 5  ;;  %v2543_v18 = vrot.slane %v2541_v6, 5  ;;  %v3288_v19 = vld [vmem:[#allocation2 + $0x3a8] sm:$0xff]  ;;  %4412 = vmatprep.subr.bf16.mxu1 %v6956_v14  ;;  %2329 = vst.msk [vmem:[#allocation2 + $0x1e0] sm:$0xff] %vm330_vm1, %v7133_v10 }
  0xf5   : > { %4843 = vmatmul.mubr.bf16.gmra.mrb[16].mxu0 %v3213_v51  ;;  %2840 = vst.msk [vmem:[#allocation2 + $0x1a0] sm:$0xff] %vm313_vm0, %v6025_v2  ;;  %v752_v20 = vrot.slane %v751_v8, 4  ;;  %v2547_v21 = vrot.slane %v2545_v11, 4  ;;  %4413 = vmatpush1.bf16.msra.mxu1 %v6954_v7  ;;  %v6958_v25 = vld [vmem:[#allocation3 + $0x430] ss:$8 sps:$4 sm:$0xff]   ;;  %v6961_v52 = vld [vmem:[%s7245_s26 + $0xb4] sm:$0xff]  }
  0xf6   : > { %2856 = vst.msk [vmem:[#allocation2 + $0x1a0] sm:$0xff] %vm330_vm1, %v7133_v10  ;;  %v747_v22 = vsel %vm7265_vm7, %v742_v16, %v746_v58  ;;  %v2538_v23 = vor.u32 %v2537_v17, %v2534_v9  ;;  %v2553_v24 = vrot.slane %v2551_v13, 5  ;;  %v6960_v28 = vld [vmem:[#allocation3 + $0x434] ss:$8 sps:$4 sm:$0xff]   ;;  %v392_v29 = vld [vmem:[%s7245_s26 + $0xb4] sm:$0xf] }
  0xf7   : > { %v757_v26 = vsel %vm7265_vm7, %v752_v20, %v756_v0  ;;  %v2548_v27 = vor.u32 %v2547_v21, %v2543_v18  ;;  %v393_v30 = vld [vmem:[%s7245_s26 + $0xb8] sm:$0xf]  ;;  %v394_v34 = vld [vmem:[%s7245_s26 + $0xbc] sm:$0x1]  ;;  %v759_v35 = vshrl.u32 %v392_v29, 16  ;;  %v762_v36 = vshll.u32 %v392_v29, 16  ;;  %4969 = vmatprep.subr.bf16.mxu0 %v6960_v28 }
  0xf8   : > { %v5698_v32 = vcombine.low %v747_v22, %v757_v26  ;;  %v2539_v33 = vrot.slane %v2538_v23, 4  ;;  %v3222_v37 = vld [vmem:[#allocation2 + $0x198] sm:$0xff]  ;;  %v768_v39 = vshll.u32 %v393_v30, 16  ;;  %v772_v40 = vshrl.u32 %v393_v30, 16  ;;  %4970 = vmatpush1.bf16.msra.mxu0 %v6958_v25  ;;  %v5994_v46 = vld [vmem:[%s7245_s26 + $0x70] sm:$0xf] }
  0xf9   : > { %v3289_v31 = vld [vmem:[#allocation2 + $0x3b0] sm:$0xff]  ;;  %v2549_v38 = vrot.slane %v2548_v27, 4  ;;  %v778_v41 = vshll.u32 %v394_v34, 16  ;;  %v5993_v42 = vld [vmem:[%s7245_s26 + $0x6c] sm:$0xf]  ;;  %v761_v44 = vrot.slane %v759_v35, 4 }
  0xfa   : > { %4353 = vmatprep.mubr.bf16.mxu1 %v3289_v31  ;;  %860 = vst.msk [vmem:[#allocation2 + $0x3f8] sm:$0xff] %vm313_vm0, %v5698_v32  ;;  %v2544_v43 = vsel %vm7265_vm7, %v2539_v33, %v2543_v18  ;;  %v764_v45 = vrot.slane %v762_v36, 5  ;;  %v5995_v47 = vld [vmem:[%s7245_s26 + $0x74] sm:$0x1]  ;;  %v770_v49 = vrot.slane %v768_v39, 5  ;;  %v774_v50 = vrot.slane %v772_v40, 4 }
  0xfb   : > { %4354 = vmatmul.mubr.bf16.gmra.mrb[52].mxu1 %v3288_v19  ;;  %876 = vst.msk [vmem:[#allocation2 + $0x3f8] sm:$0xff] %vm330_vm1, %v7133_v10  ;;  %v2554_v48 = vsel %vm7265_vm7, %v2549_v38, %v2553_v24  ;;  %v780_v51 = vrot.slane %v778_v41, 5  ;;  %v2556_v56 = vshrl.u32 %v5993_v42, 16  ;;  %v2559_v57 = vshll.u32 %v5993_v42, 16  ;;  %v6965_v62 = vld [vmem:[%s7245_s26 + $0x6c] sm:$0xff]   ;;  %v3297_v5 = vld [vmem:[#allocation2 + $0x3f0] sm:$0xff] }
  0xfc   : > { %v6026_v54 = vcombine.low %v2544_v43, %v2554_v48  ;;  %v765_v55 = vor.u32 %v764_v45, %v761_v44  ;;  %v775_v58 = vor.u32 %v774_v50, %v770_v49  ;;  %v2565_v59 = vshll.u32 %v5994_v46, 16  ;;  %329 = vst.msk [vmem:[#allocation2 + $0x438] sm:$0xff] %vm313_vm0, %v6961_v52  ;;  %v6962_v2 = vld [vmem:[#allocation3 + $0x1f0] ss:$8 sps:$4 sm:$0xff]   ;;  %v6966_v3 = vld [vmem:[%s7245_s26 + $0xc] sm:$0xff]   ;;  %2314 = vst.msk [vmem:[#allocation2 + $0x228] sm:$0xff] %vm313_vm0, %v6965_v62 }
  0xfd   : > { %v3223_v53 = vld [vmem:[#allocation2 + $0x1a0] sm:$0xff]  ;;  %v2569_v60 = vshrl.u32 %v5994_v46, 16  ;;  %v2575_v61 = vshll.u32 %v5995_v47, 16  ;;  %v2558_v0 = vrot.slane %v2556_v56, 4  ;;  %v2561_v1 = vrot.slane %v2559_v57, 5  ;;  %346 = vst.msk [vmem:[#allocation2 + $0x438] sm:$0xff] %vm330_vm1, %v7133_v10 }
  0xfe   : > { %4852 = vmatprep.mubr.bf16.mxu0 %v3223_v53  ;;  %2841 = vst.msk [vmem:[#allocation2 + $0x1e8] sm:$0xff] %vm313_vm0, %v6026_v54  ;;  %v766_v63 = vrot.slane %v765_v55, 4  ;;  %v776_v6 = vrot.slane %v775_v58, 4  ;;  %v2567_v7 = vrot.slane %v2565_v59, 5  ;;  %v6964_v11 = vld [vmem:[#allocation3 + $0x1f4] ss:$8 sps:$4 sm:$0xff]  }
  0xff   : > { %4853 = vmatmul.mubr.bf16.gmra.mrb[20].mxu0 %v3222_v37  ;;  %2857 = vst.msk [vmem:[#allocation2 + $0x1e8] sm:$0xff] %vm330_vm1, %v7133_v10  ;;  %v2571_v8 = vrot.slane %v2569_v60, 4  ;;  %v2577_v9 = vrot.slane %v2575_v61, 5  ;;  %v2562_v14 = vor.u32 %v2561_v1, %v2558_v0  ;;  %2330 = vst.msk [vmem:[#allocation2 + $0x228] sm:$0xff] %vm330_vm1, %v7133_v10  ;;  %4414 = vmatprep.subr.bf16.mxu1 %v6964_v11  ;;  %v5996_v17 = vld [vmem:[%s7245_s26 + $0x78] sm:$0xf] }
 0x100   : > { %v771_v13 = vsel %vm7265_vm7, %v766_v63, %v770_v49  ;;  %1314 = vst.msk [vmem:[#allocation2 + $0x18] sm:$0xff] %vm313_vm0, %v6966_v3  ;;  %v781_v15 = vsel %vm7265_vm7, %v776_v6, %v780_v51  ;;  %v5997_v18 = vld [vmem:[%s7245_s26 + $0x7c] sm:$0xf]  ;;  %4415 = vmatpush1.bf16.msra.mxu1 %v6962_v2  ;;  %v5998_v22 = vld [vmem:[%s7245_s26 + $0x80] sm:$0x1]  ;;  %v2580_v23 = vshrl.u32 %v5996_v17, 16 }
 0x101   : > { %v2572_v16 = vor.u32 %v2571_v8, %v2567_v7  ;;  %1330 = vst.msk [vmem:[#allocation2 + $0x18] sm:$0xff] %vm330_vm1, %v7133_v10  ;;  %v5699_v20 = vcombine.low %v771_v13, %v781_v15  ;;  %v2563_v21 = vrot.slane %v2562_v14, 4  ;;  %v2583_v24 = vshll.u32 %v5996_v17, 16  ;;  %v878_v29 = vld [vmem:[%s7245_s26] sm:$0xe]  ;;  %v3231_v36 = vld [vmem:[#allocation2 + $0x1e0] sm:$0xff] }
 0x102   : > { %v3298_v19 = vld [vmem:[#allocation2 + $0x3f8] sm:$0xff]  ;;  %v2589_v26 = vshll.u32 %v5997_v18, 16  ;;  %v2593_v27 = vshrl.u32 %v5997_v18, 16  ;;  %v2599_v28 = vshll.u32 %v5998_v22, 16  ;;  %v7002_v30 = vld [vmem:[#allocation3 + $0x204] ss:$8 sps:$4 sm:$0xff]  }
 0x103   : > { %4363 = vmatprep.mubr.bf16.mxu1 %v3298_v19  ;;  %v2573_v25 = vrot.slane %v2572_v16, 4  ;;  %6330 = vmatprep.subr.bf16.mxu1 %v7002_v30  ;;  %861 = vst.msk [vmem:[#allocation2 + $0x440] sm:$0xff] %vm313_vm0, %v5699_v20  ;;  %v2568_v31 = vsel %vm7265_vm7, %v2563_v21, %v2567_v7  ;;  %v2582_v32 = vrot.slane %v2580_v23, 4  ;;  %v2585_v33 = vrot.slane %v2583_v24, 5  ;;  %v879_v34 = vld [vmem:[%s7245_s26 + $0x4] sm:$0xf] }
 0x104   : > { %4364 = vmatmul.mubr.bf16.gmra.mrb[56].mxu1 %v3297_v5  ;;  %v880_v35 = vld [vmem:[%s7245_s26 + $0x8] sm:$0x1]  ;;  %877 = vst.msk [vmem:[#allocation2 + $0x440] sm:$0xff] %vm330_vm1, %v7133_v10  ;;  %v2591_v38 = vrot.slane %v2589_v26, 5  ;;  %v2595_v39 = vrot.slane %v2593_v27, 4  ;;  %v5700_v43 = vrot.slane %v878_v29, 9 }
 0x105   : > { %v2578_v37 = vsel %vm7265_vm7, %v2573_v25, %v2577_v9  ;;  %v2586_v42 = vor.u32 %v2585_v33, %v2582_v32  ;;  %v979_v44 = vrot.slane %v879_v34, 5  ;;  %v6967_v45 = vld [vmem:[%s7245_s26 + $0x78] sm:$0xff]   ;;  %v2601_v47 = vrot.slane %v2599_v28, 5  ;;  %v3306_v54 = vld [vmem:[#allocation2 + $0x438] sm:$0xff]  ;;  %v5999_v61 = vld [vmem:[%s7245_s26 + $0x84] sm:$0xf] }
 0x106   : > { %v3232_v40 = vld [vmem:[#allocation2 + $0x1e8] sm:$0xff]  ;;  %v6027_v41 = vcombine.low %v2568_v31, %v2578_v37  ;;  %v2596_v46 = vor.u32 %v2595_v39, %v2591_v38  ;;  %v982_v48 = vrot.slane %v880_v35, 5  ;;  %2315 = vst.msk [vmem:[#allocation2 + $0x270] sm:$0xff] %vm313_vm0, %v6967_v45  ;;  %v6972_v57 = vld [vmem:[%s7245_s26 + $0x84] sm:$0xff]   ;;  %v6001_v1 = vld [vmem:[%s7245_s26 + $0x8c] sm:$0x1] }
 0x107   : > { %4862 = vmatprep.mubr.bf16.mxu0 %v3232_v40  ;;  %v2587_v49 = vrot.slane %v2586_v42, 4  ;;  %v980_v50 = vsel %vm7256_vm6, %v5700_v43, %v979_v44  ;;  %v981_v51 = vrot.slane %v979_v44, 4  ;;  %v6968_v52 = vld [vmem:[#allocation3 + $0x440] ss:$8 sps:$4 sm:$0xff]   ;;  %2331 = vst.msk [vmem:[#allocation2 + $0x270] sm:$0xff] %vm330_vm1, %v7133_v10  ;;  %v2604_v2 = vshrl.u32 %v5999_v61, 16 }
 0x108   : > { %4863 = vmatmul.mubr.bf16.gmra.mrb[24].mxu0 %v3231_v36  ;;  %2842 = vst.msk [vmem:[#allocation2 + $0x230] sm:$0xff] %vm313_vm0, %v6027_v41  ;;  %v6971_v53 = vld [vmem:[%s7245_s26 + $0x18] sm:$0xff]   ;;  %v2597_v55 = vrot.slane %v2596_v46, 4  ;;  %v3174_v58 = vld [vmem:[#allocation2 + $0x18] sm:$0xff]  ;;  %v2607_v3 = vshll.u32 %v5999_v61, 16  ;;  %2316 = vst.msk [vmem:[#allocation2 + $0x2b8] sm:$0xff] %vm313_vm0, %v6972_v57 }
 0x109   : > { %2858 = vst.msk [vmem:[#allocation2 + $0x230] sm:$0xff] %vm330_vm1, %v7133_v10  ;;  %v6970_v56 = vld [vmem:[#allocation3 + $0x444] ss:$8 sps:$4 sm:$0xff]   ;;  %v2592_v59 = vsel %vm7265_vm7, %v2587_v49, %v2591_v38  ;;  %v983_v60 = vsel %vm7256_vm6, %v981_v51, %v982_v48  ;;  %v6000_v62 = vld [vmem:[%s7245_s26 + $0x88] sm:$0xf]  ;;  %v2623_v11 = vshll.u32 %v6001_v1, 16 }
 0x10a   : > { %1315 = vst.msk [vmem:[#allocation2 + $0x60] sm:$0xff] %vm313_vm0, %v6971_v53  ;;  %v2602_v63 = vsel %vm7265_vm7, %v2597_v55, %v2601_v47  ;;  %v5716_v0 = vcombine.low %v980_v50, %v983_v60  ;;  %4971 = vmatprep.subr.bf16.mxu0 %v6970_v56  ;;  %v881_v5 = vld [vmem:[%s7245_s26 + $0xc] sm:$0xe]  ;;  %v2613_v8 = vshll.u32 %v6000_v62, 16  ;;  %v2617_v9 = vshrl.u32 %v6000_v62, 16  ;;  %v3240_v19 = vld [vmem:[#allocation2 + $0x228] sm:$0xff] }
 0x10b   : > { %1331 = vst.msk [vmem:[#allocation2 + $0x60] sm:$0xff] %vm330_vm1, %v7133_v10  ;;  %v3307_v6 = vld [vmem:[#allocation2 + $0x440] sm:$0xff]  ;;  %v6028_v7 = vcombine.low %v2592_v59, %v2602_v63  ;;  %4972 = vmatpush1.bf16.msra.mxu0 %v6968_v52  ;;  %2332 = vst.msk [vmem:[#allocation2 + $0x2b8] sm:$0xff] %vm330_vm1, %v7133_v10  ;;  %v2606_v14 = vrot.slane %v2604_v2, 4  ;;  %v2609_v15 = vrot.slane %v2607_v3, 5  ;;  %v5701_v17 = vrot.slane %v881_v5, 9 }
 0x10c   : > { %v882_v13 = vld [vmem:[%s7245_s26 + $0x10] sm:$0xf]  ;;  %4373 = vmatprep.mubr.bf16.mxu1 %v3307_v6  ;;  %1153 = vst.msk [vmem:[#allocation2 + $0x10] sm:$0xff] %vm313_vm0, %v5716_v0  ;;  %v883_v16 = vld [vmem:[%s7245_s26 + $0x14] sm:$0x1]  ;;  %v2615_v20 = vrot.slane %v2613_v8, 5 }
 0x10d   : > { %v986_v18 = vrot.slane %v882_v13, 5  ;;  %4374 = vmatmul.mubr.bf16.gmra.mrb[60].mxu1 %v3306_v54  ;;  %2843 = vst.msk [vmem:[#allocation2 + $0x278] sm:$0xff] %vm313_vm0, %v6028_v7  ;;  %v2619_v21 = vrot.slane %v2617_v9, 4  ;;  %v989_v22 = vrot.slane %v883_v16, 5  ;;  %v2610_v23 = vor.u32 %v2609_v15, %v2606_v14  ;;  %v6973_v26 = vld [vmem:[%s7245_s26 + $0x24] sm:$0xff]   ;;  %v6974_v34 = vld [vmem:[%s7245_s26 + $0x90] sm:$0xff]  }
 0x10e   : > { %1169 = vst.msk [vmem:[#allocation2 + $0x10] sm:$0xff] %vm330_vm1, %v7133_v10  ;;  %4416 = vmatprep.mubr.bf16.mxu1 %v3174_v58  ;;  %2859 = vst.msk [vmem:[#allocation2 + $0x278] sm:$0xff] %vm330_vm1, %v7133_v10  ;;  %v2625_v29 = vrot.slane %v2623_v11, 5  ;;  %v6002_v32 = vld [vmem:[%s7245_s26 + $0x90] sm:$0xf]  ;;  %v3249_v51 = vld [vmem:[#allocation2 + $0x270] sm:$0xff] }
 0x10f   : > { %v987_v24 = vsel %vm7256_vm6, %v5701_v17, %v986_v18  ;;  %v988_v25 = vrot.slane %v986_v18, 4  ;;  %v2620_v28 = vor.u32 %v2619_v21, %v2615_v20  ;;  %v2611_v30 = vrot.slane %v2610_v23, 4  ;;  %1316 = vst.msk [vmem:[#allocation2 + $0xa8] sm:$0xff] %vm313_vm0, %v6973_v26  ;;  %v6003_v33 = vld [vmem:[%s7245_s26 + $0x94] sm:$0xf]  ;;  %2317 = vst.msk [vmem:[#allocation2 + $0x300] sm:$0xff] %vm313_vm0, %v6974_v34 }
 0x110   : > { %v3241_v27 = vld [vmem:[#allocation2 + $0x230] sm:$0xff]  ;;  %1332 = vst.msk [vmem:[#allocation2 + $0xa8] sm:$0xff] %vm330_vm1, %v7133_v10  ;;  %v6004_v37 = vld [vmem:[%s7245_s26 + $0x98] sm:$0x1]  ;;  %v2628_v38 = vshrl.u32 %v6002_v32, 16  ;;  %v2631_v39 = vshll.u32 %v6002_v32, 16 }
 0x111   : > { %4872 = vmatprep.mubr.bf16.mxu0 %v3241_v27  ;;  %v990_v31 = vsel %vm7256_vm6, %v988_v25, %v989_v22  ;;  %v2621_v35 = vrot.slane %v2620_v28, 4  ;;  %v2616_v40 = vsel %vm7265_vm7, %v2611_v30, %v2615_v20  ;;  %v2637_v41 = vshll.u32 %v6003_v33, 16  ;;  %v884_v44 = vld [vmem:[%s7245_s26 + $0x18] sm:$0xe]  ;;  %v885_v48 = vld [vmem:[%s7245_s26 + $0x1c] sm:$0xf] }
 0x112   : > { %4873 = vmatmul.mubr.bf16.gmra.mrb[28].mxu0 %v3240_v19  ;;  %v5717_v36 = vcombine.low %v987_v24, %v990_v31  ;;  %v2641_v42 = vshrl.u32 %v6003_v33, 16  ;;  %v2647_v43 = vshll.u32 %v6004_v37, 16  ;;  %v2630_v46 = vrot.slane %v2628_v38, 4  ;;  %v886_v49 = vld [vmem:[%s7245_s26 + $0x20] sm:$0x1]  ;;  %2333 = vst.msk [vmem:[#allocation2 + $0x300] sm:$0xff] %vm330_vm1, %v7133_v10 }
 0x113   : > { %v2626_v45 = vsel %vm7265_vm7, %v2621_v35, %v2625_v29  ;;  %v2633_v47 = vrot.slane %v2631_v39, 5  ;;  %v3183_v52 = vld [vmem:[#allocation2 + $0x60] sm:$0xff]  ;;  %v2639_v54 = vrot.slane %v2637_v41, 5  ;;  %v5702_v58 = vrot.slane %v884_v44, 9  ;;  %v6975_v0 = vld [vmem:[#allocation3 + $0x450] ss:$8 sps:$4 sm:$0xff]  }
 0x114   : > { %1154 = vst.msk [vmem:[#allocation2 + $0x58] sm:$0xff] %vm313_vm0, %v5717_v36  ;;  %v6029_v53 = vcombine.low %v2616_v40, %v2626_v45  ;;  %v2643_v55 = vrot.slane %v2641_v42, 4  ;;  %v993_v59 = vrot.slane %v885_v48, 5  ;;  %v996_v60 = vrot.slane %v886_v49, 5  ;;  %v7003_v61 = vld [vmem:[#allocation3 + $0x200] ss:$8 sps:$4 sm:$0xff]  }
 0x115   : > { %v3173_v50 = vld [vmem:[#allocation2 + $0x10] sm:$0xff]  ;;  %1170 = vst.msk [vmem:[#allocation2 + $0x58] sm:$0xff] %vm330_vm1, %v7133_v10  ;;  %v3250_v56 = vld [vmem:[#allocation2 + $0x278] sm:$0xff]  ;;  %v2634_v57 = vor.u32 %v2633_v47, %v2630_v46  ;;  %v2649_v63 = vrot.slane %v2647_v43, 5  ;;  %v6978_v8 = vld [vmem:[%s7245_s26 + $0x30] sm:$0xff]  }
 0x116   : > { %4417 = vmatmul.mubr.bf16.vlgmr.msra.gmra.mrb[0].mxu1 %v3173_v50  ;;  %4882 = vmatprep.mubr.bf16.mxu0 %v3250_v56  ;;  %2844 = vst.msk [vmem:[#allocation2 + $0x2c0] sm:$0xff] %vm313_vm0, %v6029_v53  ;;  %v2644_v62 = vor.u32 %v2643_v55, %v2639_v54  ;;  %v7004_v1 = vld [vmem:[#allocation3 + $0x214] ss:$8 sps:$4 sm:$0xff]   ;;  %v994_v3 = vsel %vm7256_vm6, %v5702_v58, %v993_v59  ;;  %v995_v5 = vrot.slane %v993_v59, 4  ;;  %v6005_v13 = vld [vmem:[%s7245_s26 + $0x9c] sm:$0xf] }
 0x117   : > { %6346 = vmatpush1.bf16.msra.mxu1 %v7003_v61  ;;  %4426 = vmatprep.mubr.bf16.mxu1 %v3183_v52  ;;  %2860 = vst.msk [vmem:[#allocation2 + $0x2c0] sm:$0xff] %vm330_vm1, %v7133_v10  ;;  %v2635_v2 = vrot.slane %v2634_v57, 4  ;;  %v6977_v6 = vld [vmem:[#allocation3 + $0x454] ss:$8 sps:$4 sm:$0xff]   ;;  %v6006_v14 = vld [vmem:[%s7245_s26 + $0xa0] sm:$0xf] }
 0x118   : > { %6331 = vmatprep.subr.bf16.mxu1 %v7004_v1  ;;  %v2645_v7 = vrot.slane %v2644_v62, 4  ;;  %v997_v11 = vsel %vm7256_vm6, %v995_v5, %v996_v60  ;;  %4973 = vmatprep.subr.bf16.mxu0 %v6977_v6  ;;  %v6007_v15 = vld [vmem:[%s7245_s26 + $0xa4] sm:$0x1]  ;;  %v7005_v16 = vld [vmem:[#allocation3 + $0x210] ss:$8 sps:$4 sm:$0xff]   ;;  %v3192_v17 = vld [vmem:[#allocation2 + $0xa8] sm:$0xff] }
 0x119   : > { %v2640_v9 = vsel %vm7265_vm7, %v2635_v2, %v2639_v54  ;;  %v5718_v19 = vcombine.low %v994_v3, %v997_v11  ;;  %4974 = vmatpush1.bf16.msra.mxu0 %v6975_v0  ;;  %1317 = vst.msk [vmem:[#allocation2 + $0xf0] sm:$0xff] %vm313_vm0, %v6978_v8  ;;  %v2652_v20 = vshrl.u32 %v6005_v13, 16  ;;  %v2655_v21 = vshll.u32 %v6005_v13, 16  ;;  %v887_v22 = vld [vmem:[%s7245_s26 + $0x24] sm:$0xe]  ;;  %v6979_v23 = vld [vmem:[%s7245_s26 + $0x9c] sm:$0xff]  }
 0x11a   : > { %4883 = vmatmul.mubr.bf16.gmra.mrb[32].mxu0 %v3249_v51  ;;  %v2650_v18 = vsel %vm7265_vm7, %v2645_v7, %v2649_v63  ;;  %v7006_v26 = vld [vmem:[#allocation3 + $0x224] ss:$8 sps:$4 sm:$0xff]   ;;  %1333 = vst.msk [vmem:[#allocation2 + $0xf0] sm:$0xff] %vm330_vm1, %v7133_v10  ;;  %v2661_v27 = vshll.u32 %v6006_v14, 16  ;;  %v2665_v28 = vshrl.u32 %v6006_v14, 16  ;;  %v2671_v29 = vshll.u32 %v6007_v15, 16 }
 0x11b   : > { %6347 = vmatpush1.bf16.msra.mxu1 %v7005_v16  ;;  %v6030_v25 = vcombine.low %v2640_v9, %v2650_v18  ;;  %v888_v30 = vld [vmem:[%s7245_s26 + $0x28] sm:$0xf]  ;;  %1155 = vst.msk [vmem:[#allocation2 + $0xa0] sm:$0xff] %vm313_vm0, %v5718_v19  ;;  %v2654_v31 = vrot.slane %v2652_v20, 4  ;;  %v2657_v32 = vrot.slane %v2655_v21, 5  ;;  %v5703_v34 = vrot.slane %v887_v22, 9 }
 0x11c   : > { %v3182_v24 = vld [vmem:[#allocation2 + $0x58] sm:$0xff]  ;;  %6332 = vmatprep.subr.bf16.mxu1 %v7006_v26  ;;  %v1000_v35 = vrot.slane %v888_v30, 5  ;;  %2318 = vst.msk [vmem:[#allocation2 + $0x348] sm:$0xff] %vm313_vm0, %v6979_v23  ;;  %v2663_v37 = vrot.slane %v2661_v27, 5  ;;  %v2667_v38 = vrot.slane %v2665_v28, 4  ;;  %v2673_v46 = vrot.slane %v2671_v29, 5 }
 0x11d   : > { %v889_v33 = vld [vmem:[%s7245_s26 + $0x2c] sm:$0x1]  ;;  %2845 = vst.msk [vmem:[#allocation2 + $0x308] sm:$0xff] %vm313_vm0, %v6030_v25  ;;  %v7007_v41 = vld [vmem:[#allocation3 + $0x220] ss:$8 sps:$4 sm:$0xff]   ;;  %v2658_v42 = vor.u32 %v2657_v32, %v2654_v31  ;;  %v6980_v48 = vld [vmem:[%s7245_s26 + $0x3c] sm:$0xff]  }
 0x11e   : > { %4427 = vmatmul.mubr.bf16.gmra.mrb[4].mxu1 %v3182_v24  ;;  %v3258_v36 = vld [vmem:[#allocation2 + $0x2b8] sm:$0xff]  ;;  %1171 = vst.msk [vmem:[#allocation2 + $0xa0] sm:$0xff] %vm330_vm1, %v7133_v10  ;;  %v1003_v39 = vrot.slane %v889_v33, 5  ;;  %2334 = vst.msk [vmem:[#allocation2 + $0x348] sm:$0xff] %vm330_vm1, %v7133_v10  ;;  %v3259_v40 = vld [vmem:[#allocation2 + $0x2c0] sm:$0xff]  ;;  %v1001_v43 = vsel %vm7256_vm6, %v5703_v34, %v1000_v35  ;;  %v1002_v44 = vrot.slane %v1000_v35, 4  ;;  %v2668_v45 = vor.u32 %v2667_v38, %v2663_v37 }
 0x11f   : > { %4436 = vmatprep.mubr.bf16.mxu1 %v3192_v17  ;;  %2861 = vst.msk [vmem:[#allocation2 + $0x308] sm:$0xff] %vm330_vm1, %v7133_v10  ;;  %6348 = vmatpush1.bf16.msra.mxu1 %v7007_v41  ;;  %v7008_v47 = vld [vmem:[#allocation3 + $0x234] ss:$8 sps:$4 sm:$0xff]   ;;  %v6008_v49 = vld [vmem:[%s7245_s26 + $0xa8] sm:$0xf]  ;;  %v2659_v50 = vrot.slane %v2658_v42, 4 }
 0x120   : > { %4892 = vmatprep.mubr.bf16.mxu0 %v3259_v40  ;;  %6333 = vmatprep.subr.bf16.mxu1 %v7008_v47  ;;  %v1004_v51 = vsel %vm7256_vm6, %v1002_v44, %v1003_v39  ;;  %v6009_v52 = vld [vmem:[%s7245_s26 + $0xac] sm:$0xf]  ;;  %v6010_v53 = vld [vmem:[%s7245_s26 + $0xb0] sm:$0x1]  ;;  %v2676_v54 = vshrl.u32 %v6008_v49, 16  ;;  %v2669_v55 = vrot.slane %v2668_v45, 4 }
 0x121   : > { %v5719_v56 = vcombine.low %v1001_v43, %v1004_v51  ;;  %1318 = vst.msk [vmem:[#allocation2 + $0x138] sm:$0xff] %vm313_vm0, %v6980_v48  ;;  %v2679_v57 = vshll.u32 %v6008_v49, 16  ;;  %v2685_v58 = vshll.u32 %v6009_v52, 16  ;;  %v890_v59 = vld [vmem:[%s7245_s26 + $0x30] sm:$0xe]  ;;  %v6981_v60 = vld [vmem:[%s7245_s26 + $0xa8] sm:$0xff]   ;;  %v2664_v62 = vsel %vm7265_vm7, %v2659_v50, %v2663_v37 }
 0x122   : > { %4893 = vmatmul.mubr.bf16.gmra.mrb[36].mxu0 %v3258_v36  ;;  %v3201_v61 = vld [vmem:[#allocation2 + $0xf0] sm:$0xff]  ;;  %1334 = vst.msk [vmem:[#allocation2 + $0x138] sm:$0xff] %vm330_vm1, %v7133_v10  ;;  %v2678_v0 = vrot.slane %v2676_v54, 4  ;;  %v2689_v1 = vshrl.u32 %v6009_v52, 16  ;;  %v2695_v2 = vshll.u32 %v6010_v53, 16  ;;  %v2674_v5 = vsel %vm7265_vm7, %v2669_v55, %v2673_v46  ;;  %v3267_v14 = vld [vmem:[#allocation2 + $0x300] sm:$0xff] }
 0x123   : > { %v7009_v63 = vld [vmem:[#allocation3 + $0x230] ss:$8 sps:$4 sm:$0xff]   ;;  %v891_v3 = vld [vmem:[%s7245_s26 + $0x34] sm:$0xf]  ;;  %1156 = vst.msk [vmem:[#allocation2 + $0xe8] sm:$0xff] %vm313_vm0, %v5719_v56  ;;  %v2681_v6 = vrot.slane %v2679_v57, 5  ;;  %v6031_v15 = vcombine.low %v2664_v62, %v2674_v5 }
 0x124   : > { %6349 = vmatpush1.bf16.msra.mxu1 %v7009_v63  ;;  %v2687_v7 = vrot.slane %v2685_v58, 5  ;;  %v892_v8 = vld [vmem:[%s7245_s26 + $0x38] sm:$0x1]  ;;  %v5704_v9 = vrot.slane %v890_v59, 9  ;;  %v7010_v11 = vld [vmem:[#allocation3 + $0x244] ss:$8 sps:$4 sm:$0xff]  }
 0x125   : > { %6334 = vmatprep.subr.bf16.mxu1 %v7010_v11  ;;  %2319 = vst.msk [vmem:[#allocation2 + $0x390] sm:$0xff] %vm313_vm0, %v6981_v60  ;;  %v3191_v13 = vld [vmem:[#allocation2 + $0xa0] sm:$0xff]  ;;  %v2691_v16 = vrot.slane %v2689_v1, 4  ;;  %v2697_v17 = vrot.slane %v2695_v2, 5  ;;  %v1007_v18 = vrot.slane %v891_v3, 5  ;;  %v2682_v20 = vor.u32 %v2681_v6, %v2678_v0  ;;  %2846 = vst.msk [vmem:[#allocation2 + $0x350] sm:$0xff] %vm313_vm0, %v6031_v15 }
 0x126   : > { %1172 = vst.msk [vmem:[#allocation2 + $0xe8] sm:$0xff] %vm330_vm1, %v7133_v10  ;;  %2335 = vst.msk [vmem:[#allocation2 + $0x390] sm:$0xff] %vm330_vm1, %v7133_v10  ;;  %v3268_v19 = vld [vmem:[#allocation2 + $0x308] sm:$0xff]  ;;  %4437 = vmatmul.mubr.bf16.gmra.mrb[8].mxu1 %v3191_v13  ;;  %v1010_v21 = vrot.slane %v892_v8, 5  ;;  %v6985_v27 = vld [vmem:[%s7245_s26 + $0x48] sm:$0xff]  }
 0x127   : > { %4902 = vmatprep.mubr.bf16.mxu0 %v3268_v19  ;;  %4446 = vmatprep.mubr.bf16.mxu1 %v3201_v61  ;;  %v2692_v22 = vor.u32 %v2691_v16, %v2687_v7  ;;  %v1008_v23 = vsel %vm7256_vm6, %v5704_v9, %v1007_v18  ;;  %v1009_v24 = vrot.slane %v1007_v18, 4  ;;  %v6982_v25 = vld [vmem:[#allocation3 + $0x460] ss:$8 sps:$4 sm:$0xff]   ;;  %v6984_v26 = vld [vmem:[#allocation3 + $0x464] ss:$8 sps:$4 sm:$0xff]   ;;  %2862 = vst.msk [vmem:[#allocation2 + $0x350] sm:$0xff] %vm330_vm1, %v7133_v10 }
 0x128   : > { %v2683_v28 = vrot.slane %v2682_v20, 4  ;;  %v7011_v29 = vld [vmem:[#allocation3 + $0x240] ss:$8 sps:$4 sm:$0xff]   ;;  %4975 = vmatprep.subr.bf16.mxu0 %v6984_v26  ;;  %1319 = vst.msk [vmem:[#allocation2 + $0x180] sm:$0xff] %vm313_vm0, %v6985_v27  ;;  %v6011_v33 = vld [vmem:[%s7245_s26 + $0xb4] sm:$0xf] }
 0x129   : > { %6350 = vmatpush1.bf16.msra.mxu1 %v7011_v29  ;;  %v6986_v30 = vld [vmem:[%s7245_s26 + $0xb4] sm:$0xff]   ;;  %v2693_v31 = vrot.slane %v2692_v22, 4  ;;  %v1011_v32 = vsel %vm7256_vm6, %v1009_v24, %v1010_v21  ;;  %v7012_v35 = vld [vmem:[#allocation3 + $0x254] ss:$8 sps:$4 sm:$0xff]   ;;  %1335 = vst.msk [vmem:[#allocation2 + $0x180] sm:$0xff] %vm330_vm1, %v7133_v10  ;;  %v2700_v40 = vshrl.u32 %v6011_v33, 16  ;;  %4976 = vmatpush1.bf16.msra.mxu0 %v6982_v25 }
 0x12a   : > { %v6012_v34 = vld [vmem:[%s7245_s26 + $0xb8] sm:$0xf]  ;;  %6335 = vmatprep.subr.bf16.mxu1 %v7012_v35  ;;  %4903 = vmatmul.mubr.bf16.gmra.mrb[40].mxu0 %v3267_v14  ;;  %v2688_v37 = vsel %vm7265_vm7, %v2683_v28, %v2687_v7  ;;  %v5720_v38 = vcombine.low %v1008_v23, %v1011_v32  ;;  %v6013_v39 = vld [vmem:[%s7245_s26 + $0xbc] sm:$0x1]  ;;  %v2703_v41 = vshll.u32 %v6011_v33, 16  ;;  %2320 = vst.msk [vmem:[#allocation2 + $0x3d8] sm:$0xff] %vm313_vm0, %v6986_v30 }
 0x12b   : > { %v6987_v36 = vld [vmem:[%s7245_s26 + $0x54] sm:$0xff]   ;;  %v6988_v42 = vld [vmem:[%s7245_s26 + $0xc0] sm:$0xff]   ;;  %v2698_v43 = vsel %vm7265_vm7, %v2693_v31, %v2697_v17  ;;  %v2709_v44 = vshll.u32 %v6012_v34, 16  ;;  %v2713_v45 = vshrl.u32 %v6012_v34, 16  ;;  %v2719_v46 = vshll.u32 %v6013_v39, 16  ;;  %2336 = vst.msk [vmem:[#allocation2 + $0x3d8] sm:$0xff] %vm330_vm1, %v7133_v10 }
 0x12c   : > { %v893_v47 = vld [vmem:[%s7245_s26 + $0x3c] sm:$0xe]  ;;  %1320 = vst.msk [vmem:[#allocation2 + $0x1c8] sm:$0xff] %vm313_vm0, %v6987_v36  ;;  %v3210_v49 = vld [vmem:[#allocation2 + $0x138] sm:$0xff]  ;;  %v6032_v50 = vcombine.low %v2688_v37, %v2698_v43  ;;  %1157 = vst.msk [vmem:[#allocation2 + $0x130] sm:$0xff] %vm313_vm0, %v5720_v38  ;;  %v2702_v51 = vrot.slane %v2700_v40, 4 }
 0x12d   : > { %v3200_v48 = vld [vmem:[#allocation2 + $0xe8] sm:$0xff]  ;;  %v2705_v52 = vrot.slane %v2703_v41, 5  ;;  %v894_v53 = vld [vmem:[%s7245_s26 + $0x40] sm:$0xf]  ;;  %1336 = vst.msk [vmem:[#allocation2 + $0x1c8] sm:$0xff] %vm330_vm1, %v7133_v10  ;;  %1173 = vst.msk [vmem:[#allocation2 + $0x130] sm:$0xff] %vm330_vm1, %v7133_v10 }
 0x12e   : > { %v7013_v54 = vld [vmem:[#allocation3 + $0x250] ss:$8 sps:$4 sm:$0xff]   ;;  %2321 = vst.msk [vmem:[#allocation2 + $0x420] sm:$0xff] %vm313_vm0, %v6988_v42  ;;  %v3276_v55 = vld [vmem:[#allocation2 + $0x348] sm:$0xff]  ;;  %v2711_v56 = vrot.slane %v2709_v44, 5  ;;  %v2715_v57 = vrot.slane %v2713_v45, 4  ;;  %4447 = vmatmul.mubr.bf16.gmra.mrb[12].mxu1 %v3200_v48 }
 0x12f   : > { %6351 = vmatpush1.bf16.msra.mxu1 %v7013_v54  ;;  %v895_v58 = vld [vmem:[%s7245_s26 + $0x44] sm:$0x1]  ;;  %v5705_v59 = vrot.slane %v893_v47, 9  ;;  %v7014_v60 = vld [vmem:[#allocation3 + $0x264] ss:$8 sps:$4 sm:$0xff]   ;;  %2337 = vst.msk [vmem:[#allocation2 + $0x420] sm:$0xff] %vm330_vm1, %v7133_v10  ;;  %v2706_v61 = vor.u32 %v2705_v52, %v2702_v51  ;;  %4456 = vmatprep.mubr.bf16.mxu1 %v3210_v49 }
 0x130   : > { %6336 = vmatprep.subr.bf16.mxu1 %v7014_v60  ;;  %2847 = vst.msk [vmem:[#allocation2 + $0x398] sm:$0xff] %vm313_vm0, %v6032_v50  ;;  %v1014_v62 = vrot.slane %v894_v53, 5  ;;  %v1017_v63 = vrot.slane %v895_v58, 5  ;;  %v3277_v0 = vld [vmem:[#allocation2 + $0x350] sm:$0xff]  ;;  %v2716_v1 = vor.u32 %v2715_v57, %v2711_v56  ;;  %v2721_v2 = vrot.slane %v2719_v46, 5  ;;  %v3219_v22 = vld [vmem:[#allocation2 + $0x180] sm:$0xff] }
 0x131   : > { %2863 = vst.msk [vmem:[#allocation2 + $0x398] sm:$0xff] %vm330_vm1, %v7133_v10  ;;  %4912 = vmatprep.mubr.bf16.mxu0 %v3277_v0  ;;  %v2707_v3 = vrot.slane %v2706_v61, 4  ;;  %v6014_v7 = vld [vmem:[%s7245_s26 + $0xc0] sm:$0xf]  ;;  %v6015_v8 = vld [vmem:[%s7245_s26 + $0xc4] sm:$0xf] }
 0x132   : > { %v1015_v5 = vsel %vm7256_vm6, %v5705_v59, %v1014_v62  ;;  %v1016_v6 = vrot.slane %v1014_v62, 4  ;;  %v7015_v9 = vld [vmem:[#allocation3 + $0x260] ss:$8 sps:$4 sm:$0xff]   ;;  %v2717_v11 = vrot.slane %v2716_v1, 4  ;;  %v6016_v13 = vld [vmem:[%s7245_s26 + $0xc8] sm:$0x1]  ;;  %4913 = vmatmul.mubr.bf16.gmra.mrb[44].mxu0 %v3276_v55 }
 0x133   : > { %6352 = vmatpush1.bf16.msra.mxu1 %v7015_v9  ;;  %v2724_v14 = vshrl.u32 %v6014_v7, 16  ;;  %v2727_v15 = vshll.u32 %v6014_v7, 16  ;;  %v7016_v16 = vld [vmem:[#allocation3 + $0x274] ss:$8 sps:$4 sm:$0xff]   ;;  %v2712_v17 = vsel %vm7265_vm7, %v2707_v3, %v2711_v56  ;;  %v2733_v19 = vshll.u32 %v6015_v8, 16 }
 0x134   : > { %6337 = vmatprep.subr.bf16.mxu1 %v7016_v16  ;;  %v1018_v18 = vsel %vm7256_vm6, %v1016_v6, %v1017_v63  ;;  %v2737_v20 = vshrl.u32 %v6015_v8, 16  ;;  %v896_v21 = vld [vmem:[%s7245_s26 + $0x48] sm:$0xe]  ;;  %v2722_v23 = vsel %vm7265_vm7, %v2717_v11, %v2721_v2  ;;  %v897_v27 = vld [vmem:[%s7245_s26 + $0x4c] sm:$0xf]  ;;  %v6992_v28 = vld [vmem:[%s7245_s26 + $0x60] sm:$0xff]  }
 0x135   : > { %v5721_v24 = vcombine.low %v1015_v5, %v1018_v18  ;;  %v2726_v25 = vrot.slane %v2724_v14, 4  ;;  %v2729_v26 = vrot.slane %v2727_v15, 5  ;;  %v3209_v29 = vld [vmem:[#allocation2 + $0x130] sm:$0xff]  ;;  %v6033_v30 = vcombine.low %v2712_v17, %v2722_v23  ;;  %v898_v34 = vld [vmem:[%s7245_s26 + $0x50] sm:$0x1]  ;;  %1321 = vst.msk [vmem:[#allocation2 + $0x210] sm:$0xff] %vm313_vm0, %v6992_v28 }
 0x136   : > { %v2735_v31 = vrot.slane %v2733_v19, 5  ;;  %v2739_v32 = vrot.slane %v2737_v20, 4  ;;  %v2743_v33 = vshll.u32 %v6016_v13, 16  ;;  %v7017_v35 = vld [vmem:[#allocation3 + $0x270] ss:$8 sps:$4 sm:$0xff]   ;;  %v5706_v38 = vrot.slane %v896_v21, 9  ;;  %4457 = vmatmul.mubr.bf16.gmra.mrb[16].mxu1 %v3209_v29 }
 0x137   : > { %6353 = vmatpush1.bf16.msra.mxu1 %v7017_v35  ;;  %v3285_v36 = vld [vmem:[#allocation2 + $0x390] sm:$0xff]  ;;  %1158 = vst.msk [vmem:[#allocation2 + $0x178] sm:$0xff] %vm313_vm0, %v5721_v24  ;;  %v2730_v37 = vor.u32 %v2729_v26, %v2726_v25  ;;  %v1021_v39 = vrot.slane %v897_v27, 5  ;;  %v1024_v40 = vrot.slane %v898_v34, 5  ;;  %v7018_v41 = vld [vmem:[#allocation3 + $0x284] ss:$8 sps:$4 sm:$0xff]   ;;  %4466 = vmatprep.mubr.bf16.mxu1 %v3219_v22 }
 0x138   : > { %6338 = vmatprep.subr.bf16.mxu1 %v7018_v41  ;;  %v3286_v42 = vld [vmem:[#allocation2 + $0x398] sm:$0xff]  ;;  %2848 = vst.msk [vmem:[#allocation2 + $0x3e0] sm:$0xff] %vm313_vm0, %v6033_v30  ;;  %v2740_v43 = vor.u32 %v2739_v32, %v2735_v31  ;;  %v2745_v44 = vrot.slane %v2743_v33, 5  ;;  %v7019_v53 = vld [vmem:[#allocation3 + $0x280] ss:$8 sps:$4 sm:$0xff]  }
 0x139   : > { %1174 = vst.msk [vmem:[#allocation2 + $0x178] sm:$0xff] %vm330_vm1, %v7133_v10  ;;  %v6989_v45 = vld [vmem:[#allocation3 + $0x470] ss:$8 sps:$4 sm:$0xff]   ;;  %1337 = vst.msk [vmem:[#allocation2 + $0x210] sm:$0xff] %vm330_vm1, %v7133_v10  ;;  %4922 = vmatprep.mubr.bf16.mxu0 %v3286_v42  ;;  %v2731_v46 = vrot.slane %v2730_v37, 4  ;;  %v1022_v47 = vsel %vm7256_vm6, %v5706_v38, %v1021_v39  ;;  %v1023_v48 = vrot.slane %v1021_v39, 4 }
 0x13a   : > { %2864 = vst.msk [vmem:[#allocation2 + $0x3e0] sm:$0xff] %vm330_vm1, %v7133_v10  ;;  %v6991_v49 = vld [vmem:[#allocation3 + $0x474] ss:$8 sps:$4 sm:$0xff]   ;;  %v2741_v50 = vrot.slane %v2740_v43, 4  ;;  %v6018_v56 = vld [vmem:[%s7245_s26 + $0xd0] sm:$0xf]  ;;  %4923 = vmatmul.mubr.bf16.gmra.mrb[48].mxu0 %v3285_v36 }
 0x13b   : > { %v6017_v51 = vld [vmem:[%s7245_s26 + $0xcc] sm:$0xf]  ;;  %6354 = vmatpush1.bf16.msra.mxu1 %v7019_v53  ;;  %v2736_v54 = vsel %vm7265_vm7, %v2731_v46, %v2735_v31  ;;  %v1025_v55 = vsel %vm7256_vm6, %v1023_v48, %v1024_v40  ;;  %4977 = vmatprep.subr.bf16.mxu0 %v6991_v49  ;;  %v6019_v57 = vld [vmem:[%s7245_s26 + $0xd4] sm:$0x1]  ;;  %v3228_v61 = vld [vmem:[#allocation2 + $0x1c8] sm:$0xff]  ;;  %v2757_v0 = vshll.u32 %v6018_v56, 16 }
 0x13c   : > { %v6993_v52 = vld [vmem:[%s7245_s26 + $0xcc] sm:$0xff]   ;;  %v2748_v58 = vshrl.u32 %v6017_v51, 16  ;;  %v2751_v59 = vshll.u32 %v6017_v51, 16  ;;  %v2746_v62 = vsel %vm7265_vm7, %v2741_v50, %v2745_v44  ;;  %v5722_v63 = vcombine.low %v1022_v47, %v1025_v55  ;;  %v899_v2 = vld [vmem:[%s7245_s26 + $0x54] sm:$0xe]  ;;  %4978 = vmatpush1.bf16.msra.mxu0 %v6989_v45  ;;  %v6995_v31 = vld [vmem:[%s7245_s26 + $0x78] sm:$0xff]  }
 0x13d   : > { %v7020_v60 = vld [vmem:[#allocation3 + $0x294] ss:$8 sps:$4 sm:$0xff]   ;;  %v2761_v1 = vshrl.u32 %v6018_v56, 16  ;;  %v900_v3 = vld [vmem:[%s7245_s26 + $0x58] sm:$0xf]  ;;  %2322 = vst.msk [vmem:[#allocation2 + $0x468] sm:$0xff] %vm313_vm0, %v6993_v52  ;;  %v6034_v5 = vcombine.low %v2736_v54, %v2746_v62 }
 0x13e   : > { %6339 = vmatprep.subr.bf16.mxu1 %v7020_v60  ;;  %v2750_v6 = vrot.slane %v2748_v58, 4  ;;  %v2753_v7 = vrot.slane %v2751_v59, 5  ;;  %v2767_v8 = vshll.u32 %v6019_v57, 16  ;;  %v901_v9 = vld [vmem:[%s7245_s26 + $0x5c] sm:$0x1]  ;;  %2338 = vst.msk [vmem:[#allocation2 + $0x468] sm:$0xff] %vm330_vm1, %v7133_v10 }
 0x13f   : > { %v6994_v11 = vld [vmem:[%s7245_s26 + $0x6c] sm:$0xff]   ;;  %1159 = vst.msk [vmem:[#allocation2 + $0x1c0] sm:$0xff] %vm313_vm0, %v5722_v63  ;;  %v2759_v13 = vrot.slane %v2757_v0, 5  ;;  %v2763_v14 = vrot.slane %v2761_v1, 4  ;;  %v5707_v15 = vrot.slane %v899_v2, 9  ;;  %v1028_v16 = vrot.slane %v900_v3, 5 }
 0x140   : > { %v7021_v17 = vld [vmem:[#allocation3 + $0x290] ss:$8 sps:$4 sm:$0xff]   ;;  %2849 = vst.msk [vmem:[#allocation2 + $0x428] sm:$0xff] %vm313_vm0, %v6034_v5  ;;  %v2754_v20 = vor.u32 %v2753_v7, %v2750_v6  ;;  %v2769_v21 = vrot.slane %v2767_v8, 5  ;;  %v1031_v22 = vrot.slane %v901_v9, 5  ;;  %1322 = vst.msk [vmem:[#allocation2 + $0x258] sm:$0xff] %vm313_vm0, %v6994_v11 }
 0x141   : > { %6355 = vmatpush1.bf16.msra.mxu1 %v7021_v17  ;;  %v3218_v18 = vld [vmem:[#allocation2 + $0x178] sm:$0xff]  ;;  %1175 = vst.msk [vmem:[#allocation2 + $0x1c0] sm:$0xff] %vm330_vm1, %v7133_v10  ;;  %v7022_v23 = vld [vmem:[#allocation3 + $0x2a4] ss:$8 sps:$4 sm:$0xff]   ;;  %2865 = vst.msk [vmem:[#allocation2 + $0x428] sm:$0xff] %vm330_vm1, %v7133_v10  ;;  %v2764_v25 = vor.u32 %v2763_v14, %v2759_v13  ;;  %v1029_v26 = vsel %vm7256_vm6, %v5707_v15, %v1028_v16  ;;  %v1030_v27 = vrot.slane %v1028_v16, 4 }
 0x142   : > { %v3294_v19 = vld [vmem:[#allocation2 + $0x3d8] sm:$0xff]  ;;  %6340 = vmatprep.subr.bf16.mxu1 %v7022_v23  ;;  %v3295_v24 = vld [vmem:[#allocation2 + $0x3e0] sm:$0xff]  ;;  %4467 = vmatmul.mubr.bf16.gmra.mrb[20].mxu1 %v3218_v18  ;;  %1338 = vst.msk [vmem:[#allocation2 + $0x258] sm:$0xff] %vm330_vm1, %v7133_v10  ;;  %v2755_v28 = vrot.slane %v2754_v20, 4  ;;  %v902_v29 = vld [vmem:[%s7245_s26 + $0x60] sm:$0xe] }
 0x143   : > { %4932 = vmatprep.mubr.bf16.mxu0 %v3295_v24  ;;  %4476 = vmatprep.mubr.bf16.mxu1 %v3228_v61  ;;  %v903_v30 = vld [vmem:[%s7245_s26 + $0x64] sm:$0xf]  ;;  %v2765_v32 = vrot.slane %v2764_v25, 4  ;;  %v1032_v33 = vsel %vm7256_vm6, %v1030_v27, %v1031_v22  ;;  %v904_v34 = vld [vmem:[%s7245_s26 + $0x68] sm:$0x1]  ;;  %v5708_v35 = vrot.slane %v902_v29, 9 }
 0x144   : > { %v1035_v36 = vrot.slane %v903_v30, 5  ;;  %v6996_v37 = vld [vmem:[%s7245_s26 + $0x84] sm:$0xff]   ;;  %v7023_v38 = vld [vmem:[#allocation3 + $0x2a0] ss:$8 sps:$4 sm:$0xff]   ;;  %v2760_v39 = vsel %vm7265_vm7, %v2755_v28, %v2759_v13  ;;  %v5723_v40 = vcombine.low %v1029_v26, %v1032_v33  ;;  %v1038_v41 = vrot.slane %v904_v34, 5  ;;  %1323 = vst.msk [vmem:[#allocation2 + $0x2a0] sm:$0xff] %vm313_vm0, %v6995_v31  ;;  %4933 = vmatmul.mubr.bf16.gmra.mrb[52].mxu0 %v3294_v19 }
 0x145   : > { %6356 = vmatpush1.bf16.msra.mxu1 %v7023_v38  ;;  %v6036_v42 = vld [vmem:[%s7245_s26 + $0x18] sm:$0xe]  ;;  %v6037_v43 = vld [vmem:[%s7245_s26 + $0x1c] sm:$0xf]  ;;  %v6997_v44 = vld [vmem:[%s7245_s26 + $0x90] sm:$0xff]   ;;  %v2770_v47 = vsel %vm7265_vm7, %v2765_v32, %v2769_v21  ;;  %1339 = vst.msk [vmem:[#allocation2 + $0x2a0] sm:$0xff] %vm330_vm1, %v7133_v10 }
 0x146   : > { %v7024_v45 = vld [vmem:[#allocation3 + $0x2b4] ss:$8 sps:$4 sm:$0xff]   ;;  %v1036_v48 = vsel %vm7256_vm6, %v5708_v35, %v1035_v36  ;;  %v1037_v49 = vrot.slane %v1035_v36, 4  ;;  %v6038_v50 = vld [vmem:[%s7245_s26 + $0x20] sm:$0x1]  ;;  %v6084_v51 = vrot.slane %v6036_v42, 9  ;;  %v6035_v53 = vcombine.low %v2760_v39, %v2770_v47 }
 0x147   : > { %6341 = vmatprep.subr.bf16.mxu1 %v7024_v45  ;;  %v3237_v46 = vld [vmem:[#allocation2 + $0x210] sm:$0xff]  ;;  %1324 = vst.msk [vmem:[#allocation2 + $0x2e8] sm:$0xff] %vm313_vm0, %v6996_v37  ;;  %1160 = vst.msk [vmem:[#allocation2 + $0x208] sm:$0xff] %vm313_vm0, %v5723_v40  ;;  %v2965_v54 = vrot.slane %v6037_v43, 5  ;;  %v2968_v55 = vrot.slane %v6038_v50, 5  ;;  %v3303_v62 = vld [vmem:[#allocation2 + $0x420] sm:$0xff] }
 0x148   : > { %v6998_v52 = vld [vmem:[%s7245_s26 + $0x9c] sm:$0xff]   ;;  %1340 = vst.msk [vmem:[#allocation2 + $0x2e8] sm:$0xff] %vm330_vm1, %v7133_v10  ;;  %v3227_v56 = vld [vmem:[#allocation2 + $0x1c0] sm:$0xff]  ;;  %1176 = vst.msk [vmem:[#allocation2 + $0x208] sm:$0xff] %vm330_vm1, %v7133_v10  ;;  %v1039_v57 = vsel %vm7256_vm6, %v1037_v49, %v1038_v41 }
 0x149   : > { %1325 = vst.msk [vmem:[#allocation2 + $0x330] sm:$0xff] %vm313_vm0, %v6997_v44  ;;  %v905_v58 = vld [vmem:[%s7245_s26 + $0x6c] sm:$0xe]  ;;  %v906_v59 = vld [vmem:[%s7245_s26 + $0x70] sm:$0xf]  ;;  %1326 = vst.msk [vmem:[#allocation2 + $0x378] sm:$0xff] %vm313_vm0, %v6998_v52  ;;  %v5724_v63 = vcombine.low %v1036_v48, %v1039_v57  ;;  %v2966_v0 = vsel %vm7256_vm6, %v6084_v51, %v2965_v54 }
 0x14a   : > { %1341 = vst.msk [vmem:[#allocation2 + $0x330] sm:$0xff] %vm330_vm1, %v7133_v10  ;;  %v7025_v60 = vld [vmem:[#allocation3 + $0x2b0] ss:$8 sps:$4 sm:$0xff]   ;;  %v3304_v61 = vld [vmem:[#allocation2 + $0x428] sm:$0xff]  ;;  %v2967_v1 = vrot.slane %v2965_v54, 4  ;;  %v5709_v3 = vrot.slane %v905_v58, 9  ;;  %4477 = vmatmul.mubr.bf16.gmra.mrb[24].mxu1 %v3227_v56 }
 0x14b   : > { %6357 = vmatpush1.bf16.msra.mxu1 %v7025_v60  ;;  %2850 = vst.msk [vmem:[#allocation2 + $0x470] sm:$0xff] %vm313_vm0, %v6035_v53  ;;  %v907_v2 = vld [vmem:[%s7245_s26 + $0x74] sm:$0x1]  ;;  %4942 = vmatprep.mubr.bf16.mxu0 %v3304_v61  ;;  %v1042_v6 = vrot.slane %v906_v59, 5  ;;  %v6039_v8 = vld [vmem:[%s7245_s26 + $0x24] sm:$0xe] }
 0x14c   : > { %1342 = vst.msk [vmem:[#allocation2 + $0x378] sm:$0xff] %vm330_vm1, %v7133_v10  ;;  %v7026_v5 = vld [vmem:[#allocation3 + $0x2c4] ss:$8 sps:$4 sm:$0xff]   ;;  %2866 = vst.msk [vmem:[#allocation2 + $0x470] sm:$0xff] %vm330_vm1, %v7133_v10  ;;  %v1045_v7 = vrot.slane %v907_v2, 5  ;;  %4486 = vmatprep.mubr.bf16.mxu1 %v3237_v46  ;;  %v2969_v11 = vsel %vm7256_vm6, %v2967_v1, %v2968_v55  ;;  %v6085_v14 = vrot.slane %v6039_v8, 9  ;;  %4943 = vmatmul.mubr.bf16.gmra.mrb[56].mxu0 %v3303_v62 }
 0x14d   : > { %6342 = vmatprep.subr.bf16.mxu1 %v7026_v5  ;;  %v6040_v9 = vld [vmem:[%s7245_s26 + $0x28] sm:$0xf]  ;;  %1161 = vst.msk [vmem:[#allocation2 + $0x250] sm:$0xff] %vm313_vm0, %v5724_v63  ;;  %v6041_v13 = vld [vmem:[%s7245_s26 + $0x2c] sm:$0x1]  ;;  %v6100_v16 = vcombine.low %v2966_v0, %v2969_v11  ;;  %v1043_v17 = vsel %vm7256_vm6, %v5709_v3, %v1042_v6  ;;  %v1044_v18 = vrot.slane %v1042_v6, 4 }
 0x14e   : > { %v2972_v15 = vrot.slane %v6040_v9, 5  ;;  %1177 = vst.msk [vmem:[#allocation2 + $0x250] sm:$0xff] %vm330_vm1, %v7133_v10  ;;  %v2975_v19 = vrot.slane %v6041_v13, 5  ;;  %v908_v20 = vld [vmem:[%s7245_s26 + $0x78] sm:$0xe]  ;;  %v3246_v27 = vld [vmem:[#allocation2 + $0x258] sm:$0xff] }
 0x14f   : > { %v7027_v21 = vld [vmem:[#allocation3 + $0x2c0] ss:$8 sps:$4 sm:$0xff]   ;;  %v909_v24 = vld [vmem:[%s7245_s26 + $0x7c] sm:$0xf]  ;;  %v910_v25 = vld [vmem:[%s7245_s26 + $0x80] sm:$0x1]  ;;  %v1046_v28 = vsel %vm7256_vm6, %v1044_v18, %v1045_v7 }
 0x150   : > { %6358 = vmatpush1.bf16.msra.mxu1 %v7027_v21  ;;  %v2973_v22 = vsel %vm7256_vm6, %v6085_v14, %v2972_v15  ;;  %v2974_v23 = vrot.slane %v2972_v15, 4  ;;  %v7028_v26 = vld [vmem:[#allocation3 + $0x2d4] ss:$8 sps:$4 sm:$0xff]   ;;  %3139 = vst.msk [vmem:[#allocation2 + $0x40] sm:$0xff] %vm313_vm0, %v6100_v16  ;;  %v5710_v29 = vrot.slane %v908_v20, 9  ;;  %v1049_v30 = vrot.slane %v909_v24, 5 }
 0x151   : > { %6343 = vmatprep.subr.bf16.mxu1 %v7028_v26  ;;  %v1052_v31 = vrot.slane %v910_v25, 5  ;;  %v6042_v32 = vld [vmem:[%s7245_s26 + $0x30] sm:$0xe]  ;;  %v3236_v33 = vld [vmem:[#allocation2 + $0x208] sm:$0xff]  ;;  %3155 = vst.msk [vmem:[#allocation2 + $0x40] sm:$0xff] %vm330_vm1, %v7133_v10  ;;  %v5725_v34 = vcombine.low %v1043_v17, %v1046_v28  ;;  %v6999_v63 = vld [vmem:[%s7245_s26 + $0xa8] sm:$0xff]  }
 0x152   : > { %v2976_v35 = vsel %vm7256_vm6, %v2974_v23, %v2975_v19  ;;  %v6043_v36 = vld [vmem:[%s7245_s26 + $0x34] sm:$0xf]  ;;  %v6044_v37 = vld [vmem:[%s7245_s26 + $0x38] sm:$0x1]  ;;  %v6086_v38 = vrot.slane %v6042_v32, 9  ;;  %v1050_v40 = vsel %vm7256_vm6, %v5710_v29, %v1049_v30  ;;  %v1051_v41 = vrot.slane %v1049_v30, 4  ;;  %4487 = vmatmul.mubr.bf16.gmra.mrb[28].mxu1 %v3236_v33 }
 0x153   : > { %v6101_v39 = vcombine.low %v2973_v22, %v2976_v35  ;;  %v2979_v42 = vrot.slane %v6043_v36, 5  ;;  %v7029_v43 = vld [vmem:[#allocation3 + $0x2d0] ss:$8 sps:$4 sm:$0xff]   ;;  %1162 = vst.msk [vmem:[#allocation2 + $0x298] sm:$0xff] %vm313_vm0, %v5725_v34  ;;  %v2982_v45 = vrot.slane %v6044_v37, 5  ;;  %v3312_v54 = vld [vmem:[#allocation2 + $0x468] sm:$0xff]  ;;  %4496 = vmatprep.mubr.bf16.mxu1 %v3246_v27 }
 0x154   : > { %6359 = vmatpush1.bf16.msra.mxu1 %v7029_v43  ;;  %v3313_v44 = vld [vmem:[#allocation2 + $0x470] sm:$0xff]  ;;  %v7030_v47 = vld [vmem:[#allocation3 + $0x2e4] ss:$8 sps:$4 sm:$0xff]   ;;  %1178 = vst.msk [vmem:[#allocation2 + $0x298] sm:$0xff] %vm330_vm1, %v7133_v10  ;;  %v1053_v48 = vsel %vm7256_vm6, %v1051_v41, %v1052_v31  ;;  %v912_v51 = vld [vmem:[%s7245_s26 + $0x88] sm:$0xf] }
 0x155   : > { %v911_v46 = vld [vmem:[%s7245_s26 + $0x84] sm:$0xe]  ;;  %6344 = vmatprep.subr.bf16.mxu1 %v7030_v47  ;;  %4952 = vmatprep.mubr.bf16.mxu0 %v3313_v44  ;;  %3140 = vst.msk [vmem:[#allocation2 + $0x88] sm:$0xff] %vm313_vm0, %v6101_v39  ;;  %v2980_v49 = vsel %vm7256_vm6, %v6086_v38, %v2979_v42  ;;  %v2981_v50 = vrot.slane %v2979_v42, 4  ;;  %v913_v52 = vld [vmem:[%s7245_s26 + $0x8c] sm:$0x1]  ;;  %v5726_v55 = vcombine.low %v1050_v40, %v1053_v48 }
 0x156   : > { %v5711_v53 = vrot.slane %v911_v46, 9  ;;  %3156 = vst.msk [vmem:[#allocation2 + $0x88] sm:$0xff] %vm330_vm1, %v7133_v10  ;;  %v1056_v56 = vrot.slane %v912_v51, 5  ;;  %v1059_v57 = vrot.slane %v913_v52, 5  ;;  %v6045_v58 = vld [vmem:[%s7245_s26 + $0x3c] sm:$0xe]  ;;  %4953 = vmatmul.mubr.bf16.gmra.mrb[60].mxu0 %v3312_v54 }
 0x157   : > { %v2983_v59 = vsel %vm7256_vm6, %v2981_v50, %v2982_v45  ;;  %v6046_v60 = vld [vmem:[%s7245_s26 + $0x40] sm:$0xf]  ;;  %v6047_v61 = vld [vmem:[%s7245_s26 + $0x44] sm:$0x1]  ;;  %v6087_v62 = vrot.slane %v6045_v58, 9  ;;  %1163 = vst.msk [vmem:[#allocation2 + $0x2e0] sm:$0xff] %vm313_vm0, %v5726_v55  ;;  %4995 = vmatprep.mubr.bf16.mxu0 %v7133_v10 }
 0x158   : > { %v7031_v0 = vld [vmem:[#allocation3 + $0x2e0] ss:$8 sps:$4 sm:$0xff]   ;;  %v6102_v1 = vcombine.low %v2980_v49, %v2983_v59  ;;  %v1057_v2 = vsel %vm7256_vm6, %v5711_v53, %v1056_v56  ;;  %v1058_v3 = vrot.slane %v1056_v56, 4  ;;  %v2986_v5 = vrot.slane %v6046_v60, 5  ;;  %v7032_v6 = vld [vmem:[#allocation3 + $0x2f4] ss:$8 sps:$4 sm:$0xff]  }
 0x159   : > { %6360 = vmatpush1.bf16.msra.mxu1 %v7031_v0  ;;  %v3245_v7 = vld [vmem:[#allocation2 + $0x250] sm:$0xff]  ;;  %v3255_v8 = vld [vmem:[#allocation2 + $0x2a0] sm:$0xff]  ;;  %1179 = vst.msk [vmem:[#allocation2 + $0x2e0] sm:$0xff] %vm330_vm1, %v7133_v10  ;;  %v2989_v9 = vrot.slane %v6047_v61, 5  ;;  %v916_v17 = vld [vmem:[%s7245_s26 + $0x98] sm:$0x1] }
 0x15a   : > { %6345 = vmatprep.subr.bf16.mxu1 %v7032_v6  ;;  %v914_v11 = vld [vmem:[%s7245_s26 + $0x90] sm:$0xe]  ;;  %v915_v13 = vld [vmem:[%s7245_s26 + $0x94] sm:$0xf]  ;;  %1327 = vst.msk [vmem:[#allocation2 + $0x3c0] sm:$0xff] %vm313_vm0, %v6999_v63  ;;  %3141 = vst.msk [vmem:[#allocation2 + $0xd0] sm:$0xff] %vm313_vm0, %v6102_v1  ;;  %v1060_v14 = vsel %vm7256_vm6, %v1058_v3, %v1059_v57  ;;  %v2987_v15 = vsel %vm7256_vm6, %v6087_v62, %v2986_v5  ;;  %4497 = vmatmul.mubr.bf16.gmra.mrb[32].mxu1 %v3245_v7 }
 0x15b   : > { %v2988_v16 = vrot.slane %v2986_v5, 4  ;;  %v5712_v18 = vrot.slane %v914_v11, 9  ;;  %v6048_v19 = vld [vmem:[%s7245_s26 + $0x48] sm:$0xe]  ;;  %1343 = vst.msk [vmem:[#allocation2 + $0x3c0] sm:$0xff] %vm330_vm1, %v7133_v10  ;;  %3157 = vst.msk [vmem:[#allocation2 + $0xd0] sm:$0xff] %vm330_vm1, %v7133_v10  ;;  %v5727_v20 = vcombine.low %v1057_v2, %v1060_v14  ;;  %4506 = vmatprep.mubr.bf16.mxu1 %v3255_v8 }
 0x15c   : > { %v1063_v21 = vrot.slane %v915_v13, 5  ;;  %v1066_v22 = vrot.slane %v916_v17, 5  ;;  %v6049_v23 = vld [vmem:[%s7245_s26 + $0x4c] sm:$0xf]  ;;  %v6050_v24 = vld [vmem:[%s7245_s26 + $0x50] sm:$0x1] }
 0x15d   : > { %v7033_v25 = vld [vmem:[#allocation3 + $0x2f0] ss:$8 sps:$4 sm:$0xff]   ;;  %v2990_v26 = vsel %vm7256_vm6, %v2988_v16, %v2989_v9  ;;  %v6088_v27 = vrot.slane %v6048_v19, 9  ;;  %v2993_v28 = vrot.slane %v6049_v23, 5  ;;  %v2996_v29 = vrot.slane %v6050_v24, 5  ;;  %v3179_v30 = vld [vmem:[#allocation2 + $0x40] sm:$0xff] }
 0x15e   : > { %6361 = vmatpush1.bf16.msra.mxu1 %v7033_v25  ;;  %1164 = vst.msk [vmem:[#allocation2 + $0x328] sm:$0xff] %vm313_vm0, %v5727_v20  ;;  %v6103_v31 = vcombine.low %v2987_v15, %v2990_v26  ;;  %v1064_v32 = vsel %vm7256_vm6, %v5712_v18, %v1063_v21  ;;  %v1065_v33 = vrot.slane %v1063_v21, 4  ;;  %v917_v34 = vld [vmem:[%s7245_s26 + $0x9c] sm:$0xe]  ;;  %v918_v37 = vld [vmem:[%s7245_s26 + $0xa0] sm:$0xf]  ;;  %4996 = vmatmul.mubr.bf16.vlgmr.msra.gmra.mrb[0].mxu0 %v3179_v30 }
 0x15f   : > { %1180 = vst.msk [vmem:[#allocation2 + $0x328] sm:$0xff] %vm330_vm1, %v7133_v10  ;;  %v2994_v35 = vsel %vm7256_vm6, %v6088_v27, %v2993_v28  ;;  %v2995_v36 = vrot.slane %v2993_v28, 4  ;;  %v919_v38 = vld [vmem:[%s7245_s26 + $0xa4] sm:$0x1]  ;;  %v5713_v39 = vrot.slane %v917_v34, 9  ;;  %v1070_v41 = vrot.slane %v918_v37, 5  ;;  %5005 = vmatprep.mubr.bf16.mxu0 %v7133_v10 }
 0x160   : > { %3142 = vst.msk [vmem:[#allocation2 + $0x118] sm:$0xff] %vm313_vm0, %v6103_v31  ;;  %v1067_v40 = vsel %vm7256_vm6, %v1065_v33, %v1066_v22  ;;  %v1073_v42 = vrot.slane %v919_v38, 5  ;;  %v6051_v43 = vld [vmem:[%s7245_s26 + $0x54] sm:$0xe]  ;;  %v6052_v44 = vld [vmem:[%s7245_s26 + $0x58] sm:$0xf] }
 0x161   : > { %3158 = vst.msk [vmem:[#allocation2 + $0x118] sm:$0xff] %vm330_vm1, %v7133_v10  ;;  %v5728_v45 = vcombine.low %v1064_v32, %v1067_v40  ;;  %v2997_v46 = vsel %vm7256_vm6, %v2995_v36, %v2996_v29  ;;  %v6053_v47 = vld [vmem:[%s7245_s26 + $0x5c] sm:$0x1]  ;;  %v6089_v48 = vrot.slane %v6051_v43, 9  ;;  %v3000_v49 = vrot.slane %v6052_v44, 5  ;;  %v7000_v50 = vld [vmem:[%s7245_s26 + $0xb4] sm:$0xff]  }
 0x162   : > { %v6104_v51 = vcombine.low %v2994_v35, %v2997_v46  ;;  %v1071_v52 = vsel %vm7256_vm6, %v5713_v39, %v1070_v41  ;;  %v1072_v53 = vrot.slane %v1070_v41, 4  ;;  %v3003_v54 = vrot.slane %v6053_v47, 5  ;;  %v7001_v55 = vld [vmem:[%s7245_s26 + $0xc0] sm:$0xff]   ;;  %v3254_v56 = vld [vmem:[#allocation2 + $0x298] sm:$0xff]  ;;  %1328 = vst.msk [vmem:[#allocation2 + $0x408] sm:$0xff] %vm313_vm0, %v7000_v50  ;;  %v3264_v60 = vld [vmem:[#allocation2 + $0x2e8] sm:$0xff] }
 0x163   : > { %1165 = vst.msk [vmem:[#allocation2 + $0x370] sm:$0xff] %vm313_vm0, %v5728_v45  ;;  %v3001_v57 = vsel %vm7256_vm6, %v6089_v48, %v3000_v49  ;;  %v3002_v58 = vrot.slane %v3000_v49, 4  ;;  %v920_v59 = vld [vmem:[%s7245_s26 + $0xa8] sm:$0xe]  ;;  %v921_v62 = vld [vmem:[%s7245_s26 + $0xac] sm:$0xf]  ;;  %4507 = vmatmul.mubr.bf16.gmra.mrb[36].mxu1 %v3254_v56 }
 0x164   : > { %1181 = vst.msk [vmem:[#allocation2 + $0x370] sm:$0xff] %vm330_vm1, %v7133_v10  ;;  %v1074_v61 = vsel %vm7256_vm6, %v1072_v53, %v1073_v42  ;;  %1344 = vst.msk [vmem:[#allocation2 + $0x408] sm:$0xff] %vm330_vm1, %v7133_v10  ;;  %v922_v63 = vld [vmem:[%s7245_s26 + $0xb0] sm:$0x1]  ;;  %v5714_v0 = vrot.slane %v920_v59, 9  ;;  %v1077_v3 = vrot.slane %v921_v62, 5  ;;  %4516 = vmatprep.mubr.bf16.mxu1 %v3264_v60 }
 0x165   : > { %3143 = vst.msk [vmem:[#allocation2 + $0x160] sm:$0xff] %vm313_vm0, %v6104_v51  ;;  %1329 = vst.msk [vmem:[#allocation2 + $0x450] sm:$0xff] %vm313_vm0, %v7001_v55  ;;  %v5729_v1 = vcombine.low %v1071_v52, %v1074_v61  ;;  %v3004_v2 = vsel %vm7256_vm6, %v3002_v58, %v3003_v54  ;;  %v1080_v5 = vrot.slane %v922_v63, 5  ;;  %v6054_v6 = vld [vmem:[%s7245_s26 + $0x60] sm:$0xe]  ;;  %v3188_v8 = vld [vmem:[#allocation2 + $0x88] sm:$0xff] }
 0x166   : > { %3159 = vst.msk [vmem:[#allocation2 + $0x160] sm:$0xff] %vm330_vm1, %v7133_v10  ;;  %v6055_v7 = vld [vmem:[%s7245_s26 + $0x64] sm:$0xf]  ;;  %1345 = vst.msk [vmem:[#allocation2 + $0x450] sm:$0xff] %vm330_vm1, %v7133_v10  ;;  %v6105_v9 = vcombine.low %v3001_v57, %v3004_v2  ;;  %v6056_v11 = vld [vmem:[%s7245_s26 + $0x68] sm:$0x1]  ;;  %v1078_v15 = vsel %vm7256_vm6, %v5714_v0, %v1077_v3  ;;  %5006 = vmatmul.mubr.bf16.gmra.mrb[4].mxu0 %v3188_v8 }
 0x167   : > { %v6090_v13 = vrot.slane %v6054_v6, 9  ;;  %v3007_v14 = vrot.slane %v6055_v7, 5  ;;  %1166 = vst.msk [vmem:[#allocation2 + $0x3b8] sm:$0xff] %vm313_vm0, %v5729_v1  ;;  %v1079_v16 = vrot.slane %v1077_v3, 4  ;;  %v3010_v17 = vrot.slane %v6056_v11, 5  ;;  %5015 = vmatprep.mubr.bf16.mxu0 %v7133_v10  ;;  %v3263_v33 = vld [vmem:[#allocation2 + $0x2e0] sm:$0xff] }
 0x168   : > { %1182 = vst.msk [vmem:[#allocation2 + $0x3b8] sm:$0xff] %vm330_vm1, %v7133_v10  ;;  %v923_v20 = vld [vmem:[%s7245_s26 + $0xb4] sm:$0xe]  ;;  %v924_v21 = vld [vmem:[%s7245_s26 + $0xb8] sm:$0xf]  ;;  %v3273_v39 = vld [vmem:[#allocation2 + $0x330] sm:$0xff] }
 0x169   : > { %3144 = vst.msk [vmem:[#allocation2 + $0x1a8] sm:$0xff] %vm313_vm0, %v6105_v9  ;;  %v3008_v18 = vsel %vm7256_vm6, %v6090_v13, %v3007_v14  ;;  %v3009_v19 = vrot.slane %v3007_v14, 4  ;;  %v1081_v22 = vsel %vm7256_vm6, %v1079_v16, %v1080_v5  ;;  %v925_v23 = vld [vmem:[%s7245_s26 + $0xbc] sm:$0x1]  ;;  %v5715_v24 = vrot.slane %v923_v20, 9  ;;  %v3197_v54 = vld [vmem:[#allocation2 + $0xd0] sm:$0xff] }
 0x16a   : > { %3160 = vst.msk [vmem:[#allocation2 + $0x1a8] sm:$0xff] %vm330_vm1, %v7133_v10  ;;  %v1084_v25 = vrot.slane %v924_v21, 5  ;;  %v6057_v26 = vld [vmem:[%s7245_s26 + $0x6c] sm:$0xe]  ;;  %v5730_v27 = vcombine.low %v1078_v15, %v1081_v22  ;;  %v1087_v29 = vrot.slane %v925_v23, 5  ;;  %v3272_v7 = vld [vmem:[#allocation2 + $0x328] sm:$0xff] }
 0x16b   : > { %v3011_v28 = vsel %vm7256_vm6, %v3009_v19, %v3010_v17  ;;  %v6058_v30 = vld [vmem:[%s7245_s26 + $0x70] sm:$0xf]  ;;  %v6059_v31 = vld [vmem:[%s7245_s26 + $0x74] sm:$0x1]  ;;  %v6091_v32 = vrot.slane %v6057_v26, 9  ;;  %4517 = vmatmul.mubr.bf16.gmra.mrb[40].mxu1 %v3263_v33  ;;  %v3282_v20 = vld [vmem:[#allocation2 + $0x378] sm:$0xff] }
 0x16c   : > { %v6106_v34 = vcombine.low %v3008_v18, %v3011_v28  ;;  %v1085_v35 = vsel %vm7256_vm6, %v5715_v24, %v1084_v25  ;;  %v1086_v36 = vrot.slane %v1084_v25, 4  ;;  %v3014_v37 = vrot.slane %v6058_v30, 5  ;;  %v5868_v38 = vld [vmem:[%s7245_s26 + $0x6c] sm:$0xe]  ;;  %1167 = vst.msk [vmem:[#allocation2 + $0x400] sm:$0xff] %vm313_vm0, %v5730_v27  ;;  %4526 = vmatprep.mubr.bf16.mxu1 %v3273_v39 }
 0x16d   : > { %v3017_v40 = vrot.slane %v6059_v31, 5  ;;  %v5869_v41 = vld [vmem:[%s7245_s26 + $0x70] sm:$0xf]  ;;  %v5900_v42 = vrot.slane %v5868_v38, 9  ;;  %1183 = vst.msk [vmem:[#allocation2 + $0x400] sm:$0xff] %vm330_vm1, %v7133_v10 }
 0x16e   : > { %3145 = vst.msk [vmem:[#allocation2 + $0x1f0] sm:$0xff] %vm313_vm0, %v6106_v34  ;;  %v1088_v43 = vsel %vm7256_vm6, %v1086_v36, %v1087_v29  ;;  %v3015_v44 = vsel %vm7256_vm6, %v6091_v32, %v3014_v37  ;;  %v3016_v45 = vrot.slane %v3014_v37, 4  ;;  %v5870_v46 = vld [vmem:[%s7245_s26 + $0x74] sm:$0x1]  ;;  %v2028_v47 = vrot.slane %v5869_v41, 5  ;;  %5016 = vmatmul.mubr.bf16.gmra.mrb[8].mxu0 %v3197_v54 }
 0x16f   : > { %v5804_v48 = vld [vmem:[%s7245_s26 + $0x6c] sm:$0xf]  ;;  %3161 = vst.msk [vmem:[#allocation2 + $0x1f0] sm:$0xff] %vm330_vm1, %v7133_v10  ;;  %v5731_v49 = vcombine.low %v1085_v35, %v1088_v43  ;;  %v2031_v50 = vrot.slane %v5870_v46, 5  ;;  %v5805_v51 = vld [vmem:[%s7245_s26 + $0x70] sm:$0xf]  ;;  %5025 = vmatprep.mubr.bf16.mxu0 %v7133_v10 }
 0x170   : > { %v5806_v52 = vld [vmem:[%s7245_s26 + $0x74] sm:$0x1]  ;;  %v1587_v53 = vshrl.u32 %v5804_v48, 16  ;;  %v3018_v55 = vsel %vm7256_vm6, %v3016_v45, %v3017_v40  ;;  %v2029_v56 = vsel %vm7256_vm6, %v5900_v42, %v2028_v47  ;;  %v2030_v57 = vrot.slane %v2028_v47, 4  ;;  %v6060_v59 = vld [vmem:[%s7245_s26 + $0x78] sm:$0xe] }
 0x171   : > { %v1590_v58 = vshll.u32 %v5804_v48, 16  ;;  %1168 = vst.msk [vmem:[#allocation2 + $0x448] sm:$0xff] %vm313_vm0, %v5731_v49  ;;  %v6107_v60 = vcombine.low %v3015_v44, %v3018_v55  ;;  %v1596_v62 = vshll.u32 %v5805_v51, 16  ;;  %v1600_v63 = vshrl.u32 %v5805_v51, 16  ;;  %v6061_v0 = vld [vmem:[%s7245_s26 + $0x7c] sm:$0xf] }
 0x172   : > { %v1589_v61 = vrot.slane %v1587_v53, 4  ;;  %1184 = vst.msk [vmem:[#allocation2 + $0x448] sm:$0xff] %vm330_vm1, %v7133_v10  ;;  %v2032_v1 = vsel %vm7256_vm6, %v2030_v57, %v2031_v50  ;;  %v1606_v3 = vshll.u32 %v5806_v52, 16  ;;  %v6062_v5 = vld [vmem:[%s7245_s26 + $0x80] sm:$0x1]  ;;  %v6092_v6 = vrot.slane %v6060_v59, 9 }
 0x173   : > { %v1592_v2 = vrot.slane %v1590_v58, 5  ;;  %3146 = vst.msk [vmem:[#allocation2 + $0x238] sm:$0xff] %vm313_vm0, %v6107_v60  ;;  %v5916_v8 = vcombine.low %v2029_v56, %v2032_v1  ;;  %v1598_v9 = vrot.slane %v1596_v62, 5  ;;  %v1602_v11 = vrot.slane %v1600_v63, 4  ;;  %v5871_v14 = vld [vmem:[%s7245_s26 + $0x78] sm:$0xe]  ;;  %4527 = vmatmul.mubr.bf16.gmra.mrb[44].mxu1 %v3272_v7 }
 0x174   : > { %v3021_v13 = vrot.slane %v6061_v0, 5  ;;  %3162 = vst.msk [vmem:[#allocation2 + $0x238] sm:$0xff] %vm330_vm1, %v7133_v10  ;;  %v1608_v16 = vrot.slane %v1606_v3, 5  ;;  %v3024_v17 = vrot.slane %v6062_v5, 5  ;;  %v5872_v18 = vld [vmem:[%s7245_s26 + $0x7c] sm:$0xf]  ;;  %4536 = vmatprep.mubr.bf16.mxu1 %v3282_v20 }
 0x175   : > { %v1593_v15 = vor.u32 %v1592_v2, %v1589_v61  ;;  %v5873_v19 = vld [vmem:[%s7245_s26 + $0x80] sm:$0x1]  ;;  %2154 = vst.msk [vmem:[#allocation2 + $0x268] sm:$0xff] %vm313_vm0, %v5916_v8  ;;  %v1603_v21 = vor.u32 %v1602_v11, %v1598_v9  ;;  %v5901_v24 = vrot.slane %v5871_v14, 9  ;;  %v5807_v25 = vld [vmem:[%s7245_s26 + $0x78] sm:$0xf] }
 0x176   : > { %v3022_v22 = vsel %vm7256_vm6, %v6092_v6, %v3021_v13  ;;  %v3023_v23 = vrot.slane %v3021_v13, 4  ;;  %2170 = vst.msk [vmem:[#allocation2 + $0x268] sm:$0xff] %vm330_vm1, %v7133_v10  ;;  %v2035_v27 = vrot.slane %v5872_v18, 5  ;;  %v2038_v28 = vrot.slane %v5873_v19, 5  ;;  %v5808_v29 = vld [vmem:[%s7245_s26 + $0x7c] sm:$0xf] }
 0x177   : > { %v1594_v26 = vrot.slane %v1593_v15, 4  ;;  %v1604_v30 = vrot.slane %v1603_v21, 4  ;;  %v5809_v32 = vld [vmem:[%s7245_s26 + $0x80] sm:$0x1]  ;;  %v1611_v33 = vshrl.u32 %v5807_v25, 16  ;;  %v1614_v34 = vshll.u32 %v5807_v25, 16 }
 0x178   : > { %v3025_v31 = vsel %vm7256_vm6, %v3023_v23, %v3024_v17  ;;  %v3206_v35 = vld [vmem:[#allocation2 + $0x118] sm:$0xff]  ;;  %v2036_v38 = vsel %vm7256_vm6, %v5901_v24, %v2035_v27  ;;  %v2037_v39 = vrot.slane %v2035_v27, 4  ;;  %v6063_v40 = vld [vmem:[%s7245_s26 + $0x84] sm:$0xe]  ;;  %v1620_v45 = vshll.u32 %v5808_v29, 16  ;;  %v3291_v0 = vld [vmem:[#allocation2 + $0x3c0] sm:$0xff] }
 0x179   : > { %v1599_v36 = vsel %vm7265_vm7, %v1594_v26, %v1598_v9  ;;  %v6108_v37 = vcombine.low %v3022_v22, %v3025_v31  ;;  %v6064_v41 = vld [vmem:[%s7245_s26 + $0x88] sm:$0xf]  ;;  %v1609_v42 = vsel %vm7265_vm7, %v1604_v30, %v1608_v16  ;;  %v1613_v43 = vrot.slane %v1611_v33, 4  ;;  %v6065_v46 = vld [vmem:[%s7245_s26 + $0x8c] sm:$0x1]  ;;  %5026 = vmatmul.mubr.bf16.gmra.mrb[12].mxu0 %v3206_v35  ;;  %v3281_v53 = vld [vmem:[#allocation2 + $0x370] sm:$0xff] }
 0x17a   : > { %v1616_v44 = vrot.slane %v1614_v34, 5  ;;  %v5836_v47 = vcombine.low %v1599_v36, %v1609_v42  ;;  %v2039_v48 = vsel %vm7256_vm6, %v2037_v39, %v2038_v28  ;;  %v1624_v49 = vshrl.u32 %v5808_v29, 16  ;;  %v5874_v51 = vld [vmem:[%s7245_s26 + $0x84] sm:$0xe]  ;;  %v5875_v52 = vld [vmem:[%s7245_s26 + $0x88] sm:$0xf]  ;;  %5035 = vmatprep.mubr.bf16.mxu0 %v7133_v10 }
 0x17b   : > { %3147 = vst.msk [vmem:[#allocation2 + $0x280] sm:$0xff] %vm313_vm0, %v6108_v37  ;;  %v1630_v50 = vshll.u32 %v5809_v32, 16  ;;  %v5917_v54 = vcombine.low %v2036_v38, %v2039_v48  ;;  %v1622_v56 = vrot.slane %v1620_v45, 5  ;;  %v6093_v57 = vrot.slane %v6063_v40, 9  ;;  %v5876_v58 = vld [vmem:[%s7245_s26 + $0x8c] sm:$0x1]  ;;  %4537 = vmatmul.mubr.bf16.gmra.mrb[48].mxu1 %v3281_v53 }
 0x17c   : > { %3163 = vst.msk [vmem:[#allocation2 + $0x280] sm:$0xff] %vm330_vm1, %v7133_v10  ;;  %v1617_v55 = vor.u32 %v1616_v44, %v1613_v43  ;;  %v1626_v59 = vrot.slane %v1624_v49, 4  ;;  %v3028_v61 = vrot.slane %v6064_v41, 5  ;;  %v3031_v62 = vrot.slane %v6065_v46, 5  ;;  %v5810_v63 = vld [vmem:[%s7245_s26 + $0x84] sm:$0xf]  ;;  %4546 = vmatprep.mubr.bf16.mxu1 %v3291_v0 }
 0x17d   : > { %1850 = vst.msk [vmem:[#allocation2 + $0x260] sm:$0xff] %vm313_vm0, %v5836_v47  ;;  %v1632_v60 = vrot.slane %v1630_v50, 5  ;;  %2155 = vst.msk [vmem:[#allocation2 + $0x2b0] sm:$0xff] %vm313_vm0, %v5917_v54  ;;  %v5902_v2 = vrot.slane %v5874_v51, 9  ;;  %v2042_v3 = vrot.slane %v5875_v52, 5  ;;  %v2045_v5 = vrot.slane %v5876_v58, 5 }
 0x17e   : > { %1866 = vst.msk [vmem:[#allocation2 + $0x260] sm:$0xff] %vm330_vm1, %v7133_v10  ;;  %v1618_v1 = vrot.slane %v1617_v55, 4  ;;  %2171 = vst.msk [vmem:[#allocation2 + $0x2b0] sm:$0xff] %vm330_vm1, %v7133_v10  ;;  %v1627_v6 = vor.u32 %v1626_v59, %v1622_v56  ;;  %v3029_v7 = vsel %vm7256_vm6, %v6093_v57, %v3028_v61  ;;  %v3030_v8 = vrot.slane %v3028_v61, 4  ;;  %v5811_v9 = vld [vmem:[%s7245_s26 + $0x88] sm:$0xf] }
 0x17f   : > { %v1635_v11 = vshrl.u32 %v5810_v63, 16  ;;  %v2043_v14 = vsel %vm7256_vm6, %v5902_v2, %v2042_v3  ;;  %v2044_v15 = vrot.slane %v2042_v3, 4  ;;  %v5812_v16 = vld [vmem:[%s7245_s26 + $0x8c] sm:$0x1]  ;;  %v1638_v17 = vshll.u32 %v5810_v63, 16  ;;  %v3215_v19 = vld [vmem:[#allocation2 + $0x160] sm:$0xff] }
 0x180   : > { %v1623_v13 = vsel %vm7265_vm7, %v1618_v1, %v1622_v56  ;;  %v6066_v18 = vld [vmem:[%s7245_s26 + $0x90] sm:$0xe]  ;;  %v1628_v20 = vrot.slane %v1627_v6, 4  ;;  %v3032_v21 = vsel %vm7256_vm6, %v3030_v8, %v3031_v62  ;;  %v1644_v23 = vshll.u32 %v5811_v9, 16  ;;  %v6067_v24 = vld [vmem:[%s7245_s26 + $0x94] sm:$0xf] }
 0x181   : > { %v1637_v22 = vrot.slane %v1635_v11, 4  ;;  %v6109_v25 = vcombine.low %v3029_v7, %v3032_v21  ;;  %v2046_v26 = vsel %vm7256_vm6, %v2044_v15, %v2045_v5  ;;  %v1640_v27 = vrot.slane %v1638_v17, 5  ;;  %v6068_v29 = vld [vmem:[%s7245_s26 + $0x98] sm:$0x1]  ;;  %v5877_v30 = vld [vmem:[%s7245_s26 + $0x90] sm:$0xe]  ;;  %5036 = vmatmul.mubr.bf16.gmra.mrb[16].mxu0 %v3215_v19 }
 0x182   : > { %v1648_v28 = vshrl.u32 %v5811_v9, 16  ;;  %v1633_v31 = vsel %vm7265_vm7, %v1628_v20, %v1632_v60  ;;  %v5918_v32 = vcombine.low %v2043_v14, %v2046_v26  ;;  %v1646_v33 = vrot.slane %v1644_v23, 5  ;;  %v5878_v35 = vld [vmem:[%s7245_s26 + $0x94] sm:$0xf]  ;;  %v5879_v36 = vld [vmem:[%s7245_s26 + $0x98] sm:$0x1]  ;;  %5045 = vmatprep.mubr.bf16.mxu0 %v7133_v10 }
 0x183   : > { %v1654_v34 = vshll.u32 %v5812_v16, 16  ;;  %v5837_v37 = vcombine.low %v1623_v13, %v1633_v31  ;;  %3148 = vst.msk [vmem:[#allocation2 + $0x2c8] sm:$0xff] %vm313_vm0, %v6109_v25  ;;  %v1641_v38 = vor.u32 %v1640_v27, %v1637_v22  ;;  %v6094_v40 = vrot.slane %v6066_v18, 9  ;;  %v5813_v41 = vld [vmem:[%s7245_s26 + $0x90] sm:$0xf]  ;;  %v3290_v42 = vld [vmem:[#allocation2 + $0x3b8] sm:$0xff] }
 0x184   : > { %v1650_v39 = vrot.slane %v1648_v28, 4  ;;  %3164 = vst.msk [vmem:[#allocation2 + $0x2c8] sm:$0xff] %vm330_vm1, %v7133_v10  ;;  %v3035_v44 = vrot.slane %v6067_v24, 5  ;;  %v3038_v45 = vrot.slane %v6068_v29, 5  ;;  %v5903_v46 = vrot.slane %v5877_v30, 9  ;;  %v3300_v47 = vld [vmem:[#allocation2 + $0x408] sm:$0xff]  ;;  %4547 = vmatmul.mubr.bf16.gmra.mrb[52].mxu1 %v3290_v42 }
 0x185   : > { %2156 = vst.msk [vmem:[#allocation2 + $0x2f8] sm:$0xff] %vm313_vm0, %v5918_v32  ;;  %v1656_v43 = vrot.slane %v1654_v34, 5  ;;  %1851 = vst.msk [vmem:[#allocation2 + $0x2a8] sm:$0xff] %vm313_vm0, %v5837_v37  ;;  %v1642_v48 = vrot.slane %v1641_v38, 4  ;;  %v2049_v50 = vrot.slane %v5878_v35, 5  ;;  %v2052_v51 = vrot.slane %v5879_v36, 5  ;;  %4556 = vmatprep.mubr.bf16.mxu1 %v3300_v47 }
 0x186   : > { %2172 = vst.msk [vmem:[#allocation2 + $0x2f8] sm:$0xff] %vm330_vm1, %v7133_v10  ;;  %v1651_v49 = vor.u32 %v1650_v39, %v1646_v33  ;;  %v5814_v52 = vld [vmem:[%s7245_s26 + $0x94] sm:$0xf]  ;;  %1867 = vst.msk [vmem:[#allocation2 + $0x2a8] sm:$0xff] %vm330_vm1, %v7133_v10  ;;  %v3036_v53 = vsel %vm7256_vm6, %v6094_v40, %v3035_v44  ;;  %v3037_v54 = vrot.slane %v3035_v44, 4  ;;  %v1659_v56 = vshrl.u32 %v5813_v41, 16 }
 0x187   : > { %v5815_v55 = vld [vmem:[%s7245_s26 + $0x98] sm:$0x1]  ;;  %v1662_v57 = vshll.u32 %v5813_v41, 16  ;;  %v1647_v58 = vsel %vm7265_vm7, %v1642_v48, %v1646_v33  ;;  %v2050_v60 = vsel %vm7256_vm6, %v5903_v46, %v2049_v50  ;;  %v2051_v61 = vrot.slane %v2049_v50, 4  ;;  %v6069_v62 = vld [vmem:[%s7245_s26 + $0x9c] sm:$0xe] }
 0x188   : > { %v1652_v59 = vrot.slane %v1651_v49, 4  ;;  %v6070_v63 = vld [vmem:[%s7245_s26 + $0xa0] sm:$0xf]  ;;  %v3224_v0 = vld [vmem:[#allocation2 + $0x1a8] sm:$0xff]  ;;  %v3039_v1 = vsel %vm7256_vm6, %v3037_v54, %v3038_v45  ;;  %v1661_v2 = vrot.slane %v1659_v56, 4  ;;  %v1668_v5 = vshll.u32 %v5814_v52, 16 }
 0x189   : > { %v1664_v3 = vrot.slane %v1662_v57, 5  ;;  %v6071_v6 = vld [vmem:[%s7245_s26 + $0xa4] sm:$0x1]  ;;  %v6110_v8 = vcombine.low %v3036_v53, %v3039_v1  ;;  %v2053_v9 = vsel %vm7256_vm6, %v2051_v61, %v2052_v51  ;;  %v1672_v11 = vshrl.u32 %v5814_v52, 16  ;;  %v5880_v13 = vld [vmem:[%s7245_s26 + $0x9c] sm:$0xe]  ;;  %5046 = vmatmul.mubr.bf16.gmra.mrb[20].mxu0 %v3224_v0 }
 0x18a   : > { %v1657_v7 = vsel %vm7265_vm7, %v1652_v59, %v1656_v43  ;;  %v5881_v14 = vld [vmem:[%s7245_s26 + $0xa0] sm:$0xf]  ;;  %v3299_v15 = vld [vmem:[#allocation2 + $0x400] sm:$0xff]  ;;  %v5919_v17 = vcombine.low %v2050_v60, %v2053_v9  ;;  %v1670_v19 = vrot.slane %v1668_v5, 5  ;;  %v1678_v21 = vshll.u32 %v5815_v55, 16  ;;  %5055 = vmatprep.mubr.bf16.mxu0 %v7133_v10 }
 0x18b   : > { %v5838_v16 = vcombine.low %v1647_v58, %v1657_v7  ;;  %v1665_v18 = vor.u32 %v1664_v3, %v1661_v2  ;;  %3149 = vst.msk [vmem:[#allocation2 + $0x310] sm:$0xff] %vm313_vm0, %v6110_v8  ;;  %v1674_v20 = vrot.slane %v1672_v11, 4  ;;  %v6095_v22 = vrot.slane %v6069_v62, 9  ;;  %v5882_v24 = vld [vmem:[%s7245_s26 + $0xa4] sm:$0x1] }
 0x18c   : > { %v3042_v23 = vrot.slane %v6070_v63, 5  ;;  %3165 = vst.msk [vmem:[#allocation2 + $0x310] sm:$0xff] %vm330_vm1, %v7133_v10  ;;  %v3045_v26 = vrot.slane %v6071_v6, 5  ;;  %v5904_v27 = vrot.slane %v5880_v13, 9  ;;  %v2056_v28 = vrot.slane %v5881_v14, 5  ;;  %v3309_v30 = vld [vmem:[#allocation2 + $0x450] sm:$0xff]  ;;  %4557 = vmatmul.mubr.bf16.gmra.mrb[56].mxu1 %v3299_v15 }
 0x18d   : > { %1852 = vst.msk [vmem:[#allocation2 + $0x2f0] sm:$0xff] %vm313_vm0, %v5838_v16  ;;  %2157 = vst.msk [vmem:[#allocation2 + $0x340] sm:$0xff] %vm313_vm0, %v5919_v17  ;;  %v1666_v25 = vrot.slane %v1665_v18, 4  ;;  %v5816_v29 = vld [vmem:[%s7245_s26 + $0x9c] sm:$0xf]  ;;  %v1675_v31 = vor.u32 %v1674_v20, %v1670_v19  ;;  %v1680_v32 = vrot.slane %v1678_v21, 5  ;;  %4566 = vmatprep.mubr.bf16.mxu1 %v3309_v30 }
 0x18e   : > { %1868 = vst.msk [vmem:[#allocation2 + $0x2f0] sm:$0xff] %vm330_vm1, %v7133_v10  ;;  %2173 = vst.msk [vmem:[#allocation2 + $0x340] sm:$0xff] %vm330_vm1, %v7133_v10  ;;  %v3043_v33 = vsel %vm7256_vm6, %v6095_v22, %v3042_v23  ;;  %v3044_v34 = vrot.slane %v3042_v23, 4  ;;  %v5817_v35 = vld [vmem:[%s7245_s26 + $0xa0] sm:$0xf]  ;;  %v2057_v37 = vsel %vm7256_vm6, %v5904_v27, %v2056_v28  ;;  %v2058_v38 = vrot.slane %v2056_v28, 4 }
 0x18f   : > { %v1671_v36 = vsel %vm7265_vm7, %v1666_v25, %v1670_v19  ;;  %v2059_v39 = vrot.slane %v5882_v24, 5  ;;  %v5818_v40 = vld [vmem:[%s7245_s26 + $0xa4] sm:$0x1]  ;;  %v1676_v42 = vrot.slane %v1675_v31, 4  ;;  %v1683_v44 = vshrl.u32 %v5816_v29, 16  ;;  %v3308_v6 = vld [vmem:[#allocation2 + $0x448] sm:$0xff] }
 0x190   : > { %v3233_v41 = vld [vmem:[#allocation2 + $0x1f0] sm:$0xff]  ;;  %v3046_v43 = vsel %vm7256_vm6, %v3044_v34, %v3045_v26  ;;  %v1686_v45 = vshll.u32 %v5816_v29, 16  ;;  %v6072_v46 = vld [vmem:[%s7245_s26 + $0xa8] sm:$0xe]  ;;  %v1692_v49 = vshll.u32 %v5817_v35, 16  ;;  %v1696_v50 = vshrl.u32 %v5817_v35, 16 }
 0x191   : > { %v6111_v47 = vcombine.low %v3043_v33, %v3046_v43  ;;  %v2060_v48 = vsel %vm7256_vm6, %v2058_v38, %v2059_v39  ;;  %v6073_v51 = vld [vmem:[%s7245_s26 + $0xac] sm:$0xf]  ;;  %v6074_v52 = vld [vmem:[%s7245_s26 + $0xb0] sm:$0x1]  ;;  %v1681_v53 = vsel %vm7265_vm7, %v1676_v42, %v1680_v32  ;;  %v1685_v55 = vrot.slane %v1683_v44, 4  ;;  %5056 = vmatmul.mubr.bf16.gmra.mrb[24].mxu0 %v3233_v41  ;;  %v3248_v14 = vld [vmem:[#allocation2 + $0x268] sm:$0xff] }
 0x192   : > { %v5920_v54 = vcombine.low %v2057_v37, %v2060_v48  ;;  %v1688_v56 = vrot.slane %v1686_v45, 5  ;;  %v5883_v57 = vld [vmem:[%s7245_s26 + $0xa8] sm:$0xe]  ;;  %v5884_v58 = vld [vmem:[%s7245_s26 + $0xac] sm:$0xf]  ;;  %v5839_v59 = vcombine.low %v1671_v36, %v1681_v53  ;;  %v1694_v60 = vrot.slane %v1692_v49, 5  ;;  %5065 = vmatprep.mubr.bf16.mxu0 %v7133_v10 }
 0x193   : > { %3150 = vst.msk [vmem:[#allocation2 + $0x358] sm:$0xff] %vm313_vm0, %v6111_v47  ;;  %v1698_v61 = vrot.slane %v1696_v50, 4  ;;  %v1702_v62 = vshll.u32 %v5818_v40, 16  ;;  %v5885_v63 = vld [vmem:[%s7245_s26 + $0xb0] sm:$0x1]  ;;  %v6096_v1 = vrot.slane %v6072_v46, 9 }
 0x194   : > { %3166 = vst.msk [vmem:[#allocation2 + $0x358] sm:$0xff] %vm330_vm1, %v7133_v10  ;;  %v1689_v0 = vor.u32 %v1688_v56, %v1685_v55  ;;  %v3049_v2 = vrot.slane %v6073_v51, 5  ;;  %v3052_v3 = vrot.slane %v6074_v52, 5  ;;  %v5819_v5 = vld [vmem:[%s7245_s26 + $0xa8] sm:$0xf]  ;;  %v5905_v9 = vrot.slane %v5883_v57, 9  ;;  %4567 = vmatmul.mubr.bf16.gmra.mrb[60].mxu1 %v3308_v6 }
 0x195   : > { %2158 = vst.msk [vmem:[#allocation2 + $0x388] sm:$0xff] %vm313_vm0, %v5920_v54  ;;  %1853 = vst.msk [vmem:[#allocation2 + $0x338] sm:$0xff] %vm313_vm0, %v5839_v59  ;;  %v1699_v7 = vor.u32 %v1698_v61, %v1694_v60  ;;  %v1704_v8 = vrot.slane %v1702_v62, 5  ;;  %v2063_v11 = vrot.slane %v5884_v58, 5  ;;  %v5820_v13 = vld [vmem:[%s7245_s26 + $0xac] sm:$0xf]  ;;  %4689 = vmatprep.mubr.bf16.mxu1 %v3248_v14 }
 0x196   : > { %2174 = vst.msk [vmem:[#allocation2 + $0x388] sm:$0xff] %vm330_vm1, %v7133_v10  ;;  %1869 = vst.msk [vmem:[#allocation2 + $0x338] sm:$0xff] %vm330_vm1, %v7133_v10  ;;  %v1690_v15 = vrot.slane %v1689_v0, 4  ;;  %v3050_v16 = vsel %vm7256_vm6, %v6096_v1, %v3049_v2  ;;  %v3051_v17 = vrot.slane %v3049_v2, 4  ;;  %v2066_v18 = vrot.slane %v5885_v63, 5  ;;  %v3242_v31 = vld [vmem:[#allocation2 + $0x238] sm:$0xff] }
 0x197   : > { %v5821_v19 = vld [vmem:[%s7245_s26 + $0xb0] sm:$0x1]  ;;  %v1700_v20 = vrot.slane %v1699_v7, 4  ;;  %v2064_v21 = vsel %vm7256_vm6, %v5905_v9, %v2063_v11  ;;  %v2065_v22 = vrot.slane %v2063_v11, 4  ;;  %v1707_v23 = vshrl.u32 %v5819_v5, 16  ;;  %v3257_v58 = vld [vmem:[#allocation2 + $0x2b0] sm:$0xff] }
 0x198   : > { %v6075_v24 = vld [vmem:[%s7245_s26 + $0xb4] sm:$0xe]  ;;  %v1695_v25 = vsel %vm7265_vm7, %v1690_v15, %v1694_v60  ;;  %v3053_v26 = vsel %vm7256_vm6, %v3051_v17, %v3052_v3  ;;  %v1710_v27 = vshll.u32 %v5819_v5, 16  ;;  %v1716_v28 = vshll.u32 %v5820_v13, 16  ;;  %v6076_v29 = vld [vmem:[%s7245_s26 + $0xb8] sm:$0xf] }
 0x199   : > { %v6077_v30 = vld [vmem:[%s7245_s26 + $0xbc] sm:$0x1]  ;;  %v1705_v32 = vsel %vm7265_vm7, %v1700_v20, %v1704_v8  ;;  %v6112_v33 = vcombine.low %v3050_v16, %v3053_v26  ;;  %v2067_v34 = vsel %vm7256_vm6, %v2065_v22, %v2066_v18  ;;  %v1709_v35 = vrot.slane %v1707_v23, 4  ;;  %v5886_v36 = vld [vmem:[%s7245_s26 + $0xb4] sm:$0xe]  ;;  %5066 = vmatmul.mubr.bf16.gmra.mrb[28].mxu0 %v3242_v31 }
 0x19a   : > { %v5887_v37 = vld [vmem:[%s7245_s26 + $0xb8] sm:$0xf]  ;;  %v5840_v38 = vcombine.low %v1695_v25, %v1705_v32  ;;  %v5921_v39 = vcombine.low %v2064_v21, %v2067_v34  ;;  %v1712_v40 = vrot.slane %v1710_v27, 5  ;;  %v8338_v41 = vrot.slane %v1716_v28, 5  ;;  %v5888_v46 = vld [vmem:[%s7245_s26 + $0xbc] sm:$0x1]  ;;  %5075 = vmatprep.mubr.bf16.mxu0 %v7133_v10 }
 0x19b   : > { %3151 = vst.msk [vmem:[#allocation2 + $0x3a0] sm:$0xff] %vm313_vm0, %v6112_v33  ;;  %v1720_v42 = vshrl.u32 %v5820_v13, 16  ;;  %v1726_v43 = vshll.u32 %v5821_v19, 16  ;;  %v6097_v44 = vrot.slane %v6075_v24, 9  ;;  %v3056_v45 = vrot.slane %v6076_v29, 5  ;;  %v3247_v52 = vld [vmem:[#allocation2 + $0x260] sm:$0xff] }
 0x19c   : > { %1854 = vst.msk [vmem:[#allocation2 + $0x380] sm:$0xff] %vm313_vm0, %v5840_v38  ;;  %2159 = vst.msk [vmem:[#allocation2 + $0x3d0] sm:$0xff] %vm313_vm0, %v5921_v39  ;;  %v1713_v47 = vor.u32 %v1712_v40, %v1709_v35  ;;  %v3059_v48 = vrot.slane %v6077_v30, 5  ;;  %v5906_v49 = vrot.slane %v5886_v36, 9  ;;  %v2070_v50 = vrot.slane %v5887_v37, 5  ;;  %4690 = vmatmul.mubr.bf16.vlgmr.msra.gmra.mrb[32].mxu1 %v3247_v52  ;;  %v3251_v14 = vld [vmem:[#allocation2 + $0x280] sm:$0xff] }
 0x19d   : > { %3167 = vst.msk [vmem:[#allocation2 + $0x3a0] sm:$0xff] %vm330_vm1, %v7133_v10  ;;  %v5822_v51 = vld [vmem:[%s7245_s26 + $0xb4] sm:$0xf]  ;;  %1870 = vst.msk [vmem:[#allocation2 + $0x380] sm:$0xff] %vm330_vm1, %v7133_v10  ;;  %v1722_v53 = vrot.slane %v1720_v42, 4  ;;  %v1728_v54 = vrot.slane %v1726_v43, 5  ;;  %v3057_v55 = vsel %vm7256_vm6, %v6097_v44, %v3056_v45  ;;  %4699 = vmatprep.mubr.bf16.mxu1 %v3257_v58 }
 0x19e   : > { %2175 = vst.msk [vmem:[#allocation2 + $0x3d0] sm:$0xff] %vm330_vm1, %v7133_v10  ;;  %v3058_v56 = vrot.slane %v3056_v45, 4  ;;  %v5823_v57 = vld [vmem:[%s7245_s26 + $0xb8] sm:$0xf]  ;;  %v1714_v59 = vrot.slane %v1713_v47, 4  ;;  %v2071_v60 = vsel %vm7256_vm6, %v5906_v49, %v2070_v50  ;;  %v2072_v61 = vrot.slane %v2070_v50, 4 }
 0x19f   : > { %v2073_v62 = vrot.slane %v5888_v46, 5  ;;  %v1723_v63 = vor.u32 %v1722_v53, %v8338_v41  ;;  %v5824_v1 = vld [vmem:[%s7245_s26 + $0xbc] sm:$0x1]  ;;  %v1731_v2 = vshrl.u32 %v5822_v51, 16  ;;  %v1734_v3 = vshll.u32 %v5822_v51, 16  ;;  %v3278_v12 = vld [vmem:[#allocation2 + $0x358] sm:$0xff] }
 0x1a0   : > { %v3060_v0 = vsel %vm7256_vm6, %v3058_v56, %v3059_v48  ;;  %v6078_v5 = vld [vmem:[%s7245_s26 + $0xc0] sm:$0xe]  ;;  %v1719_v6 = vsel %vm7265_vm7, %v1714_v59, %v8338_v41  ;;  %v1740_v9 = vshll.u32 %v5823_v57, 16  ;;  %v6079_v11 = vld [vmem:[%s7245_s26 + $0xc4] sm:$0xf]  ;;  %v1744_v21 = vshrl.u32 %v5823_v57, 16 }
 0x1a1   : > { %v6113_v7 = vcombine.low %v3057_v55, %v3060_v0  ;;  %v2074_v8 = vsel %vm7256_vm6, %v2072_v61, %v2073_v62  ;;  %v6080_v13 = vld [vmem:[%s7245_s26 + $0xc8] sm:$0x1]  ;;  %v1724_v15 = vrot.slane %v1723_v63, 4  ;;  %v1733_v17 = vrot.slane %v1731_v2, 4  ;;  %v5889_v19 = vld [vmem:[%s7245_s26 + $0xc0] sm:$0xe]  ;;  %5076 = vmatmul.mubr.bf16.gmra.mrb[32].mxu0 %v3251_v14 }
 0x1a2   : > { %v5922_v16 = vcombine.low %v2071_v60, %v2074_v8  ;;  %v1736_v18 = vrot.slane %v1734_v3, 5  ;;  %v1742_v20 = vrot.slane %v1740_v9, 5  ;;  %v1750_v22 = vshll.u32 %v5824_v1, 16  ;;  %v5890_v24 = vld [vmem:[%s7245_s26 + $0xc4] sm:$0xf]  ;;  %5085 = vmatprep.mubr.bf16.mxu0 %v7133_v10  ;;  %v3256_v35 = vld [vmem:[#allocation2 + $0x2a8] sm:$0xff] }
 0x1a3   : > { %3152 = vst.msk [vmem:[#allocation2 + $0x3e8] sm:$0xff] %vm313_vm0, %v6113_v7  ;;  %v6098_v23 = vrot.slane %v6078_v5, 9  ;;  %v1729_v25 = vsel %vm7265_vm7, %v1724_v15, %v1728_v54  ;;  %v3063_v27 = vrot.slane %v6079_v11, 5  ;;  %v3066_v28 = vrot.slane %v6080_v13, 5  ;;  %v5891_v29 = vld [vmem:[%s7245_s26 + $0xc8] sm:$0x1] }
 0x1a4   : > { %3168 = vst.msk [vmem:[#allocation2 + $0x3e8] sm:$0xff] %vm330_vm1, %v7133_v10  ;;  %v1737_v26 = vor.u32 %v1736_v18, %v1733_v17  ;;  %v5825_v30 = vld [vmem:[%s7245_s26 + $0xc0] sm:$0xf]  ;;  %v5841_v31 = vcombine.low %v1719_v6, %v1729_v25  ;;  %v1746_v32 = vrot.slane %v1744_v21, 4  ;;  %v1752_v33 = vrot.slane %v1750_v22, 5  ;;  %v3266_v41 = vld [vmem:[#allocation2 + $0x2f8] sm:$0xff]  ;;  %4700 = vmatmul.mubr.bf16.gmra.mrb[36].mxu1 %v3256_v35 }
 0x1a5   : > { %2160 = vst.msk [vmem:[#allocation2 + $0x418] sm:$0xff] %vm313_vm0, %v5922_v16  ;;  %v5907_v34 = vrot.slane %v5889_v19, 9  ;;  %v3064_v37 = vsel %vm7256_vm6, %v6098_v23, %v3063_v27  ;;  %v3065_v38 = vrot.slane %v3063_v27, 4  ;;  %v2077_v39 = vrot.slane %v5890_v24, 5  ;;  %v5826_v40 = vld [vmem:[%s7245_s26 + $0xc4] sm:$0xf]  ;;  %4709 = vmatprep.mubr.bf16.mxu1 %v3266_v41 }
 0x1a6   : > { %2176 = vst.msk [vmem:[#allocation2 + $0x418] sm:$0xff] %vm330_vm1, %v7133_v10  ;;  %v1738_v36 = vrot.slane %v1737_v26, 4  ;;  %v1747_v42 = vor.u32 %v1746_v32, %v1742_v20  ;;  %v2080_v43 = vrot.slane %v5891_v29, 5  ;;  %v5827_v44 = vld [vmem:[%s7245_s26 + $0xc8] sm:$0x1]  ;;  %v1755_v45 = vshrl.u32 %v5825_v30, 16 }
 0x1a7   : > { %1855 = vst.msk [vmem:[#allocation2 + $0x3c8] sm:$0xff] %vm313_vm0, %v5841_v31  ;;  %v1758_v46 = vshll.u32 %v5825_v30, 16  ;;  %v3067_v48 = vsel %vm7256_vm6, %v3065_v38, %v3066_v28  ;;  %v2078_v49 = vsel %vm7256_vm6, %v5907_v34, %v2077_v39  ;;  %v2079_v50 = vrot.slane %v2077_v39, 4  ;;  %v6081_v51 = vld [vmem:[%s7245_s26 + $0xcc] sm:$0xe]  ;;  %v3260_v57 = vld [vmem:[#allocation2 + $0x2c8] sm:$0xff] }
 0x1a8   : > { %1871 = vst.msk [vmem:[#allocation2 + $0x3c8] sm:$0xff] %vm330_vm1, %v7133_v10  ;;  %v1743_v47 = vsel %vm7265_vm7, %v1738_v36, %v1742_v20  ;;  %v1748_v52 = vrot.slane %v1747_v42, 4  ;;  %v6114_v53 = vcombine.low %v3064_v37, %v3067_v48  ;;  %v1757_v54 = vrot.slane %v1755_v45, 4  ;;  %v6082_v56 = vld [vmem:[%s7245_s26 + $0xd0] sm:$0xf]  ;;  %v3265_v11 = vld [vmem:[#allocation2 + $0x2f0] sm:$0xff] }
 0x1a9   : > { %v1760_v55 = vrot.slane %v1758_v46, 5  ;;  %v2081_v58 = vsel %vm7256_vm6, %v2079_v50, %v2080_v43  ;;  %v1764_v59 = vshll.u32 %v5826_v40, 16  ;;  %v1768_v60 = vshrl.u32 %v5826_v40, 16  ;;  %v6083_v62 = vld [vmem:[%s7245_s26 + $0xd4] sm:$0x1]  ;;  %5086 = vmatmul.mubr.bf16.gmra.mrb[36].mxu0 %v3260_v57  ;;  %v3269_v21 = vld [vmem:[#allocation2 + $0x310] sm:$0xff] }
 0x1aa   : > { %v1774_v61 = vshll.u32 %v5827_v44, 16  ;;  %v1753_v63 = vsel %vm7265_vm7, %v1748_v52, %v1752_v33  ;;  %3153 = vst.msk [vmem:[#allocation2 + $0x430] sm:$0xff] %vm313_vm0, %v6114_v53  ;;  %v5923_v0 = vcombine.low %v2078_v49, %v2081_v58  ;;  %v6099_v2 = vrot.slane %v6081_v51, 9  ;;  %5095 = vmatprep.mubr.bf16.mxu0 %v7133_v10  ;;  %v3275_v15 = vld [vmem:[#allocation2 + $0x340] sm:$0xff]  ;;  %v3274_v25 = vld [vmem:[#allocation2 + $0x338] sm:$0xff]  ;;  %v3284_v4 = vld [vmem:[#allocation2 + $0x388] sm:$0xff] }
 0x1ab   : > { %v1761_v1 = vor.u32 %v1760_v55, %v1757_v54  ;;  %v5842_v3 = vcombine.low %v1743_v47, %v1753_v63  ;;  %3169 = vst.msk [vmem:[#allocation2 + $0x430] sm:$0xff] %vm330_vm1, %v7133_v10  ;;  %v1766_v5 = vrot.slane %v1764_v59, 5  ;;  %v1770_v6 = vrot.slane %v1768_v60, 4  ;;  %v3283_v26 = vld [vmem:[#allocation2 + $0x380] sm:$0xff]  ;;  %v3293_v27 = vld [vmem:[#allocation2 + $0x3d0] sm:$0xff]  ;;  %v3296_v31 = vld [vmem:[#allocation2 + $0x3e8] sm:$0xff] }
 0x1ac   : > { %2161 = vst.msk [vmem:[#allocation2 + $0x460] sm:$0xff] %vm313_vm0, %v5923_v0  ;;  %v3070_v8 = vrot.slane %v6082_v56, 5  ;;  %v3073_v9 = vrot.slane %v6083_v62, 5  ;;  %v1776_v14 = vrot.slane %v1774_v61, 5  ;;  %4710 = vmatmul.mubr.bf16.gmra.mrb[40].mxu1 %v3265_v11  ;;  %v3287_v28 = vld [vmem:[#allocation2 + $0x3a0] sm:$0xff]  ;;  %v3461_v63 = vlaneseq }
 0x1ad   : > { %v1762_v7 = vrot.slane %v1761_v1, 4  ;;  %1856 = vst.msk [vmem:[#allocation2 + $0x410] sm:$0xff] %vm313_vm0, %v5842_v3  ;;  %v1771_v13 = vor.u32 %v1770_v6, %v1766_v5  ;;  %4719 = vmatprep.mubr.bf16.mxu1 %v3275_v15  ;;  %v3302_v30 = vld [vmem:[#allocation2 + $0x418] sm:$0xff] }
 0x1ae   : > { %2177 = vst.msk [vmem:[#allocation2 + $0x460] sm:$0xff] %vm330_vm1, %v7133_v10  ;;  %1872 = vst.msk [vmem:[#allocation2 + $0x410] sm:$0xff] %vm330_vm1, %v7133_v10  ;;  %v3071_v16 = vsel %vm7256_vm6, %v6099_v2, %v3070_v8  ;;  %v3072_v17 = vrot.slane %v3070_v8, 4  ;;  %v3462_v1 = vshrl.u32 %v3461_v63, 7  ;;  %v3459_v8 = vld [vmem:[%s8671_s2] sm:$0x3] }
 0x1af   : > { %v1767_v18 = vsel %vm7265_vm7, %v1762_v7, %v1766_v5  ;;  %v1772_v19 = vrot.slane %v1771_v13, 4  ;;  %v3292_v29 = vld [vmem:[#allocation2 + $0x3c8] sm:$0xff] }
 0x1b0   : > { %v3074_v20 = vsel %vm7256_vm6, %v3072_v17, %v3073_v9  ;;  %v3463_v6 = vsub.s32 0, %v3462_v1  ;;  %v3467_v9 = vsub.s32 1, %v3462_v1 }
 0x1b1   : > { %v1777_v22 = vsel %vm7265_vm7, %v1772_v19, %v1776_v14  ;;  %v6115_v23 = vcombine.low %v3071_v16, %v3074_v20  ;;  %5096 = vmatmul.mubr.bf16.gmra.mrb[40].mxu0 %v3269_v21 }
 0x1b2   : > { %v5843_v24 = vcombine.low %v1767_v18, %v1777_v22  ;;  %5105 = vmatprep.mubr.bf16.mxu0 %v7133_v10  ;;  %v3305_v34 = vld [vmem:[#allocation2 + $0x430] sm:$0xff]  ;;  %v8486_v11 = vrot.slane %v3459_v8, %v3463_v6  ;;  %v8488_v13 = vrot.slane %v3459_v8, %v3467_v9 }
 0x1b3   : > { %3154 = vst.msk [vmem:[#allocation2 + $0x478] sm:$0xff] %vm313_vm0, %v6115_v23 }
 0x1b4   : > { %1857 = vst.msk [vmem:[#allocation2 + $0x458] sm:$0xff] %vm313_vm0, %v5843_v24  ;;  %4720 = vmatmul.mubr.bf16.gmra.mrb[44].mxu1 %v3274_v25 }
 0x1b5   : > { %3170 = vst.msk [vmem:[#allocation2 + $0x478] sm:$0xff] %vm330_vm1, %v7133_v10  ;;  %1873 = vst.msk [vmem:[#allocation2 + $0x458] sm:$0xff] %vm330_vm1, %v7133_v10  ;;  %4729 = vmatprep.mubr.bf16.mxu1 %v3284_v4  ;;  %v3301_v32 = vld [vmem:[#allocation2 + $0x410] sm:$0xff]  ;;  %v3311_v33 = vld [vmem:[#allocation2 + $0x460] sm:$0xff] }
 0x1b9   : > { %5106 = vmatmul.mubr.bf16.gmra.mrb[44].mxu0 %v3278_v12 }
 0x1ba   : > { %5115 = vmatprep.mubr.bf16.mxu0 %v7133_v10 }
 0x1bc   : > { %4730 = vmatmul.mubr.bf16.gmra.mrb[48].mxu1 %v3283_v26  ;;  %v3310_v35 = vld [vmem:[#allocation2 + $0x458] sm:$0xff] }
 0x1bd   : > { %4739 = vmatprep.mubr.bf16.mxu1 %v3293_v27  ;;  %v3314_v36 = vld [vmem:[#allocation2 + $0x478] sm:$0xff] }
 0x1c1   : > { %5116 = vmatmul.mubr.bf16.gmra.mrb[48].mxu0 %v3287_v28 }
 0x1c2   : > { %5125 = vmatprep.mubr.bf16.mxu0 %v7133_v10 }
 0x1c4   : > { %4740 = vmatmul.mubr.bf16.gmra.mrb[52].mxu1 %v3292_v29 }
 0x1c5   : > { %4749 = vmatprep.mubr.bf16.mxu1 %v3302_v30 }
 0x1c9   : > { %5126 = vmatmul.mubr.bf16.gmra.mrb[52].mxu0 %v3296_v31 }
 0x1ca   : > { %5135 = vmatprep.mubr.bf16.mxu0 %v7133_v10 }
 0x1cc   : > { %4750 = vmatmul.mubr.bf16.gmra.mrb[56].mxu1 %v3301_v32 }
 0x1cd   : > { %4759 = vmatprep.mubr.bf16.mxu1 %v3311_v33 }
 0x1d1   : > { %5136 = vmatmul.mubr.bf16.gmra.mrb[56].mxu0 %v3305_v34 }
 0x1d2   : > { %5145 = vmatprep.mubr.bf16.mxu0 %v7133_v10 }
 0x1d4   : > { %4760 = vmatmul.mubr.bf16.gmra.mrb[60].mxu1 %v3310_v35 }
 0x1d9   : > { %5146 = vmatmul.mubr.bf16.gmra.mrb[60].mxu0 %v3314_v36 }
 0x1e9   : > { %v4418_v37 = vpop.f32.mrb[0].mxu1 }
 0x1ea   : > { %v4420_v38 = vpop.f32.mrb[1].mxu1  ;;  %v6362_v14 = vadd.f32 %v4418_v37, %v8486_v11 }
 0x1eb   : > { %v4422_v39 = vpop.f32.mrb[2].mxu1  ;;  %v6364_v15 = vadd.f32 %v4420_v38, %v8488_v13 }
 0x1ec   : > { %v4424_v40 = vpop.f32.mrb[3].mxu1  ;;  %v6366_v17 = vadd.f32 %v4422_v39, %v8486_v11 }
 0x1ed   : > { %v6368_v20 = vadd.f32 %v4424_v40, %v8488_v13 }
 0x1f1   : > { %v4428_v41 = vpop.f32.mrb[4].mxu1 }
 0x1f2   : > { %v4430_v42 = vpop.f32.mrb[5].mxu1  ;;  %v6370_v30 = vadd.f32 %v4428_v41, %v8486_v11 }
 0x1f3   : > { %v8431_v43 = vpop.f32.mrb[6].mxu1  ;;  %v6372_v33 = vadd.f32 %v4430_v42, %v8488_v13 }
 0x1f4   : > { %v8433_v44 = vpop.f32.mrb[7].mxu1  ;;  %v6374_v36 = vadd.f32 %v8431_v43, %v8486_v11 }
 0x1f5   : > { %v6376_v40 = vadd.f32 %v8433_v44, %v8488_v13 }
 0x1f9   : > { %v8435_v45 = vpop.f32.mrb[8].mxu1 }
 0x1fa   : > { %v8437_v46 = vpop.f32.mrb[9].mxu1  ;;  %v6378_v44 = vadd.f32 %v8435_v45, %v8486_v11 }
 0x1fb   : > { %v8439_v47 = vpop.f32.mrb[10].mxu1 }
 0x1fc   : > { %v8441_v10 = vpop.f32.mrb[11].mxu1 }
 0x201   : > { %v8443_v48 = vpop.f32.mrb[12].mxu1 }
 0x202   : > { %v8445_v49 = vpop.f32.mrb[13].mxu1 }
 0x203   : > { %v8447_v50 = vpop.f32.mrb[14].mxu1 }
 0x204   : > { %v8449_v51 = vpop.f32.mrb[15].mxu1 }
 0x209   : > { %v8451_v52 = vpop.f32.mrb[16].mxu1 }
 0x20a   : > { %v8453_v53 = vpop.f32.mrb[17].mxu1 }
 0x20b   : > { %v8455_v54 = vpop.f32.mrb[18].mxu1 }
 0x20c   : > { %v8457_v55 = vpop.f32.mrb[19].mxu1 }
 0x215   : > { %v8459_v56 = vpop.f32.mrb[20].mxu1 }
 0x216   : > { %v8461_v57 = vpop.f32.mrb[21].mxu1 }
 0x217   : > { %v8463_v58 = vpop.f32.mrb[22].mxu1 }
 0x218   : > { %v8465_v59 = vpop.f32.mrb[23].mxu1 }
 0x21d   : > { %v8467_v60 = vpop.f32.mrb[24].mxu1 }
 0x21e   : > { %v8469_v61 = vpop.f32.mrb[25].mxu1 }
 0x21f   : > { %v8471_v62 = vpop.f32.mrb[26].mxu1 }
 0x220   : > { %v8473_v0 = vpop.f32.mrb[27].mxu1 }
 0x225   : > { %v8475_v2 = vpop.f32.mrb[28].mxu1 }
 0x226   : > { %v8477_v3 = vpop.f32.mrb[29].mxu1 }
 0x227   : > { %v8479_v5 = vpop.f32.mrb[30].mxu1 }
 0x228   : > { %v8481_v7 = vpop.f32.mrb[31].mxu1 }
 0x231   : > { %v4997_v16 = vpop.f32.mrb[0].mxu0 }
 0x232   : > { %v6363_v18 = vadd.f32 %v6362_v14, %v4997_v16  ;;  %v4999_v19 = vpop.f32.mrb[1].mxu0 }
 0x233   : > { %v6365_v21 = vadd.f32 %v6364_v15, %v4999_v19  ;;  %v5001_v22 = vpop.f32.mrb[2].mxu0  ;;  %v6380_v19 = vadd.f32 %v8437_v46, %v8488_v13 }
 0x234   : > { %vm5156_vm8 = vcmp.ge.f32.partialorder %v6363_v18, 0.0  ;;  %v5220_v23 = vmul.f32 0.2, %v6363_v18  ;;  %v6367_v24 = vadd.f32 %v6366_v17, %v5001_v22  ;;  %v5003_v25 = vpop.f32.mrb[3].mxu0  ;;  %v6382_v22 = vadd.f32 %v8439_v47, %v8486_v11 }
 0x235   : > { %vm5157_vm9 = vcmp.ge.f32.partialorder %v6365_v21, 0.0  ;;  %v5221_v4 = vmul.f32 0.2, %v6365_v21  ;;  %v6369_v12 = vadd.f32 %v6368_v20, %v5003_v25 }
 0x236   : > { %v5284_v26 = vsel %vm5156_vm8, %v6363_v18, %v5220_v23  ;;  %vm5158_vm10 = vcmp.ge.f32.partialorder %v6367_v24, 0.0  ;;  %v5222_v27 = vmul.f32 0.2, %v6367_v24 }
 0x237   : > { %v5285_v28 = vsel %vm5157_vm9, %v6365_v21, %v5221_v4  ;;  %vm5159_vm11 = vcmp.ge.f32.partialorder %v6369_v12, 0.0  ;;  %v5223_v29 = vmul.f32 0.2, %v6369_v12  ;;  %v6384_v4 = vadd.f32 %v8441_v10, %v8488_v13 }
 0x238   : > { %v6297_v31 = vpack.c.bf16 %v5285_v28, %v5284_v26  ;;  %v5286_v32 = vsel %vm5158_vm10, %v6367_v24, %v5222_v27  ;;  %v6386_v10 = vadd.f32 %v8443_v48, %v8486_v11 }
 0x239   : > { %v5287_v34 = vsel %vm5159_vm11, %v6369_v12, %v5223_v29  ;;  %v5007_v35 = vpop.f32.mrb[4].mxu0 }
 0x23a   : > { %5540 = vst [vmem:[%s8501_s4] sm:$0xff] %v6297_v31  ;;  %v6298_v37 = vpack.c.bf16 %v5287_v34, %v5286_v32  ;;  %v6371_v38 = vadd.f32 %v6370_v30, %v5007_v35  ;;  %v5009_v39 = vpop.f32.mrb[5].mxu0  ;;  %v6388_v35 = vadd.f32 %v8445_v49, %v8488_v13 }
 0x23b   : > { %v6373_v41 = vadd.f32 %v6372_v33, %v5009_v39  ;;  %v5011_v63 = vpop.f32.mrb[6].mxu0 }
 0x23c   : > { %5541 = vst [vmem:[%s8501_s4 + $0x8] sm:$0xff] %v6298_v37  ;;  %vm5160_vm12 = vcmp.ge.f32.partialorder %v6371_v38, 0.0  ;;  %v5224_v42 = vmul.f32 0.2, %v6371_v38  ;;  %v6375_v1 = vadd.f32 %v6374_v36, %v5011_v63  ;;  %v5013_v6 = vpop.f32.mrb[7].mxu0  ;;  %v6392_v63 = vadd.f32 %v8449_v51, %v8488_v13 }
 0x23d   : > { %vm5161_vm13 = vcmp.ge.f32.partialorder %v6373_v41, 0.0  ;;  %v5225_v43 = vmul.f32 0.2, %v6373_v41  ;;  %v6377_v8 = vadd.f32 %v6376_v40, %v5013_v6  ;;  %v6394_v51 = vadd.f32 %v8451_v52, %v8486_v11 }
 0x23e   : > { %v5288_v9 = vsel %vm5160_vm12, %v6371_v38, %v5224_v42  ;;  %vm5162_vm14 = vcmp.ge.f32.partialorder %v6375_v1, 0.0  ;;  %v5226_v14 = vmul.f32 0.2, %v6375_v1  ;;  %v6390_v38 = vadd.f32 %v8447_v50, %v8486_v11 }
 0x23f   : > { %v5289_v15 = vsel %vm5161_vm13, %v6373_v41, %v5225_v43  ;;  %vm5163_vm15 = vcmp.ge.f32.partialorder %v6377_v8, 0.0  ;;  %v5227_v16 = vmul.f32 0.2, %v6377_v8 }
 0x240   : > { %v6299_v17 = vpack.c.bf16 %v5289_v15, %v5288_v9  ;;  %v5290_v18 = vsel %vm5162_vm14, %v6375_v1, %v5226_v14 }
 0x241   : > { %v5291_v20 = vsel %vm5163_vm15, %v6377_v8, %v5227_v16  ;;  %v5017_v21 = vpop.f32.mrb[8].mxu0 }
 0x242   : > { %5542 = vst [vmem:[%s8501_s4 + $0x10] sm:$0xff] %v6299_v17  ;;  %v6300_v23 = vpack.c.bf16 %v5291_v20, %v5290_v18  ;;  %v6379_v24 = vadd.f32 %v6378_v44, %v5017_v21  ;;  %v5019_v25 = vpop.f32.mrb[9].mxu0  ;;  %v6396_v17 = vadd.f32 %v8453_v53, %v8488_v13  ;;  %v6398_v20 = vadd.f32 %v8455_v54, %v8486_v11 }
 0x243   : > { %v6381_v12 = vadd.f32 %v6380_v19, %v5019_v25  ;;  %v5021_v26 = vpop.f32.mrb[10].mxu0 }
 0x244   : > { %5543 = vst [vmem:[%s8501_s4 + $0x18] sm:$0xff] %v6300_v23  ;;  %vm5164_vm0 = vcmp.ge.f32.partialorder %v6379_v24, 0.0  ;;  %v5228_v45 = vmul.f32 0.2, %v6379_v24  ;;  %v6383_v27 = vadd.f32 %v6382_v22, %v5021_v26  ;;  %v5023_v28 = vpop.f32.mrb[11].mxu0 }
 0x245   : > { %vm5165_vm1 = vcmp.ge.f32.partialorder %v6381_v12, 0.0  ;;  %v5229_v46 = vmul.f32 0.2, %v6381_v12  ;;  %v6385_v29 = vadd.f32 %v6384_v4, %v5023_v28 }
 0x246   : > { %v5292_v30 = vsel %vm5164_vm0, %v6379_v24, %v5228_v45  ;;  %vm5166_vm2 = vcmp.ge.f32.partialorder %v6383_v27, 0.0  ;;  %v5230_v47 = vmul.f32 0.2, %v6383_v27  ;;  %v6400_v24 = vadd.f32 %v8457_v55, %v8488_v13 }
 0x247   : > { %v5293_v31 = vsel %vm5165_vm1, %v6381_v12, %v5229_v46  ;;  %vm5167_vm3 = vcmp.ge.f32.partialorder %v6385_v29, 0.0  ;;  %v5231_v32 = vmul.f32 0.2, %v6385_v29  ;;  %v6402_v55 = vadd.f32 %v8459_v56, %v8486_v11 }
 0x248   : > { %v6301_v33 = vpack.c.bf16 %v5293_v31, %v5292_v30  ;;  %v5294_v34 = vsel %vm5166_vm2, %v6383_v27, %v5230_v47  ;;  %v6404_v47 = vadd.f32 %v8461_v57, %v8488_v13 }
 0x249   : > { %v5295_v36 = vsel %vm5167_vm3, %v6385_v29, %v5231_v32 }
 0x24a   : > { %5544 = vst [vmem:[%s8501_s4 + $0x20] sm:$0xff] %v6301_v33  ;;  %v6302_v39 = vpack.c.bf16 %v5295_v36, %v5294_v34  ;;  %v6408_v36 = vadd.f32 %v8465_v59, %v8488_v13  ;;  %v6410_v59 = vadd.f32 %v8467_v60, %v8486_v11 }
 0x24c   : > { %v5027_v37 = vpop.f32.mrb[12].mxu0  ;;  %5545 = vst [vmem:[%s8501_s4 + $0x28] sm:$0xff] %v6302_v39 }
 0x24d   : > { %v6387_v40 = vadd.f32 %v6386_v10, %v5027_v37  ;;  %v5029_v41 = vpop.f32.mrb[13].mxu0  ;;  %v6406_v10 = vadd.f32 %v8463_v58, %v8486_v11 }
 0x24e   : > { %v6389_v42 = vadd.f32 %v6388_v35, %v5029_v41  ;;  %v5031_v1 = vpop.f32.mrb[14].mxu0 }
 0x24f   : > { %vm5168_vm4 = vcmp.ge.f32.partialorder %v6387_v40, 0.0  ;;  %v5232_v48 = vmul.f32 0.2, %v6387_v40  ;;  %v6391_v6 = vadd.f32 %v6390_v38, %v5031_v1  ;;  %v5033_v43 = vpop.f32.mrb[15].mxu0 }
 0x250   : > { %vm5169_vm5 = vcmp.ge.f32.partialorder %v6389_v42, 0.0  ;;  %v5233_v49 = vmul.f32 0.2, %v6389_v42  ;;  %v6393_v8 = vadd.f32 %v6392_v63, %v5033_v43  ;;  %v6412_v43 = vadd.f32 %v8469_v61, %v8488_v13 }
 0x251   : > { %v5296_v9 = vsel %vm5168_vm4, %v6387_v40, %v5232_v48  ;;  %vm5170_vm6 = vcmp.ge.f32.partialorder %v6391_v6, 0.0  ;;  %v5234_v50 = vmul.f32 0.2, %v6391_v6 }
 0x252   : > { %v5297_v14 = vsel %vm5169_vm5, %v6389_v42, %v5233_v49  ;;  %vm5171_vm7 = vcmp.ge.f32.partialorder %v6393_v8, 0.0  ;;  %v5235_v15 = vmul.f32 0.2, %v6393_v8 }
 0x253   : > { %v6303_v16 = vpack.c.bf16 %v5297_v14, %v5296_v9  ;;  %v5298_v44 = vsel %vm5170_vm6, %v6391_v6, %v5234_v50  ;;  %v6414_v9 = vadd.f32 %v8471_v62, %v8486_v11 }
 0x254   : > { %v5299_v18 = vsel %vm5171_vm7, %v6393_v8, %v5235_v15  ;;  %v5037_v19 = vpop.f32.mrb[16].mxu0 }
 0x255   : > { %5546 = vst [vmem:[%s8501_s4 + $0x30] sm:$0xff] %v6303_v16  ;;  %v6304_v21 = vpack.c.bf16 %v5299_v18, %v5298_v44  ;;  %v6395_v22 = vadd.f32 %v6394_v51, %v5037_v19  ;;  %v5039_v23 = vpop.f32.mrb[17].mxu0  ;;  %v6416_v51 = vadd.f32 %v8473_v0, %v8488_v13  ;;  %v6418_v0 = vadd.f32 %v8475_v2, %v8486_v11 }
 0x256   : > { %v6397_v25 = vadd.f32 %v6396_v17, %v5039_v23  ;;  %v5041_v4 = vpop.f32.mrb[18].mxu0 }
 0x257   : > { %5547 = vst [vmem:[%s8501_s4 + $0x38] sm:$0xff] %v6304_v21  ;;  %vm5172_vm8 = vcmp.ge.f32.partialorder %v6395_v22, 0.0  ;;  %v5236_v52 = vmul.f32 0.2, %v6395_v22  ;;  %v6399_v12 = vadd.f32 %v6398_v20, %v5041_v4  ;;  %v5043_v26 = vpop.f32.mrb[19].mxu0 }
 0x258   : > { %vm5173_vm9 = vcmp.ge.f32.partialorder %v6397_v25, 0.0  ;;  %v5237_v53 = vmul.f32 0.2, %v6397_v25  ;;  %v6401_v45 = vadd.f32 %v6400_v24, %v5043_v26 }
 0x259   : > { %v5300_v27 = vsel %vm5172_vm8, %v6395_v22, %v5236_v52  ;;  %vm5174_vm10 = vcmp.ge.f32.partialorder %v6399_v12, 0.0  ;;  %v5238_v54 = vmul.f32 0.2, %v6399_v12 }
 0x25a   : > { %v5301_v28 = vsel %vm5173_vm9, %v6397_v25, %v5237_v53  ;;  %vm5175_vm11 = vcmp.ge.f32.partialorder %v6401_v45, 0.0  ;;  %v5239_v46 = vmul.f32 0.2, %v6401_v45  ;;  %v6420_v25 = vadd.f32 %v8477_v3, %v8488_v13 }
 0x25b   : > { %v6305_v29 = vpack.c.bf16 %v5301_v28, %v5300_v27  ;;  %v5302_v30 = vsel %vm5174_vm10, %v6399_v12, %v5238_v54  ;;  %v6422_v12 = vadd.f32 %v8479_v5, %v8486_v11  ;;  %v6424_v27 = vadd.f32 %v8481_v7, %v8488_v13 }
 0x25c   : > { %v5303_v31 = vsel %vm5175_vm11, %v6401_v45, %v5239_v46  ;;  %v5047_v32 = vpop.f32.mrb[20].mxu0 }
 0x25d   : > { %5548 = vst [vmem:[%s8501_s4 + $0x40] sm:$0xff] %v6305_v29  ;;  %v6306_v33 = vpack.c.bf16 %v5303_v31, %v5302_v30  ;;  %v6403_v34 = vadd.f32 %v6402_v55, %v5047_v32  ;;  %v5049_v35 = vpop.f32.mrb[21].mxu0 }
 0x25e   : > { %v6405_v37 = vadd.f32 %v6404_v47, %v5049_v35  ;;  %v5051_v38 = vpop.f32.mrb[22].mxu0 }
 0x25f   : > { %5549 = vst [vmem:[%s8501_s4 + $0x48] sm:$0xff] %v6306_v33  ;;  %vm5176_vm12 = vcmp.ge.f32.partialorder %v6403_v34, 0.0  ;;  %v5240_v56 = vmul.f32 0.2, %v6403_v34  ;;  %v6407_v39 = vadd.f32 %v6406_v10, %v5051_v38  ;;  %v5053_v40 = vpop.f32.mrb[23].mxu0 }
 0x260   : > { %vm5177_vm13 = vcmp.ge.f32.partialorder %v6405_v37, 0.0  ;;  %v5241_v57 = vmul.f32 0.2, %v6405_v37  ;;  %v6409_v41 = vadd.f32 %v6408_v36, %v5053_v40 }
 0x261   : > { %v5304_v63 = vsel %vm5176_vm12, %v6403_v34, %v5240_v56  ;;  %vm5178_vm14 = vcmp.ge.f32.partialorder %v6407_v39, 0.0  ;;  %v5242_v58 = vmul.f32 0.2, %v6407_v39 }
 0x262   : > { %v5305_v42 = vsel %vm5177_vm13, %v6405_v37, %v5241_v57  ;;  %vm5179_vm15 = vcmp.ge.f32.partialorder %v6409_v41, 0.0  ;;  %v5243_v1 = vmul.f32 0.2, %v6409_v41 }
 0x263   : > { %v6307_v48 = vpack.c.bf16 %v5305_v42, %v5304_v63  ;;  %v5306_v6 = vsel %vm5178_vm14, %v6407_v39, %v5242_v58 }
 0x264   : > { %v5307_v49 = vsel %vm5179_vm15, %v6409_v41, %v5243_v1  ;;  %v5057_v8 = vpop.f32.mrb[24].mxu0 }
 0x265   : > { %5550 = vst [vmem:[%s8501_s4 + $0x50] sm:$0xff] %v6307_v48  ;;  %v6308_v50 = vpack.c.bf16 %v5307_v49, %v5306_v6  ;;  %v6411_v14 = vadd.f32 %v6410_v59, %v5057_v8  ;;  %v5059_v15 = vpop.f32.mrb[25].mxu0 }
 0x266   : > { %v6413_v16 = vadd.f32 %v6412_v43, %v5059_v15  ;;  %v5061_v44 = vpop.f32.mrb[26].mxu0 }
 0x267   : > { %5551 = vst [vmem:[%s8501_s4 + $0x58] sm:$0xff] %v6308_v50  ;;  %vm5180_vm0 = vcmp.ge.f32.partialorder %v6411_v14, 0.0  ;;  %v5244_v60 = vmul.f32 0.2, %v6411_v14  ;;  %v6415_v17 = vadd.f32 %v6414_v9, %v5061_v44  ;;  %v5063_v18 = vpop.f32.mrb[27].mxu0 }
 0x268   : > { %vm5181_vm1 = vcmp.ge.f32.partialorder %v6413_v16, 0.0  ;;  %v5245_v61 = vmul.f32 0.2, %v6413_v16  ;;  %v6417_v19 = vadd.f32 %v6416_v51, %v5063_v18 }
 0x269   : > { %v5308_v20 = vsel %vm5180_vm0, %v6411_v14, %v5244_v60  ;;  %vm5182_vm2 = vcmp.ge.f32.partialorder %v6415_v17, 0.0  ;;  %v5246_v62 = vmul.f32 0.2, %v6415_v17 }
 0x26a   : > { %v5309_v21 = vsel %vm5181_vm1, %v6413_v16, %v5245_v61  ;;  %vm5183_vm3 = vcmp.ge.f32.partialorder %v6417_v19, 0.0  ;;  %v5247_v22 = vmul.f32 0.2, %v6417_v19 }
 0x26b   : > { %v6309_v23 = vpack.c.bf16 %v5309_v21, %v5308_v20  ;;  %v5310_v24 = vsel %vm5182_vm2, %v6415_v17, %v5246_v62 }
 0x26c   : > { %v5311_v4 = vsel %vm5183_vm3, %v6417_v19, %v5247_v22  ;;  %v5067_v52 = vpop.f32.mrb[28].mxu0 }
 0x26d   : > { %5552 = vst [vmem:[%s8501_s4 + $0x60] sm:$0xff] %v6309_v23  ;;  %v6310_v26 = vpack.c.bf16 %v5311_v4, %v5310_v24  ;;  %v6419_v53 = vadd.f32 %v6418_v0, %v5067_v52  ;;  %v5069_v45 = vpop.f32.mrb[29].mxu0 }
 0x26e   : > { %v6421_v54 = vadd.f32 %v6420_v25, %v5069_v45  ;;  %v5071_v28 = vpop.f32.mrb[30].mxu0 }
 0x26f   : > { %5553 = vst [vmem:[%s8501_s4 + $0x68] sm:$0xff] %v6310_v26  ;;  %vm5184_vm4 = vcmp.ge.f32.partialorder %v6419_v53, 0.0  ;;  %v5248_v2 = vmul.f32 0.2, %v6419_v53  ;;  %v6423_v46 = vadd.f32 %v6422_v12, %v5071_v28  ;;  %v5073_v55 = vpop.f32.mrb[31].mxu0  ;;  %v4691_v30 = vpop.f32.mrb[32].mxu1 }
 0x270   : > { %vm5185_vm5 = vcmp.ge.f32.partialorder %v6421_v54, 0.0  ;;  %v5249_v3 = vmul.f32 0.2, %v6421_v54  ;;  %v6425_v29 = vadd.f32 %v6424_v27, %v5073_v55  ;;  %v6426_v31 = vadd.f32 %v4691_v30, %v8486_v11  ;;  %v4693_v32 = vpop.f32.mrb[33].mxu1 }
 0x271   : > { %v5312_v47 = vsel %vm5184_vm4, %v6419_v53, %v5248_v2  ;;  %vm5186_vm6 = vcmp.ge.f32.partialorder %v6423_v46, 0.0  ;;  %v5250_v5 = vmul.f32 0.2, %v6423_v46  ;;  %v6428_v33 = vadd.f32 %v4693_v32, %v8488_v13  ;;  %v4695_v34 = vpop.f32.mrb[34].mxu1 }
 0x272   : > { %v5313_v10 = vsel %vm5185_vm5, %v6421_v54, %v5249_v3  ;;  %vm5187_vm7 = vcmp.ge.f32.partialorder %v6425_v29, 0.0  ;;  %v5251_v7 = vmul.f32 0.2, %v6425_v29  ;;  %v6430_v37 = vadd.f32 %v4695_v34, %v8486_v11  ;;  %v4697_v38 = vpop.f32.mrb[35].mxu1 }
 0x273   : > { %v6311_v35 = vpack.c.bf16 %v5313_v10, %v5312_v47  ;;  %v5314_v36 = vsel %vm5186_vm6, %v6423_v46, %v5250_v5  ;;  %v6432_v40 = vadd.f32 %v4697_v38, %v8488_v13 }
 0x274   : > { %v5315_v56 = vsel %vm5187_vm7, %v6425_v29, %v5251_v7  ;;  %v5077_v39 = vpop.f32.mrb[32].mxu0 }
 0x275   : > { %5554 = vst [vmem:[%s8501_s4 + $0x70] sm:$0xff] %v6311_v35  ;;  %v6312_v57 = vpack.c.bf16 %v5315_v56, %v5314_v36  ;;  %v6427_v41 = vadd.f32 %v6426_v31, %v5077_v39  ;;  %v5079_v63 = vpop.f32.mrb[33].mxu0 }
 0x276   : > { %v6429_v58 = vadd.f32 %v6428_v33, %v5079_v63  ;;  %v5081_v42 = vpop.f32.mrb[34].mxu0 }
 0x277   : > { %5555 = vst [vmem:[%s8501_s4 + $0x78] sm:$0xff] %v6312_v57  ;;  %vm5188_vm8 = vcmp.ge.f32.partialorder %v6427_v41, 0.0  ;;  %v5252_v1 = vmul.f32 0.2, %v6427_v41  ;;  %v6431_v59 = vadd.f32 %v6430_v37, %v5081_v42  ;;  %v5083_v48 = vpop.f32.mrb[35].mxu0  ;;  %v4701_v49 = vpop.f32.mrb[36].mxu1 }
 0x278   : > { %vm5189_vm9 = vcmp.ge.f32.partialorder %v6429_v58, 0.0  ;;  %v5253_v6 = vmul.f32 0.2, %v6429_v58  ;;  %v6433_v43 = vadd.f32 %v6432_v40, %v5083_v48  ;;  %v6434_v50 = vadd.f32 %v4701_v49, %v8486_v11  ;;  %v4703_v14 = vpop.f32.mrb[37].mxu1 }
 0x279   : > { %v5316_v8 = vsel %vm5188_vm8, %v6427_v41, %v5252_v1  ;;  %vm5190_vm10 = vcmp.ge.f32.partialorder %v6431_v59, 0.0  ;;  %v5254_v9 = vmul.f32 0.2, %v6431_v59  ;;  %v6436_v16 = vadd.f32 %v4703_v14, %v8488_v13  ;;  %v4705_v44 = vpop.f32.mrb[38].mxu1 }
 0x27a   : > { %v5317_v15 = vsel %vm5189_vm9, %v6429_v58, %v5253_v6  ;;  %vm5191_vm11 = vcmp.ge.f32.partialorder %v6433_v43, 0.0  ;;  %v5255_v51 = vmul.f32 0.2, %v6433_v43  ;;  %v6438_v18 = vadd.f32 %v4705_v44, %v8486_v11  ;;  %v4707_v61 = vpop.f32.mrb[39].mxu1 }
 0x27b   : > { %v6313_v60 = vpack.c.bf16 %v5317_v15, %v5316_v8  ;;  %v5318_v17 = vsel %vm5190_vm10, %v6431_v59, %v5254_v9  ;;  %v6440_v62 = vadd.f32 %v4707_v61, %v8488_v13 }
 0x27c   : > { %v5319_v19 = vsel %vm5191_vm11, %v6433_v43, %v5255_v51  ;;  %v5087_v20 = vpop.f32.mrb[36].mxu0 }
 0x27d   : > { %5556 = vst [vmem:[%s8501_s4 + $0x80] sm:$0xff] %v6313_v60  ;;  %v6314_v21 = vpack.c.bf16 %v5319_v19, %v5318_v17  ;;  %v6435_v22 = vadd.f32 %v6434_v50, %v5087_v20  ;;  %v5089_v0 = vpop.f32.mrb[37].mxu0 }
 0x27e   : > { %v6437_v23 = vadd.f32 %v6436_v16, %v5089_v0  ;;  %v5091_v24 = vpop.f32.mrb[38].mxu0 }
 0x27f   : > { %5557 = vst [vmem:[%s8501_s4 + $0x88] sm:$0xff] %v6314_v21  ;;  %vm5192_vm12 = vcmp.ge.f32.partialorder %v6435_v22, 0.0  ;;  %v5256_v25 = vmul.f32 0.2, %v6435_v22  ;;  %v6439_v4 = vadd.f32 %v6438_v18, %v5091_v24  ;;  %v5093_v52 = vpop.f32.mrb[39].mxu0  ;;  %v4711_v53 = vpop.f32.mrb[40].mxu1 }
 0x280   : > { %vm5193_vm13 = vcmp.ge.f32.partialorder %v6437_v23, 0.0  ;;  %v5257_v12 = vmul.f32 0.2, %v6437_v23  ;;  %v6441_v26 = vadd.f32 %v6440_v62, %v5093_v52  ;;  %v6442_v54 = vadd.f32 %v4711_v53, %v8486_v11  ;;  %v4713_v28 = vpop.f32.mrb[41].mxu1 }
 0x281   : > { %v5320_v45 = vsel %vm5192_vm12, %v6435_v22, %v5256_v25  ;;  %vm5194_vm14 = vcmp.ge.f32.partialorder %v6439_v4, 0.0  ;;  %v5258_v27 = vmul.f32 0.2, %v6439_v4  ;;  %v6444_v55 = vadd.f32 %v4713_v28, %v8488_v13  ;;  %v4715_v3 = vpop.f32.mrb[42].mxu1 }
 0x282   : > { %v5321_v2 = vsel %vm5193_vm13, %v6437_v23, %v5257_v12  ;;  %vm5195_vm15 = vcmp.ge.f32.partialorder %v6441_v26, 0.0  ;;  %v5259_v46 = vmul.f32 0.2, %v6441_v26  ;;  %v6446_v47 = vadd.f32 %v4715_v3, %v8486_v11  ;;  %v4717_v5 = vpop.f32.mrb[43].mxu1 }
 0x283   : > { %v6315_v29 = vpack.c.bf16 %v5321_v2, %v5320_v45  ;;  %v5322_v30 = vsel %vm5194_vm14, %v6439_v4, %v5258_v27  ;;  %v6448_v10 = vadd.f32 %v4717_v5, %v8488_v13 }
 0x284   : > { %v5323_v31 = vsel %vm5195_vm15, %v6441_v26, %v5259_v46  ;;  %v5097_v32 = vpop.f32.mrb[40].mxu0 }
 0x285   : > { %5558 = vst [vmem:[%s8501_s4 + $0x90] sm:$0xff] %v6315_v29  ;;  %v6316_v7 = vpack.c.bf16 %v5323_v31, %v5322_v30  ;;  %v6443_v33 = vadd.f32 %v6442_v54, %v5097_v32  ;;  %v5099_v34 = vpop.f32.mrb[41].mxu0 }
 0x286   : > { %v6445_v35 = vadd.f32 %v6444_v55, %v5099_v34  ;;  %v5101_v36 = vpop.f32.mrb[42].mxu0 }
 0x287   : > { %5559 = vst [vmem:[%s8501_s4 + $0x98] sm:$0xff] %v6316_v7  ;;  %vm5196_vm0 = vcmp.ge.f32.partialorder %v6443_v33, 0.0  ;;  %v5260_v37 = vmul.f32 0.2, %v6443_v33  ;;  %v6447_v38 = vadd.f32 %v6446_v47, %v5101_v36  ;;  %v5103_v56 = vpop.f32.mrb[43].mxu0  ;;  %v4721_v57 = vpop.f32.mrb[44].mxu1 }
 0x288   : > { %vm5197_vm1 = vcmp.ge.f32.partialorder %v6445_v35, 0.0  ;;  %v5261_v39 = vmul.f32 0.2, %v6445_v35  ;;  %v6449_v40 = vadd.f32 %v6448_v10, %v5103_v56  ;;  %v6450_v58 = vadd.f32 %v4721_v57, %v8486_v11  ;;  %v4723_v42 = vpop.f32.mrb[45].mxu1 }
 0x289   : > { %v5324_v41 = vsel %vm5196_vm0, %v6443_v33, %v5260_v37  ;;  %vm5198_vm2 = vcmp.ge.f32.partialorder %v6447_v38, 0.0  ;;  %v5262_v63 = vmul.f32 0.2, %v6447_v38  ;;  %v6452_v48 = vadd.f32 %v4723_v42, %v8488_v13  ;;  %v4725_v6 = vpop.f32.mrb[46].mxu1 }
 0x28a   : > { %v5325_v1 = vsel %vm5197_vm1, %v6445_v35, %v5261_v39  ;;  %vm5199_vm3 = vcmp.ge.f32.partialorder %v6449_v40, 0.0  ;;  %v5263_v59 = vmul.f32 0.2, %v6449_v40  ;;  %v6454_v8 = vadd.f32 %v4725_v6, %v8486_v11  ;;  %v4727_v9 = vpop.f32.mrb[47].mxu1 }
 0x28b   : > { %v6317_v43 = vpack.c.bf16 %v5325_v1, %v5324_v41  ;;  %v5326_v49 = vsel %vm5198_vm2, %v6447_v38, %v5262_v63  ;;  %v6456_v15 = vadd.f32 %v4727_v9, %v8488_v13 }
 0x28c   : > { %v5327_v50 = vsel %vm5199_vm3, %v6449_v40, %v5263_v59  ;;  %v5107_v14 = vpop.f32.mrb[44].mxu0 }
 0x28d   : > { %5560 = vst [vmem:[%s8501_s4 + $0xa0] sm:$0xff] %v6317_v43  ;;  %v6318_v51 = vpack.c.bf16 %v5327_v50, %v5326_v49  ;;  %v6451_v16 = vadd.f32 %v6450_v58, %v5107_v14  ;;  %v5109_v44 = vpop.f32.mrb[45].mxu0 }
 0x28e   : > { %v6453_v60 = vadd.f32 %v6452_v48, %v5109_v44  ;;  %v5111_v17 = vpop.f32.mrb[46].mxu0 }
 0x28f   : > { %5561 = vst [vmem:[%s8501_s4 + $0xa8] sm:$0xff] %v6318_v51  ;;  %vm5200_vm4 = vcmp.ge.f32.partialorder %v6451_v16, 0.0  ;;  %v5264_v18 = vmul.f32 0.2, %v6451_v16  ;;  %v6455_v61 = vadd.f32 %v6454_v8, %v5111_v17  ;;  %v5113_v19 = vpop.f32.mrb[47].mxu0  ;;  %v4731_v21 = vpop.f32.mrb[48].mxu1 }
 0x290   : > { %vm5201_vm5 = vcmp.ge.f32.partialorder %v6453_v60, 0.0  ;;  %v5265_v20 = vmul.f32 0.2, %v6453_v60  ;;  %v6457_v62 = vadd.f32 %v6456_v15, %v5113_v19  ;;  %v6458_v23 = vadd.f32 %v4731_v21, %v8486_v11  ;;  %v4733_v24 = vpop.f32.mrb[49].mxu1 }
 0x291   : > { %v5328_v22 = vsel %vm5200_vm4, %v6451_v16, %v5264_v18  ;;  %vm5202_vm6 = vcmp.ge.f32.partialorder %v6455_v61, 0.0  ;;  %v5266_v0 = vmul.f32 0.2, %v6455_v61  ;;  %v6460_v52 = vadd.f32 %v4733_v24, %v8488_v13  ;;  %v4735_v12 = vpop.f32.mrb[50].mxu1 }
 0x292   : > { %v5329_v25 = vsel %vm5201_vm5, %v6453_v60, %v5265_v20  ;;  %vm5203_vm7 = vcmp.ge.f32.partialorder %v6457_v62, 0.0  ;;  %v5267_v4 = vmul.f32 0.2, %v6457_v62  ;;  %v6462_v45 = vadd.f32 %v4735_v12, %v8486_v11  ;;  %v4737_v27 = vpop.f32.mrb[51].mxu1 }
 0x293   : > { %v6319_v26 = vpack.c.bf16 %v5329_v25, %v5328_v22  ;;  %v5330_v53 = vsel %vm5202_vm6, %v6455_v61, %v5266_v0  ;;  %v6464_v2 = vadd.f32 %v4737_v27, %v8488_v13 }
 0x294   : > { %v5331_v54 = vsel %vm5203_vm7, %v6457_v62, %v5267_v4  ;;  %v5117_v28 = vpop.f32.mrb[48].mxu0 }
 0x295   : > { %5562 = vst [vmem:[%s8501_s4 + $0xb0] sm:$0xff] %v6319_v26  ;;  %v6320_v46 = vpack.c.bf16 %v5331_v54, %v5330_v53  ;;  %v6459_v55 = vadd.f32 %v6458_v23, %v5117_v28  ;;  %v5119_v3 = vpop.f32.mrb[49].mxu0 }
 0x296   : > { %v6461_v29 = vadd.f32 %v6460_v52, %v5119_v3  ;;  %v5121_v30 = vpop.f32.mrb[50].mxu0 }
 0x297   : > { %5563 = vst [vmem:[%s8501_s4 + $0xb8] sm:$0xff] %v6320_v46  ;;  %vm5204_vm8 = vcmp.ge.f32.partialorder %v6459_v55, 0.0  ;;  %v5268_v47 = vmul.f32 0.2, %v6459_v55  ;;  %v6463_v5 = vadd.f32 %v6462_v45, %v5121_v30  ;;  %v5123_v31 = vpop.f32.mrb[51].mxu0  ;;  %v4741_v7 = vpop.f32.mrb[52].mxu1 }
 0x298   : > { %vm5205_vm9 = vcmp.ge.f32.partialorder %v6461_v29, 0.0  ;;  %v5269_v32 = vmul.f32 0.2, %v6461_v29  ;;  %v6465_v10 = vadd.f32 %v6464_v2, %v5123_v31  ;;  %v6466_v35 = vadd.f32 %v4741_v7, %v8486_v11  ;;  %v4743_v36 = vpop.f32.mrb[53].mxu1 }
 0x299   : > { %v5332_v33 = vsel %vm5204_vm8, %v6459_v55, %v5268_v47  ;;  %vm5206_vm10 = vcmp.ge.f32.partialorder %v6463_v5, 0.0  ;;  %v5270_v34 = vmul.f32 0.2, %v6463_v5  ;;  %v6468_v56 = vadd.f32 %v4743_v36, %v8488_v13  ;;  %v4745_v39 = vpop.f32.mrb[54].mxu1 }
 0x29a   : > { %v5333_v37 = vsel %vm5205_vm9, %v6461_v29, %v5269_v32  ;;  %vm5207_vm11 = vcmp.ge.f32.partialorder %v6465_v10, 0.0  ;;  %v5271_v38 = vmul.f32 0.2, %v6465_v10  ;;  %v6470_v41 = vadd.f32 %v4745_v39, %v8486_v11  ;;  %v4747_v63 = vpop.f32.mrb[55].mxu1 }
 0x29b   : > { %v6321_v40 = vpack.c.bf16 %v5333_v37, %v5332_v33  ;;  %v5334_v57 = vsel %vm5206_vm10, %v6463_v5, %v5270_v34  ;;  %v6472_v1 = vadd.f32 %v4747_v63, %v8488_v13 }
 0x29c   : > { %v5335_v58 = vsel %vm5207_vm11, %v6465_v10, %v5271_v38  ;;  %v5127_v42 = vpop.f32.mrb[52].mxu0 }
 0x29d   : > { %5564 = vst [vmem:[%s8501_s4 + $0xc0] sm:$0xff] %v6321_v40  ;;  %v6322_v59 = vpack.c.bf16 %v5335_v58, %v5334_v57  ;;  %v6467_v48 = vadd.f32 %v6466_v35, %v5127_v42  ;;  %v5129_v6 = vpop.f32.mrb[53].mxu0 }
 0x29e   : > { %v6469_v43 = vadd.f32 %v6468_v56, %v5129_v6  ;;  %v5131_v49 = vpop.f32.mrb[54].mxu0 }
 0x29f   : > { %5565 = vst [vmem:[%s8501_s4 + $0xc8] sm:$0xff] %v6322_v59  ;;  %vm5208_vm12 = vcmp.ge.f32.partialorder %v6467_v48, 0.0  ;;  %v5272_v8 = vmul.f32 0.2, %v6467_v48  ;;  %v6471_v9 = vadd.f32 %v6470_v41, %v5131_v49  ;;  %v5133_v50 = vpop.f32.mrb[55].mxu0  ;;  %v4751_v51 = vpop.f32.mrb[56].mxu1 }
 0x2a0   : > { %vm5209_vm13 = vcmp.ge.f32.partialorder %v6469_v43, 0.0  ;;  %v5273_v14 = vmul.f32 0.2, %v6469_v43  ;;  %v6473_v15 = vadd.f32 %v6472_v1, %v5133_v50  ;;  %v6474_v60 = vadd.f32 %v4751_v51, %v8486_v11  ;;  %v4753_v17 = vpop.f32.mrb[57].mxu1 }
 0x2a1   : > { %v5336_v16 = vsel %vm5208_vm12, %v6467_v48, %v5272_v8  ;;  %vm5210_vm14 = vcmp.ge.f32.partialorder %v6471_v9, 0.0  ;;  %v5274_v44 = vmul.f32 0.2, %v6471_v9  ;;  %v6476_v19 = vadd.f32 %v4753_v17, %v8488_v13  ;;  %v4755_v20 = vpop.f32.mrb[58].mxu1 }
 0x2a2   : > { %v5337_v18 = vsel %vm5209_vm13, %v6469_v43, %v5273_v14  ;;  %vm5211_vm15 = vcmp.ge.f32.partialorder %v6473_v15, 0.0  ;;  %v5275_v61 = vmul.f32 0.2, %v6473_v15  ;;  %v6478_v22 = vadd.f32 %v4755_v20, %v8486_v11  ;;  %v4757_v0 = vpop.f32.mrb[59].mxu1 }
 0x2a3   : > { %v6323_v62 = vpack.c.bf16 %v5337_v18, %v5336_v16  ;;  %v5338_v21 = vsel %vm5210_vm14, %v6471_v9, %v5274_v44  ;;  %v6480_v25 = vadd.f32 %v4757_v0, %v8488_v13 }
 0x2a4   : > { %v5339_v23 = vsel %vm5211_vm15, %v6473_v15, %v5275_v61  ;;  %v5137_v24 = vpop.f32.mrb[56].mxu0 }
 0x2a5   : > { %5566 = vst [vmem:[%s8501_s4 + $0xd0] sm:$0xff] %v6323_v62  ;;  %v6324_v4 = vpack.c.bf16 %v5339_v23, %v5338_v21  ;;  %v6475_v52 = vadd.f32 %v6474_v60, %v5137_v24  ;;  %v5139_v12 = vpop.f32.mrb[57].mxu0 }
 0x2a6   : > { %v6477_v26 = vadd.f32 %v6476_v19, %v5139_v12  ;;  %v5141_v53 = vpop.f32.mrb[58].mxu0 }
 0x2a7   : > { %5567 = vst [vmem:[%s8501_s4 + $0xd8] sm:$0xff] %v6324_v4  ;;  %vm5212_vm0 = vcmp.ge.f32.partialorder %v6475_v52, 0.0  ;;  %v5276_v45 = vmul.f32 0.2, %v6475_v52  ;;  %v6479_v27 = vadd.f32 %v6478_v22, %v5141_v53  ;;  %v5143_v54 = vpop.f32.mrb[59].mxu0  ;;  %v4761_v46 = vpop.f32.mrb[60].mxu1 }
 0x2a8   : > { %vm5213_vm1 = vcmp.ge.f32.partialorder %v6477_v26, 0.0  ;;  %v5277_v28 = vmul.f32 0.2, %v6477_v26  ;;  %v6481_v2 = vadd.f32 %v6480_v25, %v5143_v54  ;;  %v6482_v29 = vadd.f32 %v4761_v46, %v8486_v11  ;;  %v4763_v30 = vpop.f32.mrb[61].mxu1 }
 0x2a9   : > { %v5340_v55 = vsel %vm5212_vm0, %v6475_v52, %v5276_v45  ;;  %vm5214_vm2 = vcmp.ge.f32.partialorder %v6479_v27, 0.0  ;;  %v5278_v3 = vmul.f32 0.2, %v6479_v27  ;;  %v6484_v31 = vadd.f32 %v4763_v30, %v8488_v13  ;;  %v4765_v32 = vpop.f32.mrb[62].mxu1 }
 0x2aa   : > { %v5341_v47 = vsel %vm5213_vm1, %v6477_v26, %v5277_v28  ;;  %vm5215_vm3 = vcmp.ge.f32.partialorder %v6481_v2, 0.0  ;;  %v5279_v5 = vmul.f32 0.2, %v6481_v2  ;;  %v6486_v33 = vadd.f32 %v4765_v32, %v8486_v11  ;;  %v4767_v34 = vpop.f32.mrb[63].mxu1 }
 0x2ab   : > { %v6325_v10 = vpack.c.bf16 %v5341_v47, %v5340_v55  ;;  %v5342_v7 = vsel %vm5214_vm2, %v6479_v27, %v5278_v3  ;;  %v6488_v37 = vadd.f32 %v4767_v34, %v8488_v13 }
 0x2ac   : > { %v5343_v35 = vsel %vm5215_vm3, %v6481_v2, %v5279_v5  ;;  %v5147_v36 = vpop.f32.mrb[60].mxu0 }
 0x2ad   : > { %5568 = vst [vmem:[%s8501_s4 + $0xe0] sm:$0xff] %v6325_v10  ;;  %v6326_v38 = vpack.c.bf16 %v5343_v35, %v5342_v7  ;;  %v6483_v56 = vadd.f32 %v6482_v29, %v5147_v36  ;;  %v5149_v39 = vpop.f32.mrb[61].mxu0 }
 0x2ae   : > { %v6485_v40 = vadd.f32 %v6484_v31, %v5149_v39  ;;  %v5151_v57 = vpop.f32.mrb[62].mxu0 }
 0x2af   : > { %5569 = vst [vmem:[%s8501_s4 + $0xe8] sm:$0xff] %v6326_v38  ;;  %vm5216_vm4 = vcmp.ge.f32.partialorder %v6483_v56, 0.0  ;;  %v5280_v41 = vmul.f32 0.2, %v6483_v56  ;;  %v6487_v63 = vadd.f32 %v6486_v33, %v5151_v57  ;;  %v5153_v58 = vpop.f32.mrb[63].mxu0 }
 0x2b0   : > { %vm5217_vm5 = vcmp.ge.f32.partialorder %v6485_v40, 0.0  ;;  %v5281_v11 = vmul.f32 0.2, %v6485_v40  ;;  %v6489_v42 = vadd.f32 %v6488_v37, %v5153_v58 }
 0x2b1   : > { %v5344_v1 = vsel %vm5216_vm4, %v6483_v56, %v5280_v41  ;;  %vm5218_vm6 = vcmp.ge.f32.partialorder %v6487_v63, 0.0  ;;  %v5282_v13 = vmul.f32 0.2, %v6487_v63 }
 0x2b2   : > { %v5345_v59 = vsel %vm5217_vm5, %v6485_v40, %v5281_v11  ;;  %vm5219_vm7 = vcmp.ge.f32.partialorder %v6489_v42, 0.0  ;;  %v5283_v48 = vmul.f32 0.2, %v6489_v42 }
 0x2b3   : > { %v6327_v6 = vpack.c.bf16 %v5345_v59, %v5344_v1  ;;  %v5346_v43 = vsel %vm5218_vm6, %v6487_v63, %v5282_v13 }
 0x2b4   : > { %v5347_v49 = vsel %vm5219_vm7, %v6489_v42, %v5283_v48 }
 0x2b5   : > { %5570 = vst [vmem:[%s8501_s4 + $0xf0] sm:$0xff] %v6327_v6  ;;  %v6328_v8 = vpack.c.bf16 %v5347_v49, %v5346_v43 }
 0x2b7   : > { %5571 = vst [vmem:[%s8501_s4 + $0xf8] sm:$0xff] %v6328_v8 }
 0x2b8   : > { %7075 = shalt.err (!%p7072_p7)
}
 0x2b9   : > { %s7076_s20 = scalar_lea.hbm %s8620_s9, 4096  ;;  %s7080_s26 = scalar_lea.hbm %s8672_s3, 8192 }
 0x2ba   : > { %p7077_p8 = scmp.ne.s32.totalorder %s8620_s9, %s7076_s20  ;;  %p7081_p1 = scmp.lt.u32.totalorder %s8620_s9, %s8672_s3 }
 0x2bb   : > { %p7082_p0 = scmp.lt.u32.totalorder %s7080_s26, %s7076_s20  ;;  %p7084_p6 = scmp.lt.u32.totalorder %s7076_s20, %s8620_s9 }
 0x2bc   : > { %p7078_p11 = pnand %p7077_p8, %p8687_p9 }
 0x2bd   : > { %p7083_p5 = por %p7082_p0, %p7081_p1 }
 0x2be   : > { %p7079_p13 = pneg %p7078_p11 }
 0x2bf   : > { %p7085_p10 = por %p7084_p6, %p7083_p5 }
 0x2c1   : > { %p7086_p12 = pnand %p7085_p10, %p7079_p13 }
 0x2c3   : > { %7089 = shalt.err (!%p7086_p12)
}
 0x2c4   : > { %s7135_s29 = smov 128   ;;  %s7136_s30 = smov 8  }
 0x2c5   : > { %6687 = dma.vmem_to_hbm [thread:$0]  (%p8687_p9), %s8622_s6, 4096, %s8620_s9, %s8628_s16, %s7135_s29, %s7135_s29, %s7136_s30  }
 0x2c6 PF: > { %p6699_p2 = scmp.ge.s32.totalorder %s7128_s15, 2  ;;  %s5601_s4 = sand.u32 1, %s7116_s12  }
 0x2c7   : > { %p8688_p3 = scmp.ne.s32.totalorder %s8677_s23, 0  ;;  %s5602_s5 = scalar_lea.sflag [#allocation5], %s5601_s4 }
 0x2c9   : > { %p6694_p4 = pnand %p6699_p2, %p8688_p3 }
 0x2cb   : > { %7111 = dma.done.wait (!%p6694_p4), %s5602_s5, 4096  }
 0x2cc   : > { %7113 = vsyncadd (!%p6694_p4), %s5602_s5, 4294963200  ;;  %p14_p7 = scmp.ge.s32.totalorder %s7182_s18, 4   ;;  %s8689_s12 = smov %s7120_s13 }
 0x2cd   : > { %s8690_s13 = smov %s7124_s14  ;;  %s8691_s14 = smov %s7193_s21 }
 0x2ce   : > { %s8692_s15 = smov %s7182_s18  ;;  %16 = sbr.rel (!%p14_p7) target bundleno = 4 (0x4), region = 74 }
 0x2d5   :  { %5607 = vsyncpa [#allocation4], 1 }
 0x2d6   :  { %5609 = vsyncpa [#allocation4 + $0x1], 1 }
 0x2d7   :  { %5610 = vsyncpa [#allocation5], 1 }
 0x2d8   :  { %5612 = vsyncpa [#allocation5 + $0x1], 1 }

</bundles_post_ra>
